<compile_context>
chip_gen: v5e
topology: v5e:2x2
jax: 0.10.0
libtpu: 0.0.40
codegen_flags: <defaults>
</compile_context>

<pallas_src>
import functools
import math

import jax
import jax.numpy as jnp
from jax.experimental import pallas as pl
from jax.experimental.pallas import tpu as pltpu

_INV_SQRT2 = 1.0 / math.sqrt(2.0)
_TANH_C = math.sqrt(2.0 / math.pi)


def _gelu(h, approximate):
    if approximate:
        # tanh approximation: runs on the EUP slot instead of a long VALU
        # erf polynomial. Small deviation from PyTorch's exact GELU.
        return 0.5 * h * (1.0 + jnp.tanh(_TANH_C * (h + 0.044715 * h * h * h)))
    # exact GELU (PyTorch nn.GELU default): 0.5 * x * (1 + erf(x / sqrt(2)))
    return 0.5 * h * (1.0 + jax.lax.erf(h * _INV_SQRT2))


# ----------------------------------------------------------------------------
# Kernel
# ----------------------------------------------------------------------------
def ff_kernel(x_ref, w1_ref, b1_ref, w2_ref, b2_ref, o_ref, *,
              h_block, num_h_blocks, approximate_gelu):
    """One row-tile: o = GELU(x @ W1 + b1) @ W2 + b2 (hidden dim in slabs)."""
    tm = x_ref.shape[0]
    d = o_ref.shape[-1]
    # Per-tile operand cast only (cheap); resident weights were cast once in
    # the wrapper, NOT here.
    x = x_ref[...].astype(w1_ref.dtype)                           # (TM, D)

    def slab(j, acc):
        start = j * h_block
        if not isinstance(start, int):
            start = pl.multiple_of(start, h_block)
        w1s = w1_ref[:, pl.ds(start, h_block)]                    # (D, BH)
        b1s = b1_ref[:, pl.ds(start, h_block)]                    # (1, BH) f32
        h = jnp.dot(x, w1s, preferred_element_type=jnp.float32) + b1s
        h = _gelu(h, approximate_gelu)
        w2s = w2_ref[pl.ds(start, h_block), :]                    # (BH, D)
        return acc + jnp.dot(h.astype(w2_ref.dtype), w2s,
                             preferred_element_type=jnp.float32)

    acc0 = jnp.zeros((tm, d), jnp.float32)
    if num_h_blocks == 1:
        acc = slab(0, acc0)
    else:
        acc = jax.lax.fori_loop(0, num_h_blocks, slab, acc0, unroll=True)

    o_ref[...] = (acc + b2_ref[...]).astype(o_ref.dtype)


# ----------------------------------------------------------------------------
# Wrapper
# ----------------------------------------------------------------------------
def _round_up(x, m):
    return ((x + m - 1) // m) * m


def feed_forward(x, w1, b1, w2, b2, *, block_rows=512, hidden_block=512,
                 matmul_dtype=jnp.bfloat16, approximate_gelu=False):
    """x: (..., D); w1: (D, H); b1: (H,)/(1,H); w2: (H, D); b2: (D,)/(1,D)."""
    *lead, D = x.shape
    H = w1.shape[1]
    M = 1
    for s in lead:
        M *= s

    x2 = x.reshape(M, D)
    b1 = jnp.reshape(b1, (1, H))
    b2 = jnp.reshape(b2, (1, D))

    # Cast weights ONCE here (wrapper), not per grid step inside the kernel.
    if matmul_dtype is not None and w1.dtype != matmul_dtype:
        w1 = w1.astype(matmul_dtype)
        w2 = w2.astype(matmul_dtype)

    # Row tile: multiple of 8 sublanes, as large as block_rows allows.
    tm = min(block_rows, _round_up(M, 8))
    tm = max(8, tm - tm % 8)
    n_steps = pl.cdiv(M, tm)
    if n_steps > 1 and n_steps % 2 == 1:
        # Prefer an even step count so both v7x TensorCores get work.
        tm = max(8, _round_up(pl.cdiv(M, n_steps + 1), 8))
        n_steps = pl.cdiv(M, tm)
    grid = (n_steps,)

    # Hidden-dim slabs: keep the GELU intermediate in vregs at ViT sizes.
    if H > hidden_block and H % hidden_block == 0 and hidden_block % 128 == 0:
        h_block, num_h_blocks = hidden_block, H // hidden_block
    else:
        h_block, num_h_blocks = H, 1

    x_item = jnp.dtype(x.dtype).itemsize
    w_item = jnp.dtype(w1.dtype).itemsize
    cost = pl.CostEstimate(
        flops=4 * M * D * H,                         # two matmuls
        transcendentals=M * H,                       # one erf/tanh per hidden act
        bytes_accessed=(x_item * 2 * M * D           # x in + y out
                        + w_item * 2 * D * H         # W1 + W2 (actual dtype)
                        + 4 * (H + D)),              # f32 biases
    )

    kern = functools.partial(ff_kernel, h_block=h_block,
                             num_h_blocks=num_h_blocks,
                             approximate_gelu=approximate_gelu)

    def build(single_buffer_weights):
        resident_bufs = 1 if single_buffer_weights else 2
        vmem_need = (resident_bufs * (2 * D * H * w_item + 4 * (H + D))  # weights/biases
                     + 2 * 2 * tm * D * x_item        # x/out row tiles, double-buffered
                     + tm * h_block * 4                # GELU slab intermediate
                     + tm * D * 4)                     # f32 accumulator
        vmem_limit = int(min(64 * 2**20, max(32 * 2**20, vmem_need + 8 * 2**20)))

        if single_buffer_weights:
            def wspec(shape):
                return pl.BlockSpec(shape, lambda i: (0, 0),
                                    pipeline_mode=pl.Buffered(1))
        else:
            def wspec(shape):
                return pl.BlockSpec(shape, lambda i: (0, 0))

        return pl.pallas_call(
            kern,
            out_shape=jax.ShapeDtypeStruct((M, D), x.dtype),
            grid_spec=pltpu.PrefetchScalarGridSpec(
                num_scalar_prefetch=0,
                grid=grid,
                in_specs=[
                    pl.BlockSpec((tm, D), lambda i: (i, 0)),  # x row tile (pipelined)
                    wspec((D, H)),                            # W1 (resident)
                    wspec((1, H)),                            # b1 (resident)
                    wspec((H, D)),                            # W2 (resident)
                    wspec((1, D)),                            # b2 (resident)
                ],
                out_specs=pl.BlockSpec((tm, D), lambda i: (i, 0)),
            ),
            compiler_params=pltpu.CompilerParams(
                dimension_semantics=("parallel",),
                vmem_limit_bytes=vmem_limit,
            ),
            cost_estimate=cost,
        )

    try:
        out = jax.block_until_ready(build(True)(x2, w1, b1, w2, b2))
    except Exception:
        # pipeline_mode=pl.Buffered(1) unsupported in this build: fall back to
        # default double-buffered weight specs (still correct, more VMEM).
        out = build(False)(x2, w1, b1, w2, b2)

    return out.reshape(*lead, D)


# ----------------------------------------------------------------------------
# Demo / self-check
# ----------------------------------------------------------------------------
def _reference(x, w1, b1, w2, b2):
    h = jnp.dot(x, w1, preferred_element_type=jnp.float32) + b1
    h = jax.nn.gelu(h, approximate=False)
    return jnp.dot(h, w2, preferred_element_type=jnp.float32) + b2


if __name__ == "__main__":
    # Small but lane-dense shapes: (B, N, D) tokens, hidden = 2*D.
    B, N, dim, hidden = 2, 64, 128, 256

    key = jax.random.PRNGKey(0)
    kx, k1, k2, k3, k4 = jax.random.split(key, 5)
    x = jax.random.normal(kx, (B, N, dim), jnp.float32)
    w1 = 0.05 * jax.random.normal(k1, (dim, hidden), jnp.float32)
    b1 = 0.02 * jax.random.normal(k2, (1, hidden), jnp.float32)
    w2 = 0.05 * jax.random.normal(k3, (hidden, dim), jnp.float32)
    b2 = 0.02 * jax.random.normal(k4, (1, dim), jnp.float32)

    ref = _reference(x.reshape(-1, dim), w1, b1, w2, b2).reshape(B, N, dim)

    # 1) Default production path: bf16 MXU operands, f32 accumulation,
    #    single row tile (TM = M = 128) so there's no per-step overhead.
    out = feed_forward(x, w1, b1, w2, b2)
    out = jax.block_until_ready(out)
    assert out.shape == (B, N, dim) and out.dtype == jnp.float32
    err_bf16 = float(jnp.max(jnp.abs(out - ref)))
    assert jnp.allclose(out, ref, rtol=3e-2, atol=3e-2), err_bf16

    # 2) Bit-exact f32 path, also exercising the hidden-slab inner loop
    #    (hidden_block=128 -> 2 slabs).
    out32 = feed_forward(x, w1, b1, w2, b2, matmul_dtype=None, hidden_block=128)
    out32 = jax.block_until_ready(out32)
    err_f32 = float(jnp.max(jnp.abs(out32 - ref)))
    assert jnp.allclose(out32, ref, rtol=1e-5, atol=1e-5), err_f32

    # TODO(synk): nn.Dropout with p>0 (training mode) would need
    # pltpu.prng_seed/prng_random_bits; p=0.0 eval forward is a no-op here.
    print("KERNEL_OK")
</pallas_src>

<mosaic_0001>
module attributes {stable_mosaic.version = 11 : i64} {
  func.func @ff_kernel(%arg0: i32, %arg1: memref<128x128xf32, #tpu.memory_space<vmem>>, %arg2: memref<128x256xbf16, #tpu.memory_space<vmem>>, %arg3: memref<1x256xf32, #tpu.memory_space<vmem>>, %arg4: memref<256x128xbf16, #tpu.memory_space<vmem>>, %arg5: memref<1x128xf32, #tpu.memory_space<vmem>>, %arg6: memref<128x128xf32, #tpu.memory_space<vmem>>) attributes {dimension_semantics = [#tpu.dimension_semantics<parallel>], iteration_bounds = array<i64: 1>, scalar_prefetch = 0 : i64, scratch_operands = 0 : i64, tpu.core_type = #tpu.core_type<tc>, window_params = [{transform_indices = @transform_0, window_bounds = array<i64: 128, 128>}, {pipeline_mode = #tpu.pipeline_mode<synchronous>, transform_indices = @transform_1, window_bounds = array<i64: 128, 256>}, {pipeline_mode = #tpu.pipeline_mode<synchronous>, transform_indices = @transform_2, window_bounds = array<i64: 1, 256>}, {pipeline_mode = #tpu.pipeline_mode<synchronous>, transform_indices = @transform_3, window_bounds = array<i64: 256, 128>}, {pipeline_mode = #tpu.pipeline_mode<synchronous>, transform_indices = @transform_4, window_bounds = array<i64: 1, 128>}, {transform_indices = @transform_5, window_bounds = array<i64: 128, 128>}]} {
    %c0 = arith.constant 0 : index
    %c0_0 = arith.constant 0 : index
    %0 = vector.load %arg1[%c0, %c0_0] : memref<128x128xf32, #tpu.memory_space<vmem>>, vector<128x128xf32>
    %1 = arith.truncf %0 : vector<128x128xf32> to vector<128x128xbf16>
    %cst = arith.constant 0.000000e+00 : f32
    %2 = vector.broadcast %cst : f32 to vector<128x128xf32>
    %c0_1 = arith.constant 0 : index
    %c0_2 = arith.constant 0 : index
    %3 = vector.load %arg2[%c0_1, %c0_2] : memref<128x256xbf16, #tpu.memory_space<vmem>>, vector<128x256xbf16>
    %c0_3 = arith.constant 0 : index
    %c0_4 = arith.constant 0 : index
    %4 = vector.load %arg3[%c0_3, %c0_4] : memref<1x256xf32, #tpu.memory_space<vmem>>, vector<1x256xf32>
    %cst_5 = arith.constant dense<0.000000e+00> : vector<128x256xf32>
    %5 = tpu.matmul %1, %3, %cst_5 {dimension_numbers = #tpu.dot_dimension_numbers<[1], [0], [0], [1], [0, 0, 1, 1], [], []>} : vector<128x128xbf16>, vector<128x256xbf16>, vector<128x256xf32> -> vector<128x256xf32>
    %6 = vector.broadcast %4 : vector<1x256xf32> to vector<128x256xf32>
    %7 = arith.addf %5, %6 : vector<128x256xf32>
    %cst_6 = arith.constant 5.000000e-01 : f32
    %8 = vector.broadcast %cst_6 : f32 to vector<128x256xf32>
    %9 = arith.mulf %8, %7 : vector<128x256xf32>
    %cst_7 = arith.constant 0.707106769 : f32
    %10 = vector.broadcast %cst_7 : f32 to vector<128x256xf32>
    %11 = arith.mulf %7, %10 : vector<128x256xf32>
    %12 = math.erf %11 : vector<128x256xf32>
    %cst_8 = arith.constant 1.000000e+00 : f32
    %13 = vector.broadcast %cst_8 : f32 to vector<128x256xf32>
    %14 = arith.addf %13, %12 : vector<128x256xf32>
    %15 = arith.mulf %9, %14 : vector<128x256xf32>
    %c0_9 = arith.constant 0 : index
    %c0_10 = arith.constant 0 : index
    %16 = vector.load %arg4[%c0_9, %c0_10] : memref<256x128xbf16, #tpu.memory_space<vmem>>, vector<256x128xbf16>
    %17 = arith.truncf %15 : vector<128x256xf32> to vector<128x256xbf16>
    %cst_11 = arith.constant dense<0.000000e+00> : vector<128x128xf32>
    %18 = tpu.matmul %17, %16, %cst_11 {dimension_numbers = #tpu.dot_dimension_numbers<[1], [0], [0], [1], [0, 0, 1, 1], [], []>} : vector<128x256xbf16>, vector<256x128xbf16>, vector<128x128xf32> -> vector<128x128xf32>
    %19 = arith.addf %2, %18 : vector<128x128xf32>
    %c0_12 = arith.constant 0 : index
    %c0_13 = arith.constant 0 : index
    %20 = vector.load %arg5[%c0_12, %c0_13] : memref<1x128xf32, #tpu.memory_space<vmem>>, vector<1x128xf32>
    %21 = vector.broadcast %20 : vector<1x128xf32> to vector<128x128xf32>
    %22 = arith.addf %19, %21 : vector<128x128xf32>
    %c0_14 = arith.constant 0 : index
    %c0_15 = arith.constant 0 : index
    %23 = vector.load %arg6[%c0_14, %c0_15] : memref<128x128xf32, #tpu.memory_space<vmem>>, vector<128x128xf32>
    tpu.vector_store %arg6[%c0_14, %c0_15], %22 {strides = array<i32>} : memref<128x128xf32, #tpu.memory_space<vmem>>, vector<128x128xf32>,
    return
  }
  func.func @transform_0(%arg0: i32) -> (i32, i32) {
    %c0_i32 = arith.constant 0 : i32
    %c0_i32_0 = arith.constant 0 : i32
    return %arg0, %c0_i32 : i32, i32
  }
  func.func @transform_1(%arg0: i32) -> (i32, i32) {
    %c0_i32 = arith.constant 0 : i32
    %c0_i32_0 = arith.constant 0 : i32
    %c0_i32_1 = arith.constant 0 : i32
    return %c0_i32, %c0_i32_0 : i32, i32
  }
  func.func @transform_2(%arg0: i32) -> (i32, i32) {
    %c0_i32 = arith.constant 0 : i32
    %c0_i32_0 = arith.constant 0 : i32
    %c0_i32_1 = arith.constant 0 : i32
    return %c0_i32, %c0_i32_0 : i32, i32
  }
  func.func @transform_3(%arg0: i32) -> (i32, i32) {
    %c0_i32 = arith.constant 0 : i32
    %c0_i32_0 = arith.constant 0 : i32
    %c0_i32_1 = arith.constant 0 : i32
    return %c0_i32, %c0_i32_0 : i32, i32
  }
  func.func @transform_4(%arg0: i32) -> (i32, i32) {
    %c0_i32 = arith.constant 0 : i32
    %c0_i32_0 = arith.constant 0 : i32
    %c0_i32_1 = arith.constant 0 : i32
    return %c0_i32, %c0_i32_0 : i32, i32
  }
  func.func @transform_5(%arg0: i32) -> (i32, i32) {
    %c0_i32 = arith.constant 0 : i32
    %c0_i32_0 = arith.constant 0 : i32
    return %arg0, %c0_i32 : i32, i32
  }
}

module attributes {stable_mosaic.version = 11 : i64} {
  func.func @ff_kernel(%arg0: i32, %arg1: memref<128x128xf32, #tpu.memory_space<vmem>>, %arg2: memref<128x256xbf16, #tpu.memory_space<vmem>>, %arg3: memref<1x256xf32, #tpu.memory_space<vmem>>, %arg4: memref<256x128xbf16, #tpu.memory_space<vmem>>, %arg5: memref<1x128xf32, #tpu.memory_space<vmem>>, %arg6: memref<128x128xf32, #tpu.memory_space<vmem>>) attributes {dimension_semantics = [#tpu.dimension_semantics<parallel>], iteration_bounds = array<i64: 1>, scalar_prefetch = 0 : i64, scratch_operands = 0 : i64, tpu.core_type = #tpu.core_type<tc>, window_params = [{transform_indices = @transform_0, window_bounds = array<i64: 128, 128>}, {pipeline_mode = #tpu.pipeline_mode<synchronous>, transform_indices = @transform_1, window_bounds = array<i64: 128, 256>}, {pipeline_mode = #tpu.pipeline_mode<synchronous>, transform_indices = @transform_2, window_bounds = array<i64: 1, 256>}, {pipeline_mode = #tpu.pipeline_mode<synchronous>, transform_indices = @transform_3, window_bounds = array<i64: 256, 128>}, {pipeline_mode = #tpu.pipeline_mode<synchronous>, transform_indices = @transform_4, window_bounds = array<i64: 1, 128>}, {transform_indices = @transform_5, window_bounds = array<i64: 128, 128>}]} {
    %c0 = arith.constant 0 : index
    %c0_0 = arith.constant 0 : index
    %0 = vector.load %arg1[%c0, %c0_0] : memref<128x128xf32, #tpu.memory_space<vmem>>, vector<128x128xf32>
    %1 = arith.truncf %0 : vector<128x128xf32> to vector<128x128xbf16>
    %cst = arith.constant 0.000000e+00 : f32
    %2 = vector.broadcast %cst : f32 to vector<128x128xf32>
    %c0_1 = arith.constant 0 : index
    %c0_2 = arith.constant 0 : index
    %3 = vector.load %arg2[%c0_1, %c0_2] : memref<128x256xbf16, #tpu.memory_space<vmem>>, vector<128x256xbf16>
    %c0_3 = arith.constant 0 : index
    %c0_4 = arith.constant 0 : index
    %4 = vector.load %arg3[%c0_3, %c0_4] : memref<1x256xf32, #tpu.memory_space<vmem>>, vector<1x256xf32>
    %cst_5 = arith.constant dense<0.000000e+00> : vector<128x256xf32>
    %5 = tpu.matmul %1, %3, %cst_5 {dimension_numbers = #tpu.dot_dimension_numbers<[1], [0], [0], [1], [0, 0, 1, 1], [], []>} : vector<128x128xbf16>, vector<128x256xbf16>, vector<128x256xf32> -> vector<128x256xf32>
    %6 = vector.broadcast %4 : vector<1x256xf32> to vector<128x256xf32>
    %7 = arith.addf %5, %6 : vector<128x256xf32>
    %cst_6 = arith.constant 5.000000e-01 : f32
    %8 = vector.broadcast %cst_6 : f32 to vector<128x256xf32>
    %9 = arith.mulf %8, %7 : vector<128x256xf32>
    %cst_7 = arith.constant 0.707106769 : f32
    %10 = vector.broadcast %cst_7 : f32 to vector<128x256xf32>
    %11 = arith.mulf %7, %10 : vector<128x256xf32>
    %12 = math.erf %11 : vector<128x256xf32>
    %cst_8 = arith.constant 1.000000e+00 : f32
    %13 = vector.broadcast %cst_8 : f32 to vector<128x256xf32>
    %14 = arith.addf %13, %12 : vector<128x256xf32>
    %15 = arith.mulf %9, %14 : vector<128x256xf32>
    %c0_9 = arith.constant 0 : index
    %c0_10 = arith.constant 0 : index
    %16 = vector.load %arg4[%c0_9, %c0_10] : memref<256x128xbf16, #tpu.memory_space<vmem>>, vector<256x128xbf16>
    %17 = arith.truncf %15 : vector<128x256xf32> to vector<128x256xbf16>
    %cst_11 = arith.constant dense<0.000000e+00> : vector<128x128xf32>
    %18 = tpu.matmul %17, %16, %cst_11 {dimension_numbers = #tpu.dot_dimension_numbers<[1], [0], [0], [1], [0, 0, 1, 1], [], []>} : vector<128x256xbf16>, vector<256x128xbf16>, vector<128x128xf32> -> vector<128x128xf32>
    %19 = arith.addf %2, %18 : vector<128x128xf32>
    %c0_12 = arith.constant 0 : index
    %c0_13 = arith.constant 0 : index
    %20 = vector.load %arg5[%c0_12, %c0_13] : memref<1x128xf32, #tpu.memory_space<vmem>>, vector<1x128xf32>
    %21 = vector.broadcast %20 : vector<1x128xf32> to vector<128x128xf32>
    %22 = arith.addf %19, %21 : vector<128x128xf32>
    %c0_14 = arith.constant 0 : index
    %c0_15 = arith.constant 0 : index
    %23 = vector.load %arg6[%c0_14, %c0_15] : memref<128x128xf32, #tpu.memory_space<vmem>>, vector<128x128xf32>
    tpu.vector_store %arg6[%c0_14, %c0_15], %22 {strides = array<i32>} : memref<128x128xf32, #tpu.memory_space<vmem>>, vector<128x128xf32>,
    return
  }
  func.func @transform_0(%arg0: i32) -> (i32, i32) {
    %c0_i32 = arith.constant 0 : i32
    %c0_i32_0 = arith.constant 0 : i32
    return %arg0, %c0_i32 : i32, i32
  }
  func.func @transform_1(%arg0: i32) -> (i32, i32) {
    %c0_i32 = arith.constant 0 : i32
    %c0_i32_0 = arith.constant 0 : i32
    %c0_i32_1 = arith.constant 0 : i32
    return %c0_i32, %c0_i32_0 : i32, i32
  }
  func.func @transform_2(%arg0: i32) -> (i32, i32) {
    %c0_i32 = arith.constant 0 : i32
    %c0_i32_0 = arith.constant 0 : i32
    %c0_i32_1 = arith.constant 0 : i32
    return %c0_i32, %c0_i32_0 : i32, i32
  }
  func.func @transform_3(%arg0: i32) -> (i32, i32) {
    %c0_i32 = arith.constant 0 : i32
    %c0_i32_0 = arith.constant 0 : i32
    %c0_i32_1 = arith.constant 0 : i32
    return %c0_i32, %c0_i32_0 : i32, i32
  }
  func.func @transform_4(%arg0: i32) -> (i32, i32) {
    %c0_i32 = arith.constant 0 : i32
    %c0_i32_0 = arith.constant 0 : i32
    %c0_i32_1 = arith.constant 0 : i32
    return %c0_i32, %c0_i32_0 : i32, i32
  }
  func.func @transform_5(%arg0: i32) -> (i32, i32) {
    %c0_i32 = arith.constant 0 : i32
    %c0_i32_0 = arith.constant 0 : i32
    return %arg0, %c0_i32 : i32, i32
  }
}

</mosaic_0001>

<bundles_post_ra>
// kernel: tpu_custom_call.1
= control target key start
LH: loop header
LB: loop body
LE: loop exit
PB: predicated region body
PF: predicated region fallthrough
CT: control target
= control target key end

     0   :  { %10 = vsyncpa [#allocation3], 0  ;;  %s3781_s0 = inlined_call_operand.hbm [shape: f32[128,128], index: 0, kind: input, shape index: {}]   ;;  %s3782_s1 = inlined_call_operand.hbm [shape: bf16[128,256], index: 1, kind: input, shape index: {}]   ;;  %s3783_s2 = inlined_call_operand.hbm [shape: f32[1,256], index: 2, kind: input, shape index: {}]   ;;  %s3784_s3 = inlined_call_operand.hbm [shape: bf16[256,128], index: 3, kind: input, shape index: {}]   ;;  %s3785_s4 = inlined_call_operand.vmem [shape: f32[1,128], index: 4, kind: input, shape index: {}]   ;;  %s3786_s5 = inlined_call_operand.hbm [shape: f32[128,128], index: 5, kind: output, shape index: {}]  }
   0x1   :  { %11 = vsyncpa [#allocation6], 0 }
   0x2   :  { %12 = vsyncpa [#allocation9], 0 }
   0x3   :  { %13 = vsyncpa [#allocation4], 0  ;;  %s31_s20 = sshll.u32 %s3782_s1, 4  ;;  %s2391_s21 = smov [#allocation5]   ;;  %s32_s20 = int_to_ptr.hbm [resolvable:$true] %s31_s20 }
   0x4   :  { %s33_s22 = sshll.u32 %s2391_s21, 4  ;;  %s18_s25 = sshll.u32 %s3781_s0, 4  ;;  %s34_s22 = int_to_ptr.vmem [resolvable:$true] %s33_s22  ;;  %s19_s25 = int_to_ptr.hbm [resolvable:$true] %s18_s25 }
   0x5   :  { %s2392_s26 = smov 128   ;;  %s2393_s27 = smov 8  }
   0x6   :  { %39 = dma.hbm_to_vmem [thread:$0]  %s32_s20, 2048, %s34_s22, [#allocation6], %s2392_s26, %s2392_s26, %s2393_s27  }
   0x7   :  { %s2394_s28 = smov [#allocation2]   ;;  %s45_s1 = sshll.u32 %s3783_s2, 4  ;;  %s46_s1 = int_to_ptr.hbm [resolvable:$true] %s45_s1 }
   0x8   :  { %s20_s29 = sshll.u32 %s2394_s28, 4  ;;  %s55_s8 = sshll.u32 %s3784_s3, 4  ;;  %s21_s29 = int_to_ptr.vmem [resolvable:$true] %s20_s29  ;;  %s56_s8 = int_to_ptr.hbm [resolvable:$true] %s55_s8 }
   0x9   :  { %26 = dma.hbm_to_vmem [thread:$0]  %s19_s25, 2048, %s21_s29, [#allocation3], %s2392_s26, %s2392_s26, %s2393_s27  }
   0xa   :  { %s2395_s9 = smov [#allocation7]   ;;  %s2396_s11 = smov [#allocation8]  }
   0xb   :  { %s47_s10 = sshll.u32 %s2395_s9, 4  ;;  %s57_s12 = sshll.u32 %s2396_s11, 4  ;;  %s48_s10 = int_to_ptr.vmem [resolvable:$true] %s47_s10  ;;  %s58_s12 = int_to_ptr.vmem [resolvable:$true] %s57_s12 }
   0xc   :  { %50 = dma.hbm_to_vmem [thread:$0]  %s46_s1, 32, %s48_s10, [#allocation6]  }
   0xd   :  { %s2397_s13 = smov 64   ;;  %s2398_s2 = smov 4  }
   0xe   :  { %63 = dma.hbm_to_vmem [thread:$0]  %s56_s8, 2048, %s58_s12, [#allocation9], %s2397_s13, %s2397_s13, %s2398_s2  }
   0xf   :  { %2383 = dma.done.wait [#allocation3], 2048  }
  0x10   :  { %2384 = vsyncadd [#allocation3], 4294965248 }
  0x11   :  { %2385 = dma.done.wait [#allocation6], 2080  }
  0x12   :  { %2386 = vsyncadd [#allocation6], 4294965216 }
  0x13   :  { %2387 = dma.done.wait [#allocation9], 2048  }
  0x14   :  { %2388 = vsyncadd [#allocation9], 4294965248  ;;  %v2055_v0 = vld [vmem:[#allocation5 + $0x70] sm:$0xf]  ;;  %v2172_v1 = vld [vmem:[#allocation5 + $0x74] sm:$0xf0] }
  0x15   :  { %v2171_v2 = vld [vmem:[#allocation5 + $0x74] sm:$0xf]  ;;  %v2056_v3 = vor.u32 %v2172_v1, %v2055_v0  ;;  %v2057_v4 = vld [vmem:[#allocation5 + $0x78] sm:$0xf0]  ;;  %v2047_v5 = vld [vmem:[#allocation5 + $0x60] sm:$0xf] }
  0x16   :  { %v2170_v6 = vld [vmem:[#allocation5 + $0x64] sm:$0xf0]  ;;  %v2060_v7 = vor.u32 %v2171_v2, %v2057_v4  ;;  %v2169_v8 = vld [vmem:[#allocation5 + $0x64] sm:$0xf]  ;;  %v2049_v9 = vld [vmem:[#allocation5 + $0x68] sm:$0xf0] }
  0x17   :  { %208 = vmatpush.bf16.msra.mxu0 %v2056_v3  ;;  %v2048_v10 = vor.u32 %v2170_v6, %v2047_v5  ;;  %v2052_v11 = vor.u32 %v2169_v8, %v2049_v9  ;;  %v2039_v12 = vld [vmem:[#allocation5 + $0x50] sm:$0xf]  ;;  %v2168_v13 = vld [vmem:[#allocation5 + $0x54] sm:$0xf0]  ;;  %v2167_v14 = vld [vmem:[#allocation5 + $0x54] sm:$0xf] }
  0x18   :  { %257 = vmatpush.bf16.msra.mxu1 %v2060_v7  ;;  %v2041_v15 = vld [vmem:[#allocation5 + $0x58] sm:$0xf0]  ;;  %v2040_v16 = vor.u32 %v2168_v13, %v2039_v12  ;;  %v2031_v18 = vld [vmem:[#allocation5 + $0x40] sm:$0xf]  ;;  %v2166_v19 = vld [vmem:[#allocation5 + $0x44] sm:$0xf0] }
  0x19   :  { %v2044_v17 = vor.u32 %v2167_v14, %v2041_v15  ;;  %v2165_v20 = vld [vmem:[#allocation5 + $0x44] sm:$0xf]  ;;  %v2033_v21 = vld [vmem:[#allocation5 + $0x48] sm:$0xf0]  ;;  %v2032_v22 = vor.u32 %v2166_v19, %v2031_v18  ;;  %v2023_v24 = vld [vmem:[#allocation5 + $0x30] sm:$0xf] }
  0x1a   :  { %v2036_v23 = vor.u32 %v2165_v20, %v2033_v21  ;;  %v2164_v25 = vld [vmem:[#allocation5 + $0x34] sm:$0xf0]  ;;  %v2163_v26 = vld [vmem:[#allocation5 + $0x34] sm:$0xf]  ;;  %v2025_v27 = vld [vmem:[#allocation5 + $0x38] sm:$0xf0] }
  0x1b   :  { %209 = vmatpush.bf16.msra.mxu0 %v2048_v10  ;;  %v2024_v28 = vor.u32 %v2164_v25, %v2023_v24  ;;  %v2028_v29 = vor.u32 %v2163_v26, %v2025_v27  ;;  %v2015_v30 = vld [vmem:[#allocation5 + $0x20] sm:$0xf]  ;;  %v2162_v31 = vld [vmem:[#allocation5 + $0x24] sm:$0xf0]  ;;  %v2161_v32 = vld [vmem:[#allocation5 + $0x24] sm:$0xf] }
  0x1c   :  { %258 = vmatpush.bf16.msra.mxu1 %v2052_v11  ;;  %v2017_v33 = vld [vmem:[#allocation5 + $0x28] sm:$0xf0]  ;;  %v2016_v34 = vor.u32 %v2162_v31, %v2015_v30  ;;  %v2007_v36 = vld [vmem:[#allocation5 + $0x10] sm:$0xf]  ;;  %v2160_v37 = vld [vmem:[#allocation5 + $0x14] sm:$0xf0] }
  0x1d   :  { %v2020_v35 = vor.u32 %v2161_v32, %v2017_v33  ;;  %v2159_v38 = vld [vmem:[#allocation5 + $0x14] sm:$0xf]  ;;  %v2009_v39 = vld [vmem:[#allocation5 + $0x18] sm:$0xf0]  ;;  %v2008_v40 = vor.u32 %v2160_v37, %v2007_v36  ;;  %v1999_v42 = vld [vmem:[#allocation5] sm:$0xf] }
  0x1e   :  { %v2012_v41 = vor.u32 %v2159_v38, %v2009_v39  ;;  %v2158_v43 = vld [vmem:[#allocation5 + $0x4] sm:$0xf0]  ;;  %v2157_v44 = vld [vmem:[#allocation5 + $0x4] sm:$0xf]  ;;  %v2001_v45 = vld [vmem:[#allocation5 + $0x8] sm:$0xf0] }
  0x1f   :  { %210 = vmatpush.bf16.msra.mxu0 %v2040_v16  ;;  %v2000_v46 = vor.u32 %v2158_v43, %v1999_v42  ;;  %v82_v47 = vld [vmem:[#allocation2] sm:$0xff]  ;;  %v83_v48 = vld [vmem:[#allocation2 + $0x8] sm:$0xff]  ;;  %v2004_v49 = vor.u32 %v2157_v44, %v2001_v45  ;;  %v84_v51 = vld [vmem:[#allocation2 + $0x10] sm:$0xff]  ;;  %s1982_s18 = sshll.u32 %s3786_s5, 4  ;;  %s1983_s18 = int_to_ptr.hbm [resolvable:$true] %s1982_s18 }
  0x20   :  { %259 = vmatpush.bf16.msra.mxu1 %v2044_v17  ;;  %v98_v50 = vpack.c.bf16 %v83_v48, %v82_v47  ;;  %v85_v52 = vld [vmem:[#allocation2 + $0x18] sm:$0xff]  ;;  %v86_v54 = vld [vmem:[#allocation2 + $0x20] sm:$0xff]  ;;  %v87_v55 = vld [vmem:[#allocation2 + $0x28] sm:$0xff] }
  0x21   :  { %v99_v53 = vpack.c.bf16 %v85_v52, %v84_v51  ;;  %v100_v56 = vpack.c.bf16 %v87_v55, %v86_v54  ;;  %v88_v57 = vld [vmem:[#allocation2 + $0x30] sm:$0xff]  ;;  %v89_v58 = vld [vmem:[#allocation2 + $0x38] sm:$0xff]  ;;  %v90_v60 = vld [vmem:[#allocation2 + $0x40] sm:$0xff] }
  0x22   :  { %v101_v59 = vpack.c.bf16 %v89_v58, %v88_v57  ;;  %v91_v61 = vld [vmem:[#allocation2 + $0x48] sm:$0xff]  ;;  %v92_v63 = vld [vmem:[#allocation2 + $0x50] sm:$0xff]  ;;  %v93_v0 = vld [vmem:[#allocation2 + $0x58] sm:$0xff] }
  0x23   :  { %211 = vmatpush.bf16.msra.mxu0 %v2032_v22  ;;  %v102_v62 = vpack.c.bf16 %v91_v61, %v90_v60  ;;  %v103_v1 = vpack.c.bf16 %v93_v0, %v92_v63  ;;  %v94_v2 = vld [vmem:[#allocation2 + $0x60] sm:$0xff]  ;;  %v95_v3 = vld [vmem:[#allocation2 + $0x68] sm:$0xff]  ;;  %v96_v5 = vld [vmem:[#allocation2 + $0x70] sm:$0xff] }
  0x24   :  { %260 = vmatpush.bf16.msra.mxu1 %v2036_v23  ;;  %v104_v4 = vpack.c.bf16 %v95_v3, %v94_v2  ;;  %v97_v6 = vld [vmem:[#allocation2 + $0x78] sm:$0xff]  ;;  %v122_v8 = vld [vmem:[#allocation7] sm:$0x3]  ;;  %v2178_v26 = vld [vmem:[#allocation8 + $0x28] sm:$0xff] }
  0x25   :  { %v105_v7 = vpack.c.bf16 %v97_v6, %v96_v5  ;;  %v2448_v9 = vperm.slane %v122_v8, 0  ;;  %v2450_v11 = vperm.slane %v122_v8, 1  ;;  %v2180_v13 = vld [vmem:[#allocation8 + $0x38] sm:$0xff]  ;;  %v2179_v17 = vld [vmem:[#allocation8 + $0x30] sm:$0xff]  ;;  %v2177_v33 = vld [vmem:[#allocation8 + $0x20] sm:$0xff] }
  0x26   :  { %v2188_v14 = vld [vmem:[#allocation8 + $0x78] sm:$0xff]  ;;  %1862 = vmatpush.bf16.msra.mxu2 %v2180_v13  ;;  %v2187_v18 = vld [vmem:[#allocation8 + $0x70] sm:$0xff]  ;;  %v2182_v2 = vld [vmem:[#allocation8 + $0x48] sm:$0xff] }
  0x27   :  { %212 = vmatpush.bf16.msra.mxu0 %v2024_v28  ;;  %1911 = vmatpush.bf16.msra.mxu3 %v2188_v14  ;;  %v2176_v44 = vld [vmem:[#allocation8 + $0x18] sm:$0xff]  ;;  %v2175_v52 = vld [vmem:[#allocation8 + $0x10] sm:$0xff] }
  0x28   :  { %261 = vmatpush.bf16.msra.mxu1 %v2028_v29  ;;  %v2186_v29 = vld [vmem:[#allocation8 + $0x68] sm:$0xff]  ;;  %v2184_v45 = vld [vmem:[#allocation8 + $0x58] sm:$0xff] }
  0x2a   :  { %1863 = vmatpush.bf16.msra.mxu2 %v2179_v17 }
  0x2b   :  { %213 = vmatpush.bf16.msra.mxu0 %v2016_v34  ;;  %1912 = vmatpush.bf16.msra.mxu3 %v2187_v18  ;;  %v2185_v34 = vld [vmem:[#allocation8 + $0x60] sm:$0xff] }
  0x2c   :  { %262 = vmatpush.bf16.msra.mxu1 %v2020_v35 }
  0x2e   :  { %1864 = vmatpush.bf16.msra.mxu2 %v2178_v26 }
  0x2f   :  { %214 = vmatpush.bf16.msra.mxu0 %v2008_v40  ;;  %1913 = vmatpush.bf16.msra.mxu3 %v2186_v29 }
  0x30   :  { %263 = vmatpush.bf16.msra.mxu1 %v2012_v41 }
  0x32   :  { %1865 = vmatpush.bf16.msra.mxu2 %v2177_v33 }
  0x33   :  { %215 = vmatpush.bf16.msra.mxu0 %v2000_v46  ;;  %1914 = vmatpush.bf16.msra.mxu3 %v2185_v34 }
  0x34   :  { %264 = vmatpush.bf16.msra.mxu1 %v2004_v49 }
  0x36   :  { %216 = vmatmul.bf16.vlgmr.msra.gmra.mxu0 %v98_v50  ;;  %1866 = vmatpush.bf16.msra.mxu2 %v2176_v44 }
  0x37   :  { %265 = vmatmul.bf16.vlgmr.msra.gmra.mxu1 %v98_v50  ;;  %1915 = vmatpush.bf16.msra.mxu3 %v2184_v45 }
  0x3a   :  { %1867 = vmatpush.bf16.msra.mxu2 %v2175_v52 }
  0x46   :  { %221 = vmatmul.bf16.gmra.mxu0 %v99_v53 }
  0x47   :  { %270 = vmatmul.bf16.gmra.mxu1 %v99_v53 }
  0x56   :  { %226 = vmatmul.bf16.gmra.mxu0 %v100_v56 }
  0x57   :  { %275 = vmatmul.bf16.gmra.mxu1 %v100_v56  ;;  %v2183_v56 = vld [vmem:[#allocation8 + $0x50] sm:$0xff] }
  0x58   :  { %1916 = vmatpush.bf16.msra.mxu3 %v2183_v56 }
  0x5c   :  { %1917 = vmatpush.bf16.msra.mxu3 %v2182_v2 }
  0x66   :  { %231 = vmatmul.bf16.gmra.mxu0 %v101_v59 }
  0x67   :  { %280 = vmatmul.bf16.gmra.mxu1 %v101_v59 }
  0x76   :  { %236 = vmatmul.bf16.gmra.mxu0 %v102_v62 }
  0x77   :  { %285 = vmatmul.bf16.gmra.mxu1 %v102_v62 }
  0x86   :  { %241 = vmatmul.bf16.gmra.mxu0 %v103_v1 }
  0x87   :  { %290 = vmatmul.bf16.gmra.mxu1 %v103_v1  ;;  %v2174_v1 = vld [vmem:[#allocation8 + $0x8] sm:$0xff] }
  0x88   :  { %1868 = vmatpush.bf16.msra.mxu2 %v2174_v1 }
  0x96   :  { %246 = vmatmul.bf16.gmra.mxu0 %v104_v4 }
  0x97   :  { %295 = vmatmul.bf16.gmra.mxu1 %v104_v4 }
  0xa6   :  { %251 = vmatmul.bf16.gmra.mxu0 %v105_v7 }
  0xa7   :  { %300 = vmatmul.bf16.gmra.mxu1 %v105_v7 }
  0xb3   :  { %v217_v10 = vpop.f32.mrf.mxu0 }
  0xb4   :  { %v266_v12 = vpop.f32.mrf.mxu1  ;;  %v2453_v15 = vadd.f32 %v217_v10, %v2448_v9 }
  0xb5   :  { %v2456_v16 = vadd.f32 %v266_v12, %v2450_v11 }
  0xb6   :  { %v2459_v19 = vmul.f32 0.70710677, %v2453_v15 }
  0xb7   :  { %v2462_v21 = vmul.f32 0.70710677, %v2456_v16 }
  0xb8   :  { %v370_v25 = vmul.f32 %v2459_v19, %v2459_v19 }
  0xb9   :  { %v410_v27 = vmul.f32 %v2462_v21, %v2462_v21 }
  0xba   :  { %v2480_v31 = vmin.f32 %v370_v25, 16.0  ;;  %v2181_v25 = vld [vmem:[#allocation8 + $0x40] sm:$0xff] }
  0xbb   :  { %v219_v20 = vpop.f32.mrf.mxu0  ;;  %v2482_v35 = vmin.f32 %v410_v27, 16.0  ;;  %1918 = vmatpush.bf16.msra.mxu3 %v2181_v25  ;;  %v2582_v25 = vmul.f32 0.5, %v2453_v15 }
  0xbc   :  { %v2465_v22 = vadd.f32 %v219_v20, %v2448_v9  ;;  %v268_v23 = vpop.f32.mrf.mxu1  ;;  %v372_v40 = vmul.f32 2.1237322e-06, %v2480_v31  ;;  %v383_v48 = vmul.f32 3.8918573e-05, %v2480_v31 }
  0xbd   :  { %v2468_v24 = vadd.f32 %v268_v23, %v2450_v11  ;;  %v412_v42 = vmul.f32 2.1237322e-06, %v2482_v35  ;;  %v2173_v23 = vld [vmem:[#allocation8] sm:$0xff] }
  0xbe   :  { %v2475_v28 = vmul.f32 0.70710677, %v2465_v22  ;;  %v373_v49 = vadd.f32 0.00028619796, %v372_v40  ;;  %v384_v3 = vadd.f32 0.001143296, %v383_v48  ;;  %1869 = vmatpush.bf16.msra.mxu2 %v2173_v23 }
  0xbf   :  { %v2478_v30 = vmul.f32 0.70710677, %v2468_v24  ;;  %v413_v53 = vadd.f32 0.00028619796, %v412_v42 }
  0xc0   :  { %v450_v36 = vmul.f32 %v2475_v28, %v2475_v28  ;;  %v374_v61 = vmul.f32 %v373_v49, %v2480_v31  ;;  %v385_v26 = vmul.f32 %v384_v3, %v2480_v31 }
  0xc1   :  { %v490_v38 = vmul.f32 %v2478_v30, %v2478_v30  ;;  %v414_v63 = vmul.f32 %v413_v53, %v2482_v35 }
  0xc2   :  { %v2496_v43 = vmin.f32 %v450_v36, 16.0  ;;  %v375_v8 = vadd.f32 0.0036580483, %v374_v61  ;;  %v386_v44 = vadd.f32 0.014752088, %v385_v26 }
  0xc3   :  { %v222_v32 = vpop.f32.mrf.mxu0  ;;  %v2498_v46 = vmin.f32 %v490_v38, 16.0  ;;  %v415_v14 = vadd.f32 0.0036580483, %v414_v63 }
  0xc4   :  { %v271_v37 = vpop.f32.mrf.mxu1  ;;  %v2489_v39 = vadd.f32 %v222_v32, %v2448_v9  ;;  %v452_v54 = vmul.f32 2.1237322e-06, %v2496_v43  ;;  %v387_v3 = vmul.f32 %v386_v44, %v2480_v31 }
  0xc5   :  { %v2493_v41 = vadd.f32 %v271_v37, %v2450_v11  ;;  %v492_v57 = vmul.f32 2.1237322e-06, %v2498_v46  ;;  %v376_v37 = vmul.f32 %v375_v8, %v2480_v31  ;;  %v416_v40 = vmul.f32 %v415_v14, %v2482_v35 }
  0xc6   :  { %v2501_v47 = vmul.f32 0.70710677, %v2489_v39  ;;  %v453_v0 = vadd.f32 0.00028619796, %v452_v54 }
  0xc7   :  { %v2505_v50 = vmul.f32 0.70710677, %v2493_v41  ;;  %v493_v4 = vadd.f32 0.00028619796, %v492_v57 }
  0xc8   :  { %v530_v58 = vmul.f32 %v2501_v47, %v2501_v47  ;;  %v454_v27 = vmul.f32 %v453_v0, %v2496_v43 }
  0xc9   :  { %v570_v62 = vmul.f32 %v2505_v50, %v2505_v50  ;;  %v494_v29 = vmul.f32 %v493_v4, %v2498_v46 }
  0xca   :  { %v2521_v5 = vmin.f32 %v530_v58, 16.0  ;;  %v455_v45 = vadd.f32 0.0036580483, %v454_v27  ;;  %v417_v58 = vadd.f32 0.05243302, %v416_v40 }
  0xcb   :  { %v224_v51 = vpop.f32.mrf.mxu0  ;;  %v2529_v10 = vmin.f32 %v570_v62, 16.0  ;;  %v495_v48 = vadd.f32 0.0036580483, %v494_v29  ;;  %v388_v40 = vadd.f32 0.112945676, %v387_v3 }
  0xcc   :  { %v273_v55 = vpop.f32.mrf.mxu1  ;;  %v2512_v59 = vadd.f32 %v224_v51, %v2448_v9  ;;  %v532_v32 = vmul.f32 2.1237322e-06, %v2521_v5  ;;  %v456_v0 = vmul.f32 %v455_v45, %v2496_v43  ;;  %v418_v26 = vmul.f32 %v417_v58, %v2482_v35 }
  0xcd   :  { %v2515_v60 = vadd.f32 %v273_v55, %v2450_v11  ;;  %v572_v38 = vmul.f32 2.1237322e-06, %v2529_v10  ;;  %v377_v55 = vadd.f32 0.05243302, %v376_v37  ;;  %v496_v4 = vmul.f32 %v495_v48, %v2498_v46 }
  0xce   :  { %v2524_v6 = vmul.f32 0.70710677, %v2512_v59  ;;  %v533_v49 = vadd.f32 0.00028619796, %v532_v32  ;;  %v2590_v32 = vmul.f32 0.5, %v2456_v16  ;;  %v2593_v37 = vmul.f32 0.5, %v2465_v22 }
  0xcf   :  { %v2527_v7 = vmul.f32 0.70710677, %v2515_v60  ;;  %v573_v56 = vadd.f32 0.00028619796, %v572_v38  ;;  %v378_v14 = vmul.f32 %v377_v55, %v2480_v31  ;;  %v457_v44 = vadd.f32 0.05243302, %v456_v0 }
  0xd0   :  { %v610_v12 = vmul.f32 %v2524_v6, %v2524_v6  ;;  %v534_v1 = vmul.f32 %v533_v49, %v2521_v5  ;;  %v497_v45 = vadd.f32 0.05243302, %v496_v4  ;;  %v419_v16 = vadd.f32 0.18741608, %v418_v26 }
  0xd1   :  { %v650_v17 = vmul.f32 %v2527_v7, %v2527_v7  ;;  %v379_v49 = vadd.f32 0.18741608, %v378_v14  ;;  %v458_v0 = vmul.f32 %v457_v44, %v2496_v43 }
  0xd2   :  { %v2542_v33 = vmin.f32 %v610_v12, 16.0  ;;  %v535_v38 = vadd.f32 0.0036580483, %v534_v1  ;;  %v498_v1 = vmul.f32 %v497_v45, %v2498_v46  ;;  %v420_v26 = vmul.f32 %v419_v16, %v2482_v35 }
  0xd3   :  { %v227_v13 = vpop.f32.mrf.mxu0  ;;  %v2544_v34 = vmin.f32 %v650_v17, 16.0  ;;  %v574_v17 = vmul.f32 %v573_v56, %v2529_v10 }
  0xd4   :  { %v2536_v18 = vadd.f32 %v227_v13, %v2448_v9  ;;  %v276_v20 = vpop.f32.mrf.mxu1  ;;  %v612_v51 = vmul.f32 2.1237322e-06, %v2542_v33  ;;  %v536_v58 = vmul.f32 %v535_v38, %v2521_v5 }
  0xd5   :  { %v2547_v36 = vadd.f32 %v276_v20, %v2450_v11  ;;  %v652_v52 = vmul.f32 2.1237322e-06, %v2544_v34 }
  0xd6   :  { %v2553_v42 = vmul.f32 0.70710677, %v2536_v18  ;;  %v613_v8 = vadd.f32 0.00028619796, %v612_v51  ;;  %v575_v51 = vadd.f32 0.0036580483, %v574_v17 }
  0xd7   :  { %v2560_v54 = vmul.f32 0.70710677, %v2547_v36  ;;  %v653_v12 = vadd.f32 0.00028619796, %v652_v52 }
  0xd8   :  { %v690_v53 = vmul.f32 %v2553_v42, %v2553_v42  ;;  %v614_v15 = vmul.f32 %v613_v8, %v2542_v33 }
  0xd9   :  { %v730_v62 = vmul.f32 %v2560_v54, %v2560_v54  ;;  %v654_v48 = vmul.f32 %v653_v12, %v2544_v34  ;;  %v2613_v12 = vmul.f32 0.5, %v2489_v39 }
  0xda   :  { %v2562_v61 = vmin.f32 %v690_v53, 16.0  ;;  %v615_v3 = vadd.f32 0.0036580483, %v614_v15  ;;  %v459_v15 = vadd.f32 0.18741608, %v458_v0 }
  0xdb   :  { %v229_v57 = vpop.f32.mrf.mxu0  ;;  %v2573_v13 = vmin.f32 %v730_v62, 16.0  ;;  %v655_v4 = vadd.f32 0.0036580483, %v654_v48  ;;  %3798 = vst [vmem:[#allocation17_spill] sm:$0xff] %v2613_v12  ;;  %v499_v48 = vadd.f32 0.18741608, %v498_v1 }
  0xdc   :  { %v278_v63 = vpop.f32.mrf.mxu1  ;;  %v2569_v2 = vadd.f32 %v229_v57, %v2448_v9  ;;  %v692_v20 = vmul.f32 2.1237322e-06, %v2562_v61  ;;  %v2603_v57 = vmul.f32 0.5, %v2468_v24  ;;  %v576_v24 = vmul.f32 %v575_v51, %v2529_v10 }
  0xdd   :  { %3796 = vst [vmem:[#allocation15_spill] sm:$0xff] %v2573_v13  ;;  %v732_v27 = vmul.f32 2.1237322e-06, %v2573_v13  ;;  %v2587_v29 = vadd.f32 %v278_v63, %v2450_v11  ;;  %v389_v63 = vmul.f32 %v388_v40, %v2480_v31  ;;  %v537_v40 = vadd.f32 0.05243302, %v536_v58 }
  0xde   :  { %v2579_v23 = vmul.f32 0.70710677, %v2569_v2  ;;  %v693_v52 = vadd.f32 0.00028619796, %v692_v20  ;;  %v380_v20 = vmul.f32 %v379_v49, %v2480_v31  ;;  %v616_v51 = vmul.f32 %v615_v3, %v2542_v33 }
  0xdf   :  { %v733_v56 = vadd.f32 0.00028619796, %v732_v27  ;;  %v2600_v22 = vmul.f32 0.70710677, %v2587_v29  ;;  %v390_v45 = vadd.f32 0.4994258, %v389_v63  ;;  %v656_v49 = vmul.f32 %v655_v4, %v2544_v34 }
  0xe0   :  { %v770_v53 = vmul.f32 %v2579_v23, %v2579_v23  ;;  %v694_v14 = vmul.f32 %v693_v52, %v2562_v61  ;;  %v577_v52 = vadd.f32 0.05243302, %v576_v24  ;;  %v381_v16 = vadd.f32 1.1283791, %v380_v20 }
  0xe1   :  { %3797 = vst [vmem:[#allocation16_spill] sm:$0xff] %v2600_v22  ;;  %v734_v27 = vmul.f32 %v733_v56, %v2573_v13  ;;  %v810_v38 = vmul.f32 %v2600_v22, %v2600_v22  ;;  %v2634_v56 = vmul.f32 0.5, %v2493_v41  ;;  %v391_v3 = vmul.f32 %v390_v45, %v2480_v31 }
  0xe2   :  { %v2617_v17 = vmin.f32 %v770_v53, 16.0  ;;  %v695_v53 = vadd.f32 0.0036580483, %v694_v14  ;;  %v421_v4 = vadd.f32 1.1283791, %v420_v26  ;;  %v460_v24 = vmul.f32 %v459_v15, %v2496_v43 }
  0xe3   :  { %v232_v55 = vpop.f32.mrf.mxu0  ;;  %3800 = vst [vmem:[#allocation19_spill] sm:$0xff] %v2634_v56  ;;  %v735_v58 = vadd.f32 0.0036580483, %v734_v27  ;;  %v2636_v12 = vmin.f32 %v810_v38, 16.0  ;;  %v617_v14 = vadd.f32 0.05243302, %v616_v51  ;;  %v500_v20 = vmul.f32 %v499_v48, %v2498_v46 }
  0xe4   :  { %v2607_v62 = vadd.f32 %v232_v55, %v2448_v9  ;;  %v281_v8 = vpop.f32.mrf.mxu1  ;;  %v772_v55 = vmul.f32 2.1237322e-06, %v2617_v17  ;;  %v657_v41 = vadd.f32 0.05243302, %v656_v49  ;;  %v578_v27 = vmul.f32 %v577_v52, %v2529_v10 }
  0xe5   :  { %v2628_v39 = vadd.f32 %v281_v8, %v2450_v11  ;;  %v538_v8 = vmul.f32 %v537_v40, %v2521_v5  ;;  %v696_v38 = vmul.f32 %v695_v53, %v2562_v61  ;;  %v2650_v56 = vmul.f32 %v381_v16, %v2459_v19 }
  0xe6   :  { %v2625_v44 = vmul.f32 0.70710677, %v2607_v62  ;;  %v773_v40 = vadd.f32 0.00028619796, %v772_v55  ;;  %v812_v22 = vmul.f32 2.1237322e-06, %v2636_v12  ;;  %v618_v19 = vmul.f32 %v617_v14, %v2542_v33 }
  0xe7   :  { %v2642_v0 = vmul.f32 0.70710677, %v2628_v39  ;;  %v539_v26 = vadd.f32 0.18741608, %v538_v8  ;;  %v2661_v48 = vadd.f32 1.0, %v391_v3  ;;  %v2664_v49 = vmul.f32 0.5, %v2512_v59 }
  0xe8   :  { %3799 = vst [vmem:[#allocation18_spill] sm:$0xff] %v2625_v44  ;;  %v850_v63 = vmul.f32 %v2625_v44, %v2625_v44  ;;  %v736_v44 = vmul.f32 %v735_v58, %v2573_v13  ;;  %v461_v51 = vadd.f32 1.1283791, %v460_v24  ;;  %v658_v52 = vmul.f32 %v657_v41, %v2544_v34 }
  0xe9   :  { %v890_v15 = vmul.f32 %v2642_v0, %v2642_v0  ;;  %3801 = vst [vmem:[#allocation20_spill] sm:$0xff] %v2664_v49  ;;  %v501_v53 = vadd.f32 1.1283791, %v500_v20  ;;  %v579_v55 = vadd.f32 0.18741608, %v578_v27  ;;  %v774_v58 = vmul.f32 %v773_v40, %v2617_v17 }
  0xea   :  { %v2657_v45 = vmin.f32 %v850_v63, 16.0  ;;  %v697_v16 = vadd.f32 0.05243302, %v696_v38  ;;  %v2670_v63 = vmul.f32 %v421_v4, %v2462_v21  ;;  %v813_v3 = vadd.f32 0.00028619796, %v812_v22 }
  0xeb   :  { %v234_v1 = vpop.f32.mrf.mxu0  ;;  %v540_v59 = vmul.f32 %v539_v26, %v2521_v5  ;;  %v2677_v49 = vmin.f32 %v890_v15, 16.0  ;;  %2199 = vrcp.f32 %v2661_v48  ;;  %v619_v41 = vadd.f32 0.18741608, %v618_v19 }
  0xec   :  { %v2655_v31 = vadd.f32 %v234_v1, %v2448_v9  ;;  %v283_v8 = vpop.f32.mrf.mxu1  ;;  %v737_v1 = vadd.f32 0.05243302, %v736_v44  ;;  %v852_v14 = vmul.f32 2.1237322e-06, %v2657_v45  ;;  %v2681_v20 = vmul.f32 0.5, %v2515_v60 }
  0xed   :  { %v659_v27 = vadd.f32 0.18741608, %v658_v52  ;;  %v2684_v21 = vadd.f32 %v283_v8, %v2450_v11  ;;  %v580_v22 = vmul.f32 %v579_v55, %v2529_v10  ;;  %v2688_v44 = vmul.f32 0.5, %v2536_v18 }
  0xee   :  { %v2673_v24 = vmul.f32 0.70710677, %v2655_v31  ;;  %3802 = vst [vmem:[#allocation21_spill] sm:$0xff] %v2681_v20  ;;  %v698_v4 = vmul.f32 %v697_v16, %v2562_v61  ;;  %v775_v38 = vadd.f32 0.0036580483, %v774_v58  ;;  %v2692_v40 = vmul.f32 %v461_v51, %v2475_v28 }
  0xef   :  { %3803 = vst [vmem:[#allocation22_spill] sm:$0xff] %v2688_v44  ;;  %v738_v26 = vmul.f32 %v737_v1, %v2573_v13  ;;  %v814_v60 = vmul.f32 %v813_v3, %v2636_v12  ;;  %v2699_v19 = vmul.f32 %v501_v53, %v2478_v30  ;;  %v541_v52 = vadd.f32 1.1283791, %v540_v59 }
  0xf0   :  { %v930_v15 = vmul.f32 %v2673_v24, %v2673_v24  ;;  %v853_v55 = vadd.f32 0.00028619796, %v852_v14  ;;  %v892_v18 = vmul.f32 2.1237322e-06, %v2677_v49  ;;  %v620_v16 = vmul.f32 %v619_v41, %v2542_v33 }
  0xf1   :  { %v660_v28 = vmul.f32 %v659_v27, %v2544_v34  ;;  %v2705_v51 = vmul.f32 0.5, %v2547_v36  ;;  %v2708_v58 = vmul.f32 0.70710677, %v2684_v21  ;;  %v2710_v1 = vpop.eup %2199  ;;  %v581_v3 = vadd.f32 1.1283791, %v580_v22 }
  0xf2   :  { %v699_v30 = vadd.f32 0.18741608, %v698_v4  ;;  %v776_v53 = vmul.f32 %v775_v38, %v2617_v17  ;;  %v463_v59 = vmul.f32 3.8918573e-05, %v2496_v43  ;;  %v739_v14 = vadd.f32 0.18741608, %v738_v26 }
  0xf3   :  { %v237_v8 = vpop.f32.mrf.mxu0  ;;  %3804 = vst [vmem:[#allocation23_spill] sm:$0xff] %v2705_v51  ;;  %v815_v44 = vadd.f32 0.0036580483, %v814_v60  ;;  %v2714_v20 = vmin.f32 %v930_v15, 16.0  ;;  %v2720_v36 = vmul.f32 %v541_v52, %v2501_v47  ;;  %v2723_v27 = vmul.f32 0.5, %v2569_v2 }
  0xf4   :  { %v2717_v41 = vadd.f32 %v237_v8, %v2448_v9  ;;  %v854_v22 = vmul.f32 %v853_v55, %v2657_v45  ;;  %v893_v4 = vadd.f32 0.00028619796, %v892_v18  ;;  %v621_v51 = vadd.f32 1.1283791, %v620_v16 }
  0xf5   :  { %3805 = vst [vmem:[#allocation24_spill] sm:$0xff] %v2720_v36  ;;  %v661_v38 = vadd.f32 1.1283791, %v660_v28  ;;  %v970_v26 = vmul.f32 %v2708_v58, %v2708_v58  ;;  %v394_v60 = vmul.f32 %v2710_v1, %v2661_v48  ;;  %v2731_v15 = vmul.f32 %v581_v3, %v2505_v50 }
  0xf6   :  { %3806 = vst [vmem:[#allocation25_spill] sm:$0xff] %v2723_v27  ;;  %v700_v47 = vmul.f32 %v699_v30, %v2562_v61  ;;  %v777_v52 = vadd.f32 0.05243302, %v776_v53  ;;  %v2735_v2 = vmul.f32 0.5, %v2587_v29  ;;  %v740_v55 = vmul.f32 %v739_v14, %v2573_v13 }
  0xf7   :  { %3807 = vst [vmem:[#allocation26_spill] sm:$0xff] %v2731_v15  ;;  %v816_v18 = vmul.f32 %v815_v44, %v2636_v12  ;;  %v932_v8 = vmul.f32 2.1237322e-06, %v2714_v20  ;;  %v2741_v16 = vmul.f32 0.70710677, %v2717_v41  ;;  %v2744_v28 = vmul.f32 0.5, %v2607_v62 }
  0xf8   :  { %3808 = vst [vmem:[#allocation27_spill] sm:$0xff] %v2735_v2  ;;  %v855_v50 = vadd.f32 0.0036580483, %v854_v22  ;;  %v2747_v3 = vmul.f32 0.5, %v2628_v39  ;;  %v894_v30 = vmul.f32 %v893_v4, %v2677_v49  ;;  %v2751_v29 = vmul.f32 %v621_v51, %v2524_v6  ;;  %v286_v22 = vpop.f32.mrf.mxu1 }
  0xf9   :  { %3809 = vst [vmem:[#allocation28_spill] sm:$0xff] %v2741_v16  ;;  %v2754_v53 = vmul.f32 %v661_v38, %v2527_v7  ;;  %v2756_v44 = vmin.f32 %v970_v26, 16.0  ;;  %v395_v14 = vsub.f32 1.0, %v394_v60  ;;  %v701_v2 = vadd.f32 1.1283791, %v700_v47 }
  0xfa   :  { %3810 = vst [vmem:[#allocation29_spill] sm:$0xff] %v2744_v28  ;;  %v778_v27 = vmul.f32 %v777_v52, %v2617_v17  ;;  %v2760_v62 = vmul.f32 0.5, %v2655_v31  ;;  %v464_v39 = vadd.f32 0.001143296, %v463_v59  ;;  %v817_v4 = vadd.f32 0.05243302, %v816_v18 }
  0xfb   :  { %3811 = vst [vmem:[#allocation30_spill] sm:$0xff] %v2747_v3  ;;  %v2762_v3 = vadd.f32 1.1283791, %v740_v55  ;;  %v933_v28 = vadd.f32 0.00028619796, %v932_v8  ;;  %v1010_v6 = vmul.f32 %v2741_v16, %v2741_v16  ;;  %v856_v7 = vmul.f32 %v855_v50, %v2657_v45 }
  0xfc   :  { %3812 = vst [vmem:[#allocation31_spill] sm:$0xff] %v2751_v29  ;;  %v895_v51 = vadd.f32 0.0036580483, %v894_v30  ;;  %v465_v38 = vmul.f32 %v464_v39, %v2496_v43  ;;  %v423_v26 = vmul.f32 3.8918573e-05, %v2482_v35  ;;  %v2771_v31 = vadd.f32 %v286_v22, %v2450_v11 }
  0xfd   :  { %3813 = vst [vmem:[#allocation32_spill] sm:$0xff] %v2754_v53  ;;  %v972_v60 = vmul.f32 2.1237322e-06, %v2756_v44  ;;  %v396_v59 = vmul.f32 %v2710_v1, %v395_v14  ;;  %v503_v47 = vmul.f32 3.8918573e-05, %v2498_v46  ;;  %v2776_v52 = vmul.f32 %v701_v2, %v2553_v42 }
  0xfe   :  { %3814 = vst [vmem:[#allocation33_spill] sm:$0xff] %v2760_v62  ;;  %v2779_v55 = vmul.f32 0.5, %v2684_v21  ;;  %v466_v18 = vadd.f32 0.014752088, %v465_v38  ;;  %v424_v8 = vadd.f32 0.001143296, %v423_v26  ;;  %v818_v30 = vmul.f32 %v817_v4, %v2636_v12 }
  0xff   :  { %3815 = vst [vmem:[#allocation34_spill] sm:$0xff] %v2776_v52  ;;  %v779_v50 = vadd.f32 0.18741608, %v778_v27  ;;  %v934_v39 = vmul.f32 %v933_v28, %v2714_v20  ;;  %v2783_v62 = vmin.f32 %v1010_v6, 16.0  ;;  %v857_v22 = vadd.f32 0.05243302, %v856_v7 }
 0x100   :  { %3816 = vst [vmem:[#allocation35_spill] sm:$0xff] %v2779_v55  ;;  %v467_v14 = vmul.f32 %v466_v18, %v2496_v43  ;;  %v425_v53 = vmul.f32 %v424_v8, %v2482_v35  ;;  %v504_v13 = vadd.f32 0.001143296, %v503_v47  ;;  %v896_v42 = vmul.f32 %v895_v51, %v2677_v49 }
 0x101   :  { %v973_v2 = vadd.f32 0.00028619796, %v972_v60  ;;  %v2789_v21 = vmul.f32 0.70710677, %v2771_v31  ;;  %v397_v27 = vadd.f32 %v2710_v1, %v396_v59  ;;  %vm399_vm0 = vweird.f32 %v2710_v1 }
 0x102   :  { %v468_v4 = vadd.f32 0.112945676, %v467_v14  ;;  %v426_v28 = vadd.f32 0.014752088, %v425_v53  ;;  %v505_v6 = vmul.f32 %v504_v13, %v2498_v46  ;;  %v935_v7 = vadd.f32 0.0036580483, %v934_v39 }
 0x103   :  { %3817 = vst [vmem:[#allocation36_spill] sm:$0xff] %v2789_v21  ;;  %v1012_v38 = vmul.f32 2.1237322e-06, %v2783_v62  ;;  %vm398_vm1 = vweird.f32 %v2661_v48  ;;  %v404_v26 = vand.u32 2147483648, %v2661_v48  ;;  %v402_v51 = vand.u32 2147483647, %v2661_v48 }
 0x104   :  { %v469_v60 = vmul.f32 %v468_v4, %v2496_v43  ;;  %v427_v47 = vmul.f32 %v426_v28, %v2482_v35  ;;  %v506_v59 = vadd.f32 0.014752088, %v505_v6  ;;  %v897_v18 = vadd.f32 0.05243302, %v896_v42  ;;  %vm2805_vm2 = vmor %vm398_vm1, %vm399_vm0 }
 0x105   :  { %v974_v8 = vmul.f32 %v973_v2, %v2756_v44  ;;  %v1050_v13 = vmul.f32 %v2789_v21, %v2789_v21  ;;  %v543_v39 = vmul.f32 3.8918573e-05, %v2521_v5  ;;  %v401_v48 = vsel %vm2805_vm2, %v2710_v1, %v397_v27 }
 0x106   :  { %v470_v14 = vadd.f32 0.4994258, %v469_v60  ;;  %v428_v4 = vadd.f32 0.112945676, %v427_v47  ;;  %v507_v42 = vmul.f32 %v506_v59, %v2498_v46  ;;  %v936_v2 = vmul.f32 %v935_v7, %v2714_v20 }
 0x107   :  { %v1013_v28 = vadd.f32 0.00028619796, %v1012_v38  ;;  %v405_v6 = vor.u32 1.1754944e-38, %v404_v26  ;;  %v544_v55 = vadd.f32 0.001143296, %v543_v39  ;;  %vm403_vm3 = vcmp.eq.f32.partialorder %v402_v51, 8.507059e+37 }
 0x108   :  { %v471_v52 = vmul.f32 %v470_v14, %v2496_v43  ;;  %v429_v15 = vmul.f32 %v428_v4, %v2482_v35  ;;  %v508_v21 = vadd.f32 0.112945676, %v507_v42  ;;  %v819_v29 = vadd.f32 0.18741608, %v818_v30 }
 0x109   :  { %v975_v36 = vadd.f32 0.0036580483, %v974_v8  ;;  %v406_v16 = vsel %vm403_vm3, %v405_v6, %v401_v48  ;;  %v545_v1 = vmul.f32 %v544_v55, %v2521_v5  ;;  %v2818_v27 = vmin.f32 %v1050_v13, 16.0 }
 0x10a   :  { %v2820_v60 = vadd.f32 1.0, %v471_v52  ;;  %v430_v47 = vadd.f32 0.4994258, %v429_v15  ;;  %v509_v7 = vmul.f32 %v508_v21, %v2498_v46  ;;  %v780_v38 = vmul.f32 %v779_v50, %v2617_v17 }
 0x10b   :  { %v858_v26 = vmul.f32 %v857_v22, %v2657_v45  ;;  %v898_v43 = vmul.f32 %v897_v18, %v2677_v49  ;;  %v546_v51 = vadd.f32 0.014752088, %v545_v1  ;;  %v937_v59 = vadd.f32 0.05243302, %v936_v2 }
 0x10c   :  { %v1014_v30 = vmul.f32 %v1013_v28, %v2783_v62  ;;  %v407_v8 = vmul.f32 %v406_v16, %v2650_v56  ;;  %2201 = vrcp.f32 %v2820_v60  ;;  %v976_v52 = vmul.f32 %v975_v36, %v2756_v44 }
 0x10d   :  { %v431_v15 = vmul.f32 %v430_v47, %v2482_v35  ;;  %v510_v55 = vadd.f32 0.4994258, %v509_v7  ;;  %v547_v21 = vmul.f32 %v546_v51, %v2521_v5  ;;  %v2834_v50 = vmul.f32 %v2762_v3, %v2560_v54  ;;  %v239_v7 = vpop.f32.mrf.mxu0 }
 0x10e   :  { %v820_v22 = vmul.f32 %v819_v29, %v2636_v12  ;;  %v1052_v18 = vmul.f32 2.1237322e-06, %v2818_v27  ;;  %v623_v13 = vmul.f32 3.8918573e-05, %v2542_v33  ;;  %v859_v56 = vadd.f32 0.18741608, %v858_v26 }
 0x10f   :  { %v899_v16 = vadd.f32 0.18741608, %v898_v43  ;;  %v2839_v53 = vadd.f32 1.0, %v431_v15  ;;  %v511_v36 = vmul.f32 %v510_v55, %v2498_v46  ;;  %v2842_v35 = vadd.f32 1.1283791, %v780_v38 }
 0x110   :  { %v2845_v39 = vmul.f32 0.5, %v2717_v41  ;;  %v1015_v48 = vadd.f32 0.0036580483, %v1014_v30  ;;  %v2061_v54 = vclamps-f32 %v407_v8, 1.0  ;;  %v938_v3 = vmul.f32 %v937_v59, %v2714_v20 }
 0x111   :  { %v977_v29 = vadd.f32 0.05243302, %v976_v52  ;;  %2203 = vrcp.f32 %v2839_v53  ;;  %v548_v14 = vadd.f32 0.112945676, %v547_v21  ;;  %v2850_v42 = vmul.f32 0.5, %v2771_v31 }
 0x112   :  { %3820 = vst [vmem:[#allocation37_spill] sm:$0xff] %v2845_v39  ;;  %v2202_v4 = vpop.eup %2201  ;;  %v1053_v2 = vadd.f32 0.00028619796, %v1052_v18  ;;  %v2852_v28 = vadd.f32 1.0, %v511_v36  ;;  %v624_v46 = vadd.f32 0.001143296, %v623_v13  ;;  %v2857_v41 = vmul.f32 %v859_v56, %v2657_v45  ;;  %v288_v36 = vpop.f32.mrf.mxu1 }
 0x113   :  { %3821 = vst [vmem:[#allocation38_spill] sm:$0xff] %v2850_v42  ;;  %v2854_v6 = vadd.f32 1.1283791, %v820_v22  ;;  %v2860_v1 = vmul.f32 %v899_v16, %v2677_v49  ;;  %v474_v47 = vmul.f32 %v2202_v4, %v2820_v60  ;;  %v2864_v38 = vmul.f32 %v1015_v48, %v2783_v62 }
 0x114   :  { %v1650_v31 = vadd.f32 1.0, %v2061_v54  ;;  %2205 = vrcp.f32 %v2852_v28  ;;  %v583_v26 = vmul.f32 3.8918573e-05, %v2529_v10  ;;  %v2868_v43 = vadd.f32 0.18741608, %v938_v3 }
 0x115   :  { %v475_v51 = vsub.f32 1.0, %v474_v47  ;;  %v482_v59 = vand.u32 2147483647, %v2820_v60  ;;  %v549_v30 = vmul.f32 %v548_v14, %v2521_v5  ;;  %v2873_v8 = vmul.f32 %v977_v29, %v2756_v44 }
 0x116   :  { %v2876_v52 = vmul.f32 %v1053_v2, %v2818_v27  ;;  %v484_v15 = vand.u32 2147483648, %v2820_v60  ;;  %v625_v55 = vmul.f32 %v624_v46, %v2542_v33  ;;  %vm479_vm4 = vweird.f32 %v2202_v4 }
 0x117   :  { %v2204_v21 = vpop.eup %2203  ;;  %v476_v22 = vmul.f32 %v2202_v4, %v475_v51  ;;  %v2881_v18 = vadd.f32 %v239_v7, %v2448_v9  ;;  %v550_v13 = vadd.f32 0.4994258, %v549_v30  ;;  %vm478_vm5 = vweird.f32 %v2820_v60 }
 0x118   :  { %v2885_v56 = vmul.f32 %v1650_v31, %v2582_v25  ;;  %v434_v16 = vmul.f32 %v2204_v21, %v2839_v53  ;;  %v584_v48 = vadd.f32 0.001143296, %v583_v26  ;;  %vm483_vm6 = vcmp.eq.f32.partialorder %v482_v59, 8.507059e+37  ;;  %vm480_vm7 = vmor %vm478_vm5, %vm479_vm4 }
 0x119   :  { %v477_v54 = vadd.f32 %v2202_v4, %v476_v22  ;;  %v442_v3 = vand.u32 2147483647, %v2839_v53  ;;  %v444_v29 = vand.u32 2147483648, %v2839_v53  ;;  %v485_v2 = vor.u32 1.1754944e-38, %v484_v15 }
 0x11a   :  { %v2206_v14 = vpop.eup %2205  ;;  %v435_v46 = vsub.f32 1.0, %v434_v16  ;;  %v551_v47 = vmul.f32 %v550_v13, %v2521_v5  ;;  %v626_v60 = vadd.f32 0.014752088, %v625_v55  ;;  %v2893_v31 = vmul.f32 0.70710677, %v2881_v18  ;;  %v242_v55 = vpop.f32.mrf.mxu0 }
 0x11b   :  { %v481_v7 = vsel %vm480_vm7, %v2202_v4, %v477_v54  ;;  %v514_v25 = vmul.f32 %v2206_v14, %v2852_v28  ;;  %v2896_v26 = vadd.f32 %v288_v36, %v2450_v11  ;;  %vm438_vm8 = vweird.f32 %v2839_v53 }
 0x11c   :  { %v486_v51 = vsel %vm483_vm6, %v485_v2, %v481_v7  ;;  %v436_v59 = vmul.f32 %v2204_v21, %v435_v46  ;;  %vm439_vm9 = vweird.f32 %v2204_v21  ;;  %vm2900_vm10 = vcmp.eq.f32.partialorder %v442_v3, 8.507059e+37 }
 0x11d   :  { %v487_v30 = vmul.f32 %v486_v51, %v2692_v40  ;;  %v445_v5 = vor.u32 1.1754944e-38, %v444_v29  ;;  %v515_v4 = vsub.f32 1.0, %v514_v25  ;;  %v522_v13 = vand.u32 2147483647, %v2852_v28  ;;  %vm440_vm11 = vmor %vm438_vm8, %vm439_vm9 }
 0x11e   :  { %v437_v22 = vadd.f32 %v2204_v21, %v436_v59  ;;  %v524_v16 = vand.u32 2147483648, %v2852_v28  ;;  %v2906_v36 = vadd.f32 1.0, %v551_v47  ;;  %vm519_vm12 = vweird.f32 %v2206_v14 }
 0x11f   :  { %v2063_v54 = vclamps-f32 %v487_v30, 1.0  ;;  %v516_v53 = vmul.f32 %v2206_v14, %v515_v4  ;;  %v1090_v40 = vmul.f32 %v2893_v31, %v2893_v31  ;;  %vm518_vm13 = vweird.f32 %v2852_v28 }
 0x120   :  { %v441_v3 = vsel %vm440_vm11, %v2204_v21, %v437_v22  ;;  %v2912_v29 = vadd.f32 %v242_v55, %v2448_v9  ;;  %2207 = vrcp.f32 %v2906_v36  ;;  %v2918_v7 = vmul.f32 0.70710677, %v2896_v26  ;;  %vm520_vm14 = vmor %vm518_vm13, %vm519_vm12 }
 0x121   :  { %v1652_v2 = vadd.f32 1.0, %v2063_v54  ;;  %v446_v46 = vsel %vm2900_vm10, %v445_v5, %v441_v3  ;;  %v517_v47 = vadd.f32 %v2206_v14, %v516_v53  ;;  %v525_v51 = vor.u32 1.1754944e-38, %v524_v16 }
 0x122   :  { %v447_v25 = vmul.f32 %v446_v46, %v2670_v63  ;;  %v627_v21 = vmul.f32 %v626_v60, %v2542_v33  ;;  %v585_v28 = vmul.f32 %v584_v48, %v2529_v10  ;;  %vm523_vm15 = vcmp.eq.f32.partialorder %v522_v13, 8.507059e+37 }
 0x123   :  { %v1684_v59 = vmul.f32 %v1652_v2, %v2593_v37  ;;  %v521_v30 = vsel %vm520_vm14, %v2206_v14, %v517_v47  ;;  %v2924_v4 = vmin.f32 %v1090_v40, 16.0  ;;  %v1017_v15 = vadd.f32 0.05243302, %v2864_v38 }
 0x124   :  { %v2062_v5 = vclamps-f32 %v447_v25, 1.0  ;;  %v526_v55 = vsel %vm523_vm15, %v525_v51, %v521_v30  ;;  %v2928_v22 = vmul.f32 0.70710677, %v2912_v29  ;;  %v1055_v63 = vadd.f32 0.0036580483, %v2876_v52 }
 0x125   :  { %v1746_v16 = vpack.c.bf16 %v1684_v59, %v2885_v56  ;;  %v527_v60 = vmul.f32 %v526_v55, %v2699_v19  ;;  %v1130_v37 = vmul.f32 %v2918_v7, %v2918_v7  ;;  %v2939_v14 = vmul.f32 %v2842_v35, %v2579_v23 }
 0x126   :  { %v2935_v48 = vpop.eup %2207  ;;  %v861_v38 = vadd.f32 1.1283791, %v2857_v41  ;;  %v628_v13 = vadd.f32 0.112945676, %v627_v21  ;;  %v586_v54 = vadd.f32 0.014752088, %v585_v28  ;;  %v940_v3 = vmul.f32 %v2868_v43, %v2714_v20  ;;  %v291_v41 = vpop.f32.mrf.mxu1 }
 0x127   :  { %1870 = vmatmul.bf16.vlgmr.msra.gmra.mxu2 %v1746_v16  ;;  %v2064_v53 = vclamps-f32 %v527_v60, 1.0  ;;  %v1651_v52 = vadd.f32 1.0, %v2062_v5  ;;  %v1092_v56 = vmul.f32 2.1237322e-06, %v2924_v4  ;;  %v554_v19 = vmul.f32 %v2935_v48, %v2906_v36  ;;  %v3825_v60 = vld [vmem:[#allocation18_spill] sm:$0xff] }
 0x128   :  { %v901_v40 = vadd.f32 1.1283791, %v2860_v1  ;;  %v1018_v23 = vmul.f32 %v1017_v15, %v2783_v62  ;;  %v1170_v35 = vmul.f32 %v2928_v22, %v2928_v22  ;;  %v979_v2 = vadd.f32 0.18741608, %v2873_v8  ;;  %v3824_v8 = vld [vmem:[#allocation16_spill] sm:$0xff] }
 0x129   :  { %v1056_v46 = vmul.f32 %v1055_v63, %v2818_v27  ;;  %v1653_v47 = vadd.f32 1.0, %v2064_v53  ;;  %v2953_v25 = vmin.f32 %v1130_v37, 16.0  ;;  %v555_v51 = vsub.f32 1.0, %v554_v19 }
 0x12a   :  { %v629_v21 = vmul.f32 %v628_v13, %v2542_v33  ;;  %v587_v1 = vmul.f32 %v586_v54, %v2529_v10  ;;  %v663_v43 = vmul.f32 3.8918573e-05, %v2544_v34  ;;  %v1683_v28 = vmul.f32 %v1651_v52, %v2590_v32 }
 0x12b   :  { %v1685_v59 = vmul.f32 %v1653_v47, %v2603_v57  ;;  %v1093_v30 = vadd.f32 0.00028619796, %v1092_v56  ;;  %v2961_v15 = vadd.f32 %v291_v41, %v2450_v11  ;;  %v2965_v5 = vmul.f32 %v2854_v6, %v3824_v8 }
 0x12c   :  { %v941_v55 = vadd.f32 1.1283791, %v940_v3  ;;  %v1019_v63 = vadd.f32 0.18741608, %v1018_v23  ;;  %v2967_v16 = vmin.f32 %v1170_v35, 16.0  ;;  %v2970_v37 = vmul.f32 %v861_v38, %v3825_v60 }
 0x12d   :  { %v1057_v13 = vadd.f32 0.05243302, %v1056_v46  ;;  %v1747_v54 = vpack.c.bf16 %v1685_v59, %v1683_v28  ;;  %v1132_v32 = vmul.f32 2.1237322e-06, %v2953_v25  ;;  %v2974_v57 = vmul.f32 %v901_v40, %v2642_v0 }
 0x12e   :  { %v980_v53 = vmul.f32 %v979_v2, %v2756_v44  ;;  %v556_v52 = vmul.f32 %v2935_v48, %v555_v51  ;;  %v630_v6 = vadd.f32 0.4994258, %v629_v21  ;;  %v1094_v56 = vmul.f32 %v1093_v30, %v2924_v4 }
 0x12f   :  { %1919 = vmatmul.bf16.vlgmr.msra.gmra.mxu3 %v1747_v54  ;;  %v2980_v19 = vmul.f32 0.70710677, %v2961_v15  ;;  %v588_v38 = vadd.f32 0.112945676, %v587_v1  ;;  %v664_v3 = vadd.f32 0.001143296, %v663_v43  ;;  %v2983_v23 = vmul.f32 %v941_v55, %v2673_v24 }
 0x130   :  { %v1020_v35 = vmul.f32 %v1019_v63, %v2783_v62  ;;  %v1172_v0 = vmul.f32 2.1237322e-06, %v2967_v16  ;;  %v631_v40 = vmul.f32 %v630_v6, %v2542_v33  ;;  %v1058_v41 = vmul.f32 %v1057_v13, %v2818_v27 }
 0x131   :  { %v1133_v2 = vadd.f32 0.00028619796, %v1132_v32  ;;  %vm559_vm0 = vweird.f32 %v2935_v48  ;;  %v589_v46 = vmul.f32 %v588_v38, %v2529_v10  ;;  %v557_v47 = vadd.f32 %v2935_v48, %v556_v52 }
 0x132   :  { %v2992_v51 = vadd.f32 1.0, %v631_v40  ;;  %v665_v24 = vmul.f32 %v664_v3, %v2544_v34  ;;  %v703_v21 = vmul.f32 3.8918573e-05, %v2562_v61  ;;  %v1095_v1 = vadd.f32 0.0036580483, %v1094_v56 }
 0x133   :  { %v1210_v43 = vmul.f32 %v2980_v19, %v2980_v19  ;;  %v564_v33 = vand.u32 2147483648, %v2906_v36  ;;  %v590_v28 = vadd.f32 0.4994258, %v589_v46  ;;  %v1173_v59 = vadd.f32 0.00028619796, %v1172_v0 }
 0x134   :  { %vm558_vm1 = vweird.f32 %v2906_v36  ;;  %v562_v30 = vand.u32 2147483647, %v2906_v36  ;;  %2209 = vrcp.f32 %v2992_v51  ;;  %v981_v8 = vadd.f32 1.1283791, %v980_v53 }
 0x135   :  { %v1059_v55 = vadd.f32 0.18741608, %v1058_v41  ;;  %v1134_v63 = vmul.f32 %v1133_v2, %v2953_v25  ;;  %vm3005_vm2 = vmor %vm558_vm1, %vm559_vm0  ;;  %v591_v13 = vmul.f32 %v590_v28, %v2529_v10  ;;  %v1021_v54 = vadd.f32 1.1283791, %v1020_v35 }
 0x136   :  { %v561_v32 = vsel %vm3005_vm2, %v2935_v48, %v557_v47  ;;  %v666_v36 = vadd.f32 0.014752088, %v665_v24  ;;  %v704_v52 = vadd.f32 0.001143296, %v703_v21  ;;  %v1096_v53 = vmul.f32 %v1095_v1, %v2924_v4  ;;  %v3829_v21 = vld [vmem:[#allocation28_spill] sm:$0xff] }
 0x137   :  { %v3014_v6 = vmin.f32 %v1210_v43, 16.0  ;;  %v565_v56 = vor.u32 1.1754944e-38, %v564_v33  ;;  %v3016_v38 = vadd.f32 1.0, %v591_v13  ;;  %v1174_v3 = vmul.f32 %v1173_v59, %v2967_v16 }
 0x138   :  { %vm563_vm3 = vcmp.eq.f32.partialorder %v562_v30, 8.507059e+37  ;;  %v667_v0 = vmul.f32 %v666_v36, %v2544_v34  ;;  %v705_v10 = vmul.f32 %v704_v52, %v2562_v61  ;;  %v1060_v35 = vmul.f32 %v1059_v55, %v2818_v27  ;;  %v3831_v30 = vld [vmem:[#allocation24_spill] sm:$0xff] }
 0x139   :  { %v1135_v40 = vadd.f32 0.0036580483, %v1134_v63  ;;  %v566_v48 = vsel %vm563_vm3, %v565_v56, %v561_v32  ;;  %2211 = vrcp.f32 %v3016_v38  ;;  %v3024_v2 = vmul.f32 %v981_v8, %v2708_v58 }
 0x13a   :  { %v2210_v41 = vpop.eup %2209  ;;  %v668_v46 = vadd.f32 0.112945676, %v667_v0  ;;  %v706_v47 = vadd.f32 0.014752088, %v705_v10  ;;  %v783_v24 = vmul.f32 3.8918573e-05, %v2617_v17  ;;  %v3028_v1 = vmul.f32 %v1021_v54, %v3829_v21  ;;  %v244_v21 = vpop.f32.mrf.mxu0 }
 0x13b   :  { %3828 = vst [vmem:[#allocation16_spill] sm:$0xff] %v3024_v2  ;;  %v1097_v43 = vadd.f32 0.05243302, %v1096_v53  ;;  %v1212_v33 = vmul.f32 2.1237322e-06, %v3014_v6  ;;  %v634_v28 = vmul.f32 %v2210_v41, %v2992_v51  ;;  %v567_v55 = vmul.f32 %v566_v48, %v3831_v30 }
 0x13c   :  { %3830 = vst [vmem:[#allocation18_spill] sm:$0xff] %v3028_v1  ;;  %v1175_v59 = vadd.f32 0.0036580483, %v1174_v3  ;;  %v669_v63 = vmul.f32 %v668_v46, %v2544_v34  ;;  %v707_v58 = vmul.f32 %v706_v47, %v2562_v61  ;;  %v1061_v8 = vadd.f32 1.1283791, %v1060_v35 }
 0x13d   :  { %v635_v60 = vsub.f32 1.0, %v634_v28  ;;  %v642_v13 = vand.u32 2147483647, %v2992_v51  ;;  %v644_v32 = vand.u32 2147483648, %v2992_v51  ;;  %v1136_v54 = vmul.f32 %v1135_v40, %v2953_v25  ;;  %v293_v40 = vpop.f32.mrf.mxu1 }
 0x13e   :  { %v670_v36 = vadd.f32 0.4994258, %v669_v63  ;;  %v708_v52 = vadd.f32 0.112945676, %v707_v58  ;;  %v784_v53 = vadd.f32 0.001143296, %v783_v24  ;;  %v1098_v3 = vmul.f32 %v1097_v43, %v2924_v4 }
 0x13f   :  { %v2212_v56 = vpop.eup %2211  ;;  %v1213_v0 = vadd.f32 0.00028619796, %v1212_v33  ;;  %v636_v10 = vmul.f32 %v2210_v41, %v635_v60  ;;  %vm639_vm4 = vweird.f32 %v2210_v41  ;;  %v1176_v48 = vmul.f32 %v1175_v59, %v2967_v16 }
 0x140   :  { %v2065_v46 = vclamps-f32 %v567_v55, 1.0  ;;  %v594_v35 = vmul.f32 %v2212_v56, %v3016_v38  ;;  %v671_v47 = vmul.f32 %v670_v36, %v2544_v34  ;;  %vm638_vm5 = vweird.f32 %v2992_v51 }
 0x141   :  { %v637_v28 = vadd.f32 %v2210_v41, %v636_v10  ;;  %vm643_vm6 = vcmp.eq.f32.partialorder %v642_v13, 8.507059e+37  ;;  %v709_v24 = vmul.f32 %v708_v52, %v2562_v61  ;;  %vm640_vm7 = vmor %vm638_vm5, %vm639_vm4  ;;  %v645_v43 = vor.u32 1.1754944e-38, %v644_v32  ;;  %v3832_v32 = vld [vmem:[#allocation31_spill] sm:$0xff] }
 0x142   :  { %v595_v33 = vsub.f32 1.0, %v594_v35  ;;  %v3044_v30 = vadd.f32 1.0, %v671_v47  ;;  %v785_v59 = vmul.f32 %v784_v53, %v2617_v17  ;;  %vm599_vm8 = vweird.f32 %v2212_v56  ;;  %v3833_v47 = vld [vmem:[#allocation36_spill] sm:$0xff] }
 0x143   :  { %v641_v55 = vsel %vm640_vm7, %v2210_v41, %v637_v28  ;;  %v3048_v63 = vadd.f32 %v244_v21, %v2448_v9  ;;  %v710_v34 = vadd.f32 0.4994258, %v709_v24  ;;  %v3052_v51 = vadd.f32 %v293_v40, %v2450_v11 }
 0x144   :  { %v646_v58 = vsel %vm643_vm6, %v645_v43, %v641_v55  ;;  %v596_v60 = vmul.f32 %v2212_v56, %v595_v33  ;;  %2213 = vrcp.f32 %v3044_v30  ;;  %v1214_v13 = vmul.f32 %v1213_v0, %v3014_v6 }
 0x145   :  { %v647_v36 = vmul.f32 %v646_v58, %v3832_v32  ;;  %vm598_vm9 = vweird.f32 %v3016_v38  ;;  %v604_v41 = vand.u32 2147483648, %v3016_v38  ;;  %v602_v53 = vand.u32 2147483647, %v3016_v38  ;;  %v247_v58 = vpop.f32.mrf.mxu0  ;;  %v296_v42 = vpop.f32.mrf.mxu1 }
 0x146   :  { %v597_v52 = vadd.f32 %v2212_v56, %v596_v60  ;;  %v711_v10 = vmul.f32 %v710_v34, %v2562_v61  ;;  %v786_v35 = vadd.f32 0.014752088, %v785_v59  ;;  %v3061_v21 = vmul.f32 %v1061_v8, %v3833_v47  ;;  %vm3064_vm10 = vmor %vm598_vm9, %vm599_vm8  ;;  %v3838_v60 = vld [vmem:[#allocation17_spill] sm:$0xff] }
 0x147   :  { %v1137_v28 = vadd.f32 0.05243302, %v1136_v54  ;;  %v2067_v40 = vclamps-f32 %v647_v36, 1.0  ;;  %v1654_v24 = vadd.f32 1.0, %v2065_v46  ;;  %v1177_v43 = vadd.f32 0.05243302, %v1176_v48 }
 0x148   :  { %3834 = vst [vmem:[#allocation28_spill] sm:$0xff] %v3061_v21  ;;  %v601_v33 = vsel %vm3064_vm10, %v2212_v56, %v597_v52  ;;  %v3071_v38 = vmul.f32 0.70710677, %v3048_v63  ;;  %v3074_v61 = vmul.f32 0.70710677, %v3052_v51  ;;  %v3077_v8 = vmul.f32 0.5, %v2881_v18 }
 0x149   :  { %v1215_v54 = vadd.f32 0.0036580483, %v1214_v13  ;;  %v1656_v46 = vadd.f32 1.0, %v2067_v40  ;;  %v605_v59 = vor.u32 1.1754944e-38, %v604_v41  ;;  %v1099_v34 = vadd.f32 0.18741608, %v1098_v3 }
 0x14a   :  { %3837 = vst [vmem:[#allocation24_spill] sm:$0xff] %v3077_v8  ;;  %v2214_v55 = vpop.eup %2213  ;;  %vm603_vm11 = vcmp.eq.f32.partialorder %v602_v53, 8.507059e+37  ;;  %v3079_v48 = vadd.f32 1.0, %v711_v10  ;;  %v787_v56 = vmul.f32 %v786_v35, %v2617_v17  ;;  %v1686_v32 = vmul.f32 %v1654_v24, %v3838_v60  ;;  %v3839_v36 = vld [vmem:[#allocation20_spill] sm:$0xff]  ;;  %v3840_v24 = vld [vmem:[#allocation26_spill] sm:$0xff]  ;;  %v3841_v60 = vld [vmem:[#allocation15_spill] sm:$0xff] }
 0x14b   :  { %v1688_v52 = vmul.f32 %v1656_v46, %v3839_v36  ;;  %v606_v47 = vsel %vm603_vm11, %v605_v59, %v601_v33  ;;  %v674_v0 = vmul.f32 %v2214_v55, %v3044_v30  ;;  %v1138_v18 = vmul.f32 %v1137_v28, %v2953_v25  ;;  %v3843_v8 = vld [vmem:[#allocation32_spill] sm:$0xff] }
 0x14c   :  { %v1178_v13 = vmul.f32 %v1177_v43, %v2967_v16  ;;  %v1250_v3 = vmul.f32 %v3071_v38, %v3071_v38  ;;  %v1290_v41 = vmul.f32 %v3074_v61, %v3074_v61  ;;  %v1216_v53 = vmul.f32 %v1215_v54, %v3014_v6 }
 0x14d   :  { %v1748_v10 = vpack.c.bf16 %v1688_v52, %v1686_v32  ;;  %v675_v35 = vsub.f32 1.0, %v674_v0  ;;  %v3093_v40 = vadd.f32 %v247_v58, %v2448_v9  ;;  %v607_v33 = vmul.f32 %v606_v47, %v3840_v24 }
 0x14e   :  { %v684_v46 = vand.u32 2147483648, %v3044_v30  ;;  %2215 = vrcp.f32 %v3079_v48  ;;  %v788_v28 = vadd.f32 0.112945676, %v787_v56  ;;  %vm679_vm12 = vweird.f32 %v2214_v55 }
 0x14f   :  { %1875 = vmatmul.bf16.gmra.mxu2 %v1748_v10  ;;  %v676_v43 = vmul.f32 %v2214_v55, %v675_v35  ;;  %v682_v59 = vand.u32 2147483647, %v3044_v30  ;;  %v743_v36 = vmul.f32 3.8918573e-05, %v3841_v60  ;;  %v1100_v54 = vmul.f32 %v1099_v34, %v2924_v4 }
 0x150   :  { %v3102_v32 = vmul.f32 0.5, %v2896_v26  ;;  %v3104_v58 = vmin.f32 %v1250_v3, 16.0  ;;  %v3106_v52 = vmin.f32 %v1290_v41, 16.0  ;;  %v1139_v47 = vadd.f32 0.18741608, %v1138_v18 }
 0x151   :  { %v677_v0 = vadd.f32 %v2214_v55, %v676_v43  ;;  %vm678_vm13 = vweird.f32 %v3044_v30  ;;  %v3110_v56 = vmul.f32 0.70710677, %v3093_v40  ;;  %v1179_v10 = vadd.f32 0.18741608, %v1178_v13 }
 0x152   :  { %3842 = vst [vmem:[#allocation31_spill] sm:$0xff] %v3102_v32  ;;  %v2066_v35 = vclamps-f32 %v607_v33, 1.0  ;;  %vm680_vm14 = vmor %vm678_vm13, %vm679_vm12  ;;  %v685_v24 = vor.u32 1.1754944e-38, %v684_v46  ;;  %v789_v34 = vmul.f32 %v788_v28, %v2617_v17  ;;  %v1217_v26 = vadd.f32 0.05243302, %v1216_v53 }
 0x153   :  { %v681_v32 = vsel %vm680_vm14, %v2214_v55, %v677_v0  ;;  %vm683_vm15 = vcmp.eq.f32.partialorder %v682_v59, 8.507059e+37  ;;  %v744_v3 = vadd.f32 0.001143296, %v743_v36  ;;  %v1252_v18 = vmul.f32 2.1237322e-06, %v3104_v58 }
 0x154   :  { %v2216_v41 = vpop.eup %2215  ;;  %v686_v21 = vsel %vm683_vm15, %v685_v24, %v681_v32  ;;  %v1292_v30 = vmul.f32 2.1237322e-06, %v3106_v52  ;;  %v790_v43 = vadd.f32 0.4994258, %v789_v34  ;;  %v1330_v13 = vmul.f32 %v3110_v56, %v3110_v56 }
 0x155   :  { %v687_v39 = vmul.f32 %v686_v21, %v3843_v8  ;;  %v3119_v33 = vadd.f32 %v296_v42, %v2450_v11  ;;  %v714_v53 = vmul.f32 %v2216_v41, %v3079_v48  ;;  %v1101_v55 = vadd.f32 1.1283791, %v1100_v54 }
 0x156   :  { %v1140_v46 = vmul.f32 %v1139_v47, %v2953_v25  ;;  %v1655_v28 = vadd.f32 1.0, %v2066_v35  ;;  %v791_v59 = vmul.f32 %v790_v43, %v2617_v17  ;;  %v1180_v36 = vmul.f32 %v1179_v10, %v2967_v16  ;;  %v3844_v17 = vld [vmem:[#allocation19_spill] sm:$0xff]  ;;  %v3845_v10 = vld [vmem:[#allocation21_spill] sm:$0xff] }
 0x157   :  { %v2068_v32 = vclamps-f32 %v687_v39, 1.0  ;;  %v715_v0 = vsub.f32 1.0, %v714_v53  ;;  %v745_v21 = vmul.f32 %v744_v3, %v3841_v60  ;;  %v1218_v8 = vmul.f32 %v1217_v26, %v3014_v6 }
 0x158   :  { %v1253_v24 = vadd.f32 0.00028619796, %v1252_v18  ;;  %v1293_v34 = vadd.f32 0.00028619796, %v1292_v30  ;;  %v3127_v42 = vadd.f32 1.0, %v791_v59  ;;  %v3129_v2 = vmin.f32 %v1330_v13, 16.0 }
 0x159   :  { %v1657_v1 = vadd.f32 1.0, %v2068_v32  ;;  %v3132_v54 = vmul.f32 0.70710677, %v3119_v33  ;;  %v716_v47 = vmul.f32 %v2216_v41, %v715_v0  ;;  %v1687_v35 = vmul.f32 %v1655_v28, %v3844_v17  ;;  %v3850_v0 = vld [vmem:[#allocation34_spill] sm:$0xff] }
 0x15a   :  { %vm719_vm0 = vweird.f32 %v2216_v41  ;;  %v722_v39 = vand.u32 2147483647, %v3079_v48  ;;  %2217 = vrcp.f32 %v3127_v42  ;;  %v724_v18 = vand.u32 2147483648, %v3079_v48 }
 0x15b   :  { %v1689_v26 = vmul.f32 %v1657_v1, %v3845_v10  ;;  %v717_v3 = vadd.f32 %v2216_v41, %v716_v47  ;;  %v746_v30 = vadd.f32 0.014752088, %v745_v21  ;;  %v1141_v43 = vadd.f32 1.1283791, %v1140_v46 }
 0x15c   :  { %v3140_v13 = vmul.f32 0.5, %v2912_v29  ;;  %v3143_v53 = vmul.f32 0.5, %v2961_v15  ;;  %vm718_vm1 = vweird.f32 %v3079_v48  ;;  %v3147_v28 = vmul.f32 %v1101_v55, %v2893_v31 }
 0x15d   :  { %v1749_v59 = vpack.c.bf16 %v1689_v26, %v1687_v35  ;;  %v1254_v32 = vmul.f32 %v1253_v24, %v3104_v58  ;;  %v1294_v1 = vmul.f32 %v1293_v34, %v3106_v52  ;;  %vm3152_vm2 = vmor %vm718_vm1, %vm719_vm0  ;;  %v1181_v29 = vadd.f32 1.1283791, %v1180_v36 }
 0x15e   :  { %3846 = vst [vmem:[#allocation36_spill] sm:$0xff] %v3140_v13  ;;  %v1219_v46 = vadd.f32 0.18741608, %v1218_v8  ;;  %v1370_v15 = vmul.f32 %v3132_v54, %v3132_v54  ;;  %v721_v48 = vsel %vm3152_vm2, %v2216_v41, %v717_v3  ;;  %v1332_v31 = vmul.f32 2.1237322e-06, %v3129_v2 }
 0x15f   :  { %3847 = vst [vmem:[#allocation17_spill] sm:$0xff] %v3143_v53  ;;  %1924 = vmatmul.bf16.gmra.mxu3 %v1749_v59  ;;  %vm723_vm3 = vcmp.eq.f32.partialorder %v722_v39, 8.507059e+37  ;;  %v725_v55 = vor.u32 1.1754944e-38, %v724_v18  ;;  %v747_v21 = vmul.f32 %v746_v30, %v3841_v60  ;;  %v3163_v34 = vmul.f32 %v1141_v43, %v2918_v7 }
 0x160   :  { %v2218_v24 = vpop.eup %2217  ;;  %v823_v36 = vmul.f32 3.8918573e-05, %v2636_v12  ;;  %v863_v8 = vmul.f32 3.8918573e-05, %v2657_v45  ;;  %v943_v47 = vmul.f32 3.8918573e-05, %v2714_v20  ;;  %v1220_v39 = vmul.f32 %v1219_v46, %v3014_v6 }
 0x161   :  { %v1255_v17 = vadd.f32 0.0036580483, %v1254_v32  ;;  %v1295_v35 = vadd.f32 0.0036580483, %v1294_v1  ;;  %v726_v41 = vsel %vm723_vm3, %v725_v55, %v721_v48  ;;  %v794_v10 = vmul.f32 %v2218_v24, %v3127_v42 }
 0x162   :  { %v3170_v26 = vmin.f32 %v1370_v15, 16.0  ;;  %v748_v3 = vadd.f32 0.112945676, %v747_v21  ;;  %v824_v18 = vadd.f32 0.001143296, %v823_v36  ;;  %v804_v43 = vand.u32 2147483648, %v3127_v42 }
 0x163   :  { %v1333_v30 = vadd.f32 0.00028619796, %v1332_v31  ;;  %v795_v7 = vsub.f32 1.0, %v794_v10  ;;  %v864_v59 = vadd.f32 0.001143296, %v863_v8  ;;  %v727_v53 = vmul.f32 %v726_v41, %v3850_v0 }
 0x164   :  { %v749_v13 = vmul.f32 %v748_v3, %v3841_v60  ;;  %v825_v32 = vmul.f32 %v824_v18, %v2636_v12  ;;  %v944_v1 = vadd.f32 0.001143296, %v943_v47  ;;  %vm799_vm4 = vweird.f32 %v2218_v24 }
 0x165   :  { %v796_v48 = vmul.f32 %v2218_v24, %v795_v7  ;;  %v802_v46 = vand.u32 2147483647, %v3127_v42  ;;  %v865_v15 = vmul.f32 %v864_v59, %v2657_v45  ;;  %v3179_v55 = vmul.f32 %v1181_v29, %v2928_v22 }
 0x166   :  { %v1372_v31 = vmul.f32 2.1237322e-06, %v3170_v26  ;;  %v750_v21 = vadd.f32 0.4994258, %v749_v13  ;;  %v826_v36 = vadd.f32 0.014752088, %v825_v32  ;;  %vm798_vm5 = vweird.f32 %v3127_v42 }
 0x167   :  { %v797_v8 = vadd.f32 %v2218_v24, %v796_v48  ;;  %v866_v41 = vadd.f32 0.014752088, %v865_v15  ;;  %v945_v10 = vmul.f32 %v944_v1, %v2714_v20  ;;  %v2069_v47 = vclamps-f32 %v727_v53, 1.0  ;;  %vm800_vm6 = vmor %vm798_vm5, %vm799_vm4 }
 0x168   :  { %v805_v3 = vor.u32 1.1754944e-38, %v804_v43  ;;  %v751_v18 = vmul.f32 %v750_v21, %v3841_v60  ;;  %v827_v7 = vmul.f32 %v826_v36, %v2636_v12  ;;  %v1221_v59 = vadd.f32 1.1283791, %v1220_v39 }
 0x169   :  { %v801_v22 = vsel %vm800_vm6, %v2218_v24, %v797_v8  ;;  %vm803_vm7 = vcmp.eq.f32.partialorder %v802_v46, 8.507059e+37  ;;  %v867_v29 = vmul.f32 %v866_v41, %v2657_v45  ;;  %v1334_v13 = vmul.f32 %v1333_v30, %v3129_v2 }
 0x16a   :  { %v806_v0 = vsel %vm803_vm7, %v805_v3, %v801_v22  ;;  %v3188_v32 = vadd.f32 1.0, %v751_v18  ;;  %v828_v42 = vadd.f32 0.112945676, %v827_v7  ;;  %v1256_v1 = vmul.f32 %v1255_v17, %v3104_v58  ;;  %v3852_v18 = vld [vmem:[#allocation22_spill] sm:$0xff]  ;;  %v3853_v22 = vld [vmem:[#allocation25_spill] sm:$0xff] }
 0x16b   :  { %v807_v53 = vmul.f32 %v806_v0, %v2939_v14  ;;  %v868_v43 = vadd.f32 0.112945676, %v867_v29  ;;  %v946_v48 = vadd.f32 0.014752088, %v945_v10  ;;  %v1296_v60 = vmul.f32 %v1295_v35, %v3106_v52 }
 0x16c   :  { %v1373_v15 = vadd.f32 0.00028619796, %v1372_v31  ;;  %v1658_v39 = vadd.f32 1.0, %v2069_v47  ;;  %2219 = vrcp.f32 %v3188_v32  ;;  %v3195_v24 = vmul.f32 %v1221_v59, %v2980_v19  ;;  %v249_v59 = vpop.f32.mrf.mxu0 }
 0x16d   :  { %v2071_v30 = vclamps-f32 %v807_v53, 1.0  ;;  %v829_v46 = vmul.f32 %v828_v42, %v2636_v12  ;;  %v869_v21 = vmul.f32 %v868_v43, %v2657_v45  ;;  %v3200_v17 = vmul.f32 0.5, %v3048_v63  ;;  %v298_v63 = vpop.f32.mrf.mxu1 }
 0x16e   :  { %v3203_v14 = vmul.f32 0.5, %v3052_v51  ;;  %v1335_v36 = vadd.f32 0.0036580483, %v1334_v13  ;;  %v903_v35 = vmul.f32 3.8918573e-05, %v2677_v49  ;;  %v947_v19 = vmul.f32 %v946_v48, %v2714_v20 }
 0x16f   :  { %v1660_v31 = vadd.f32 1.0, %v2071_v30  ;;  %v830_v8 = vadd.f32 0.4994258, %v829_v46  ;;  %v870_v41 = vadd.f32 0.4994258, %v869_v21  ;;  %v1374_v3 = vmul.f32 %v1373_v15, %v3170_v26 }
 0x170   :  { %3851 = vst [vmem:[#allocation20_spill] sm:$0xff] %v3203_v14  ;;  %v1257_v10 = vadd.f32 0.05243302, %v1256_v1  ;;  %v1297_v47 = vadd.f32 0.05243302, %v1296_v60  ;;  %v1690_v7 = vmul.f32 %v1658_v39, %v3852_v18  ;;  %v3212_v13 = vadd.f32 %v249_v59, %v2448_v9 }
 0x171   :  { %v1692_v29 = vmul.f32 %v1660_v31, %v3853_v22  ;;  %v831_v51 = vmul.f32 %v830_v8, %v2636_v12  ;;  %v3215_v0 = vadd.f32 %v298_v63, %v2450_v11  ;;  %v3218_v1 = vmul.f32 0.5, %v3093_v40 }
 0x172   :  { %v2220_v42 = vpop.eup %2219  ;;  %v1336_v53 = vmul.f32 %v1335_v36, %v3129_v2  ;;  %v871_v43 = vmul.f32 %v870_v41, %v2657_v45  ;;  %v904_v48 = vadd.f32 0.001143296, %v903_v35  ;;  %v948_v12 = vadd.f32 0.112945676, %v947_v19 }
 0x173   :  { %3854 = vst [vmem:[#allocation26_spill] sm:$0xff] %v3218_v1  ;;  %v1750_v60 = vpack.c.bf16 %v1692_v29, %v1690_v7  ;;  %v754_v15 = vmul.f32 %v2220_v42, %v3188_v32  ;;  %v3223_v39 = vadd.f32 1.0, %v831_v51  ;;  %v1258_v30 = vmul.f32 %v1257_v10, %v3104_v58 }
 0x174   :  { %v1298_v46 = vmul.f32 %v1297_v47, %v3106_v52  ;;  %v1375_v21 = vadd.f32 0.0036580483, %v1374_v3  ;;  %v3228_v31 = vmul.f32 0.70710677, %v3212_v13  ;;  %v3232_v45 = vmul.f32 0.70710677, %v3215_v0 }
 0x175   :  { %1880 = vmatmul.bf16.gmra.mxu2 %v1750_v60  ;;  %v755_v40 = vsub.f32 1.0, %v754_v15  ;;  %2221 = vrcp.f32 %v3223_v39  ;;  %v983_v36 = vmul.f32 3.8918573e-05, %v2756_v44  ;;  %v1337_v35 = vadd.f32 0.05243302, %v1336_v53 }
 0x176   :  { %3855 = vst [vmem:[#allocation15_spill] sm:$0xff] %v3232_v45  ;;  %v764_v8 = vand.u32 2147483648, %v3188_v32  ;;  %v3236_v41 = vadd.f32 1.0, %v871_v43  ;;  %v905_v19 = vmul.f32 %v904_v48, %v2677_v49  ;;  %vm759_vm8 = vweird.f32 %v2220_v42  ;;  %v252_v48 = vpop.f32.mrf.mxu0 }
 0x177   :  { %v756_v10 = vmul.f32 %v2220_v42, %v755_v40  ;;  %v1410_v47 = vmul.f32 %v3228_v31, %v3228_v31  ;;  %v949_v3 = vmul.f32 %v948_v12, %v2714_v20  ;;  %v1259_v18 = vadd.f32 0.18741608, %v1258_v30 }
 0x178   :  { %v1376_v7 = vmul.f32 %v1375_v21, %v3170_v26  ;;  %v762_v59 = vand.u32 2147483647, %v3188_v32  ;;  %2223 = vrcp.f32 %v3236_v41  ;;  %vm758_vm9 = vweird.f32 %v3188_v32 }
 0x179   :  { %v757_v63 = vadd.f32 %v2220_v42, %v756_v10  ;;  %v1450_v22 = vmul.f32 %v3232_v45, %v3232_v45  ;;  %v984_v29 = vadd.f32 0.001143296, %v983_v36  ;;  %v1299_v51 = vadd.f32 0.18741608, %v1298_v46  ;;  %vm760_vm10 = vmor %vm758_vm9, %vm759_vm8 }
 0x17a   :  { %v1338_v53 = vmul.f32 %v1337_v35, %v3129_v2  ;;  %v3250_v43 = vmul.f32 0.5, %v3119_v33  ;;  %v906_v60 = vadd.f32 0.014752088, %v905_v19  ;;  %v765_v30 = vor.u32 1.1754944e-38, %v764_v8 }
 0x17b   :  { %v2222_v15 = vpop.eup %2221  ;;  %v761_v12 = vsel %vm760_vm10, %v2220_v42, %v757_v63  ;;  %v3252_v21 = vmin.f32 %v1410_v47, 16.0  ;;  %v950_v40 = vadd.f32 0.4994258, %v949_v3  ;;  %v1260_v32 = vmul.f32 %v1259_v18, %v3104_v58 }
 0x17c   :  { %3856 = vst [vmem:[#allocation32_spill] sm:$0xff] %v3250_v43  ;;  %v1377_v10 = vadd.f32 0.05243302, %v1376_v7  ;;  %vm763_vm11 = vcmp.eq.f32.partialorder %v762_v59, 8.507059e+37  ;;  %v834_v46 = vmul.f32 %v2222_v15, %v3223_v39  ;;  %v3256_v35 = vmin.f32 %v1450_v22, 16.0 }
 0x17d   :  { %v766_v36 = vsel %vm763_vm11, %v765_v30, %v761_v12  ;;  %v3259_v33 = vadd.f32 %v252_v48, %v2448_v9  ;;  %v985_v19 = vmul.f32 %v984_v29, %v2756_v44  ;;  %v3265_v42 = vmul.f32 %v1299_v51, %v3106_v52  ;;  %v301_v48 = vpop.f32.mrf.mxu1 }
 0x17e   :  { %v3262_v43 = vpop.eup %2223  ;;  %v1339_v8 = vadd.f32 0.18741608, %v1338_v53  ;;  %v835_v47 = vsub.f32 1.0, %v834_v46  ;;  %v907_v3 = vmul.f32 %v906_v60, %v2677_v49  ;;  %v842_v18 = vand.u32 2147483647, %v3223_v39 }
 0x17f   :  { %3857 = vst [vmem:[#allocation19_spill] sm:$0xff] %v3259_v33  ;;  %v844_v7 = vand.u32 2147483648, %v3223_v39  ;;  %v1412_v59 = vmul.f32 2.1237322e-06, %v3252_v21  ;;  %v951_v63 = vmul.f32 %v950_v40, %v2714_v20  ;;  %v767_v22 = vmul.f32 %v766_v36, %v2834_v50 }
 0x180   :  { %v836_v29 = vmul.f32 %v2222_v15, %v835_v47  ;;  %vm839_vm12 = vweird.f32 %v2222_v15  ;;  %v874_v51 = vmul.f32 %v3262_v43, %v3236_v41  ;;  %v1378_v53 = vmul.f32 %v1377_v10, %v3170_v26 }
 0x181   :  { %v1452_v60 = vmul.f32 2.1237322e-06, %v3256_v35  ;;  %v3278_v12 = vmul.f32 0.70710677, %v3259_v33  ;;  %v986_v30 = vadd.f32 0.014752088, %v985_v19  ;;  %vm838_vm13 = vweird.f32 %v3223_v39 }
 0x182   :  { %v837_v46 = vadd.f32 %v2222_v15, %v836_v29  ;;  %v875_v20 = vsub.f32 1.0, %v874_v51  ;;  %v908_v40 = vadd.f32 0.112945676, %v907_v3  ;;  %vm840_vm14 = vmor %vm838_vm13, %vm839_vm12  ;;  %vm843_vm15 = vcmp.eq.f32.partialorder %v842_v18, 8.507059e+37 }
 0x183   :  { %v845_v50 = vor.u32 1.1754944e-38, %v844_v7  ;;  %v1413_v36 = vadd.f32 0.00028619796, %v1412_v59  ;;  %v3282_v47 = vadd.f32 %v301_v48, %v2450_v11  ;;  %v2070_v1 = vclamps-f32 %v767_v22, 1.0 }
 0x184   :  { %v841_v10 = vsel %vm840_vm14, %v2222_v15, %v837_v46  ;;  %v876_v14 = vmul.f32 %v3262_v43, %v875_v20  ;;  %v3285_v45 = vadd.f32 1.0, %v951_v63  ;;  %v1453_v19 = vadd.f32 0.00028619796, %v1452_v60 }
 0x185   :  { %3858 = vst [vmem:[#allocation21_spill] sm:$0xff] %v3282_v47  ;;  %v846_v33 = vsel %vm843_vm15, %v845_v50, %v841_v10  ;;  %v1490_v39 = vmul.f32 %v3278_v12, %v3278_v12  ;;  %vm879_vm0 = vweird.f32 %v3262_v43  ;;  %v884_v7 = vand.u32 2147483648, %v3236_v41 }
 0x186   :  { %v847_v3 = vmul.f32 %v846_v33, %v2965_v5  ;;  %v877_v18 = vadd.f32 %v3262_v43, %v876_v14  ;;  %2225 = vrcp.f32 %v3285_v45  ;;  %v1414_v15 = vmul.f32 %v1413_v36, %v3252_v21 }
 0x187   :  { %v3296_v59 = vmul.f32 0.70710677, %v3282_v47  ;;  %vm878_vm1 = vweird.f32 %v3236_v41  ;;  %v882_v63 = vand.u32 2147483647, %v3236_v41  ;;  %v1261_v22 = vadd.f32 1.1283791, %v1260_v32 }
 0x188   :  { %v2072_v29 = vclamps-f32 %v847_v3, 1.0  ;;  %v1659_v48 = vadd.f32 1.0, %v2070_v1  ;;  %vm3300_vm2 = vmor %vm878_vm1, %vm879_vm0  ;;  %v909_v14 = vmul.f32 %v908_v40, %v2677_v49  ;;  %v1340_v33 = vmul.f32 %v1339_v8, %v3129_v2  ;;  %v3861_v40 = vld [vmem:[#allocation23_spill] sm:$0xff] }
 0x189   :  { %v1379_v51 = vadd.f32 0.18741608, %v1378_v53  ;;  %v1454_v60 = vmul.f32 %v1453_v19, %v3256_v35  ;;  %v881_v46 = vsel %vm3300_vm2, %v3262_v43, %v877_v18  ;;  %v3310_v41 = vmin.f32 %v1490_v39, 16.0  ;;  %v3862_v19 = vld [vmem:[#allocation27_spill] sm:$0xff] }
 0x18a   :  { %v1661_v20 = vadd.f32 1.0, %v2072_v29  ;;  %v885_v32 = vor.u32 1.1754944e-38, %v884_v7  ;;  %v1023_v1 = vmul.f32 3.8918573e-05, %v2783_v62  ;;  %v1415_v50 = vadd.f32 0.0036580483, %v1414_v15 }
 0x18b   :  { %v1530_v36 = vmul.f32 %v3296_v59, %v3296_v59  ;;  %vm883_vm3 = vcmp.eq.f32.partialorder %v882_v63, 8.507059e+37  ;;  %v987_v8 = vmul.f32 %v986_v30, %v2756_v44  ;;  %v1691_v10 = vmul.f32 %v1659_v48, %v3861_v40 }
 0x18c   :  { %v2226_v53 = vpop.eup %2225  ;;  %v1693_v3 = vmul.f32 %v1661_v20, %v3862_v19  ;;  %v886_v5 = vsel %vm883_vm3, %v885_v32, %v881_v46  ;;  %v910_v43 = vadd.f32 0.4994258, %v909_v14  ;;  %v3319_v39 = vmul.f32 %v1261_v22, %v3071_v38 }
 0x18d   :  { %v1301_v18 = vadd.f32 1.1283791, %v3265_v42  ;;  %v1455_v7 = vadd.f32 0.0036580483, %v1454_v60  ;;  %v954_v15 = vmul.f32 %v2226_v53, %v3285_v45  ;;  %v1341_v29 = vadd.f32 1.1283791, %v1340_v33 }
 0x18e   :  { %v1380_v63 = vmul.f32 %v1379_v51, %v3170_v26  ;;  %v1751_v47 = vpack.c.bf16 %v1693_v3, %v1691_v10  ;;  %v1492_v30 = vmul.f32 2.1237322e-06, %v3310_v41  ;;  %v1416_v48 = vmul.f32 %v1415_v50, %v3252_v21 }
 0x18f   :  { %v3326_v40 = vmin.f32 %v1530_v36, 16.0  ;;  %v887_v14 = vmul.f32 %v886_v5, %v2970_v37  ;;  %v955_v46 = vsub.f32 1.0, %v954_v15  ;;  %v964_v38 = vand.u32 2147483648, %v3285_v45 }
 0x190   :  { %1929 = vmatmul.bf16.gmra.mxu3 %v1751_v47  ;;  %v911_v42 = vmul.f32 %v910_v43, %v2677_v49  ;;  %v988_v22 = vadd.f32 0.112945676, %v987_v8  ;;  %v1024_v60 = vadd.f32 0.001143296, %v1023_v1  ;;  %v1456_v33 = vmul.f32 %v1455_v7, %v3256_v35 }
 0x191   :  { %v956_v51 = vmul.f32 %v2226_v53, %v955_v46  ;;  %vm959_vm4 = vweird.f32 %v2226_v53  ;;  %v962_v20 = vand.u32 2147483647, %v3285_v45  ;;  %v1103_v47 = vmul.f32 3.8918573e-05, %v2924_v4 }
 0x192   :  { %v3333_v32 = vadd.f32 1.0, %v911_v42  ;;  %v989_v50 = vmul.f32 %v988_v22, %v2756_v44  ;;  %v1025_v37 = vmul.f32 %v1024_v60, %v2783_v62  ;;  %v1493_v36 = vadd.f32 0.00028619796, %v1492_v30 }
 0x193   :  { %v1532_v10 = vmul.f32 2.1237322e-06, %v3326_v40  ;;  %v957_v49 = vadd.f32 %v2226_v53, %v956_v51  ;;  %vm958_vm5 = vweird.f32 %v3285_v45  ;;  %v1417_v1 = vadd.f32 0.05243302, %v1416_v48 }
 0x194   :  { %v2073_v8 = vclamps-f32 %v887_v14, 1.0  ;;  %vm960_vm6 = vmor %vm958_vm5, %vm959_vm4  ;;  %v965_v19 = vor.u32 1.1754944e-38, %v964_v38  ;;  %2227 = vrcp.f32 %v3333_v32  ;;  %v1381_v3 = vadd.f32 1.1283791, %v1380_v63 }
 0x195   :  { %v961_v5 = vsel %vm960_vm6, %v2226_v53, %v957_v49  ;;  %vm963_vm7 = vcmp.eq.f32.partialorder %v962_v20, 8.507059e+37  ;;  %v990_v43 = vadd.f32 0.4994258, %v989_v50  ;;  %v3342_v7 = vmul.f32 %v1301_v18, %v3074_v61 }
 0x196   :  { %v966_v15 = vsel %vm963_vm7, %v965_v19, %v961_v5  ;;  %v1026_v30 = vadd.f32 0.014752088, %v1025_v37  ;;  %v1104_v46 = vadd.f32 0.001143296, %v1103_v47  ;;  %v1457_v42 = vadd.f32 0.05243302, %v1456_v33 }
 0x197   :  { %v1494_v22 = vmul.f32 %v1493_v36, %v3310_v41  ;;  %v967_v45 = vmul.f32 %v966_v15, %v2983_v23  ;;  %v991_v48 = vmul.f32 %v990_v43, %v2756_v44  ;;  %v1418_v14 = vmul.f32 %v1417_v1, %v3252_v21  ;;  %v3864_v1 = vld [vmem:[#allocation33_spill] sm:$0xff]  ;;  %v303_v15 = vpop.f32.mrf.mxu1 }
 0x198   :  { %v1533_v38 = vadd.f32 0.00028619796, %v1532_v10  ;;  %v1662_v63 = vadd.f32 1.0, %v2073_v8  ;;  %v1027_v53 = vmul.f32 %v1026_v30, %v2783_v62  ;;  %v3350_v60 = vmul.f32 %v1341_v29, %v3110_v56 }
 0x199   :  { %v3353_v61 = vmul.f32 %v1381_v3, %v3132_v54  ;;  %v2075_v18 = vclamps-f32 %v967_v45, 1.0  ;;  %v3355_v33 = vadd.f32 1.0, %v991_v48  ;;  %v3358_v23 = vmul.f32 0.5, %v3212_v13  ;;  %v254_v54 = vpop.f32.mrf.mxu0  ;;  %v3863_v13 = vld [vmem:[#allocation29_spill] sm:$0xff] }
 0x19a   :  { %v2228_v51 = vpop.eup %2227  ;;  %v3361_v44 = vmul.f32 0.5, %v3215_v0  ;;  %v1028_v20 = vadd.f32 0.112945676, %v1027_v53  ;;  %v1105_v50 = vmul.f32 %v1104_v46, %v2924_v4  ;;  %v1458_v37 = vmul.f32 %v1457_v42, %v3256_v35 }
 0x19b   :  { %v1664_v56 = vadd.f32 1.0, %v2075_v18  ;;  %v914_v29 = vmul.f32 %v2228_v51, %v3333_v32  ;;  %2229 = vrcp.f32 %v3355_v33  ;;  %v1419_v47 = vadd.f32 0.18741608, %v1418_v14 }
 0x19c   :  { %v1495_v36 = vadd.f32 0.0036580483, %v1494_v22  ;;  %v1534_v10 = vmul.f32 %v1533_v38, %v3326_v40  ;;  %v1694_v49 = vmul.f32 %v1662_v63, %v3863_v13  ;;  %v922_v19 = vand.u32 2147483647, %v3333_v32 }
 0x19d   :  { %v1696_v0 = vmul.f32 %v1664_v56, %v3864_v1  ;;  %v915_v8 = vsub.f32 1.0, %v914_v29  ;;  %v1029_v3 = vmul.f32 %v1028_v20, %v2783_v62  ;;  %v924_v5 = vand.u32 2147483648, %v3333_v32 }
 0x19e   :  { %v3374_v43 = vadd.f32 %v254_v54, %v2448_v9  ;;  %v1106_v30 = vadd.f32 0.014752088, %v1105_v50  ;;  %v1063_v46 = vmul.f32 3.8918573e-05, %v2818_v27  ;;  %vm919_vm8 = vweird.f32 %v2228_v51 }
 0x19f   :  { %v1752_v42 = vpack.c.bf16 %v1696_v0, %v1694_v49  ;;  %v916_v22 = vmul.f32 %v2228_v51, %v915_v8  ;;  %v1030_v45 = vadd.f32 0.4994258, %v1029_v3  ;;  %v1459_v48 = vadd.f32 0.18741608, %v1458_v37 }
 0x1a0   :  { %v1496_v14 = vmul.f32 %v1495_v36, %v3310_v41  ;;  %v1535_v38 = vadd.f32 0.0036580483, %v1534_v10  ;;  %v1107_v63 = vmul.f32 %v1106_v30, %v2924_v4  ;;  %vm918_vm9 = vweird.f32 %v3333_v32 }
 0x1a1   :  { %v2230_v53 = vpop.eup %2229  ;;  %1885 = vmatmul.bf16.gmra.mxu2 %v1752_v42  ;;  %v917_v18 = vadd.f32 %v2228_v51, %v916_v22  ;;  %v3381_v9 = vadd.f32 %v303_v15, %v2450_v11  ;;  %v1031_v20 = vmul.f32 %v1030_v45, %v2783_v62  ;;  %vm920_vm10 = vmor %vm918_vm9, %vm919_vm8  ;;  %v925_v50 = vor.u32 1.1754944e-38, %v924_v5 }
 0x1a2   :  { %v994_v56 = vmul.f32 %v2230_v53, %v3355_v33  ;;  %v3386_v37 = vmul.f32 0.70710677, %v3374_v43  ;;  %v1108_v29 = vadd.f32 0.112945676, %v1107_v63  ;;  %vm923_vm11 = vcmp.eq.f32.partialorder %v922_v19, 8.507059e+37 }
 0x1a3   :  { %v921_v54 = vsel %vm920_vm10, %v2228_v51, %v917_v18  ;;  %v3388_v36 = vadd.f32 1.0, %v1031_v20  ;;  %v1064_v10 = vadd.f32 0.001143296, %v1063_v46  ;;  %v1420_v32 = vmul.f32 %v1419_v47, %v3252_v21 }
 0x1a4   :  { %v926_v13 = vsel %vm923_vm11, %v925_v50, %v921_v54  ;;  %v995_v11 = vsub.f32 1.0, %v994_v56  ;;  %v1109_v49 = vmul.f32 %v1108_v29, %v2924_v4  ;;  %v1002_v62 = vand.u32 2147483647, %v3355_v33 }
 0x1a5   :  { %v1004_v1 = vand.u32 2147483648, %v3355_v33  ;;  %v3395_v0 = vmul.f32 0.70710677, %v3381_v9  ;;  %2231 = vrcp.f32 %v3388_v36  ;;  %v927_v51 = vmul.f32 %v926_v13, %v2974_v57 }
 0x1a6   :  { %v996_v8 = vmul.f32 %v2230_v53, %v995_v11  ;;  %vm999_vm12 = vweird.f32 %v2230_v53  ;;  %v1570_v47 = vmul.f32 %v3386_v37, %v3386_v37  ;;  %v1460_v19 = vmul.f32 %v1459_v48, %v3256_v35 }
 0x1a7   :  { %v1110_v3 = vadd.f32 0.4994258, %v1109_v49  ;;  %v1065_v5 = vmul.f32 %v1064_v10, %v2818_v27  ;;  %v1143_v15 = vmul.f32 3.8918573e-05, %v2953_v25  ;;  %v1497_v30 = vadd.f32 0.05243302, %v1496_v14 }
 0x1a8   :  { %v1536_v46 = vmul.f32 %v1535_v38, %v3326_v40  ;;  %v997_v42 = vadd.f32 %v2230_v53, %v996_v8  ;;  %vm998_vm13 = vweird.f32 %v3355_v33  ;;  %v1005_v57 = vor.u32 1.1754944e-38, %v1004_v1  ;;  %v3865_v10 = vld [vmem:[#allocation16_spill] sm:$0xff] }
 0x1a9   :  { %vm1000_vm14 = vmor %vm998_vm13, %vm999_vm12  ;;  %v1610_v22 = vmul.f32 %v3395_v0, %v3395_v0  ;;  %v1111_v45 = vmul.f32 %v1110_v3, %v2924_v4  ;;  %v1183_v48 = vmul.f32 3.8918573e-05, %v2967_v16  ;;  %v2074_v63 = vclamps-f32 %v927_v51, 1.0 }
 0x1aa   :  { %v1001_v18 = vsel %vm1000_vm14, %v2230_v53, %v997_v42  ;;  %vm1003_vm15 = vcmp.eq.f32.partialorder %v1002_v62, 8.507059e+37  ;;  %v3410_v20 = vmin.f32 %v1570_v47, 16.0  ;;  %v1066_v56 = vadd.f32 0.014752088, %v1065_v5 }
 0x1ab   :  { %v2232_v14 = vpop.eup %2231  ;;  %v1006_v50 = vsel %vm1003_vm15, %v1005_v57, %v1001_v18  ;;  %v3412_v38 = vadd.f32 1.0, %v1111_v45  ;;  %v1144_v33 = vadd.f32 0.001143296, %v1143_v15  ;;  %v3414_v29 = vadd.f32 1.1283791, %v1420_v32  ;;  %v3866_v45 = vld [vmem:[#allocation30_spill] sm:$0xff] }
 0x1ac   :  { %v3416_v54 = vadd.f32 1.1283791, %v1460_v19  ;;  %v1007_v13 = vmul.f32 %v1006_v50, %v3865_v10  ;;  %v1034_v4 = vmul.f32 %v2232_v14, %v3388_v36  ;;  %v3421_v11 = vmul.f32 %v1497_v30, %v3310_v41 }
 0x1ad   :  { %v3423_v53 = vadd.f32 0.05243302, %v1536_v46  ;;  %2233 = vrcp.f32 %v3412_v38  ;;  %v1184_v49 = vadd.f32 0.001143296, %v1183_v48  ;;  %v1663_v1 = vadd.f32 1.0, %v2074_v63  ;;  %v3867_v63 = vld [vmem:[#allocation35_spill] sm:$0xff] }
 0x1ae   :  { %v2076_v62 = vclamps-f32 %v1007_v13, 1.0  ;;  %v1035_v51 = vsub.f32 1.0, %v1034_v4  ;;  %v1044_v32 = vand.u32 2147483648, %v3388_v36  ;;  %v3428_v8 = vmul.f32 2.1237322e-06, %v3410_v20 }
 0x1af   :  { %v3430_v47 = vmin.f32 %v1610_v22, 16.0  ;;  %v1067_v19 = vmul.f32 %v1066_v56, %v2818_v27  ;;  %v1145_v3 = vmul.f32 %v1144_v33, %v2953_v25  ;;  %vm1039_vm0 = vweird.f32 %v2232_v14 }
 0x1b0   :  { %v1665_v5 = vadd.f32 1.0, %v2076_v62  ;;  %v1036_v15 = vmul.f32 %v2232_v14, %v1035_v51  ;;  %v1042_v30 = vand.u32 2147483647, %v3388_v36  ;;  %vm1038_vm1 = vweird.f32 %v3388_v36 }
 0x1b1   :  { %v1068_v46 = vadd.f32 0.112945676, %v1067_v19  ;;  %v1146_v42 = vadd.f32 0.014752088, %v1145_v3  ;;  %v1185_v57 = vmul.f32 %v1184_v49, %v2967_v16  ;;  %v1695_v48 = vmul.f32 %v1663_v1, %v3866_v45  ;;  %vm1040_vm2 = vmor %vm1038_vm1, %vm1039_vm0  ;;  %v3868_v3 = vld [vmem:[#allocation18_spill] sm:$0xff] }
 0x1b2   :  { %v1697_v22 = vmul.f32 %v1665_v5, %v3867_v63  ;;  %v1037_v18 = vadd.f32 %v2232_v14, %v1036_v15  ;;  %v1045_v50 = vor.u32 1.1754944e-38, %v1044_v32  ;;  %v1263_v4 = vmul.f32 3.8918573e-05, %v3104_v58 }
 0x1b3   :  { %v2234_v56 = vpop.eup %2233  ;;  %v1069_v33 = vmul.f32 %v1068_v46, %v2818_v27  ;;  %v1147_v10 = vmul.f32 %v1146_v42, %v2953_v25  ;;  %v1186_v13 = vadd.f32 0.014752088, %v1185_v57  ;;  %vm1043_vm3 = vcmp.eq.f32.partialorder %v1042_v30, 8.507059e+37 }
 0x1b4   :  { %v1753_v36 = vpack.c.bf16 %v1697_v22, %v1695_v48  ;;  %v1041_v62 = vsel %vm1040_vm2, %v2232_v14, %v1037_v18  ;;  %v1114_v49 = vmul.f32 %v2234_v56, %v3412_v38  ;;  %v1122_v1 = vand.u32 2147483647, %v3412_v38 }
 0x1b5   :  { %v1046_v51 = vsel %vm1043_vm3, %v1045_v50, %v1041_v62  ;;  %v1124_v19 = vand.u32 2147483648, %v3412_v38  ;;  %v1070_v32 = vadd.f32 0.4994258, %v1069_v33  ;;  %v1148_v46 = vadd.f32 0.112945676, %v1147_v10 }
 0x1b6   :  { %1934 = vmatmul.bf16.gmra.mxu3 %v1753_v36  ;;  %v1047_v5 = vmul.f32 %v1046_v51, %v3868_v3  ;;  %v1115_v15 = vsub.f32 1.0, %v1114_v49  ;;  %v1187_v42 = vmul.f32 %v1186_v13, %v2967_v16  ;;  %vm1119_vm4 = vweird.f32 %v2234_v56 }
 0x1b7   :  { %v1071_v57 = vmul.f32 %v1070_v32, %v2818_v27  ;;  %v1264_v14 = vadd.f32 0.001143296, %v1263_v4  ;;  %v1223_v30 = vmul.f32 3.8918573e-05, %v3014_v6  ;;  %v1149_v48 = vmul.f32 %v1148_v46, %v2953_v25 }
 0x1b8   :  { %v1116_v45 = vmul.f32 %v2234_v56, %v1115_v15  ;;  %v1188_v63 = vadd.f32 0.112945676, %v1187_v42  ;;  %v1303_v22 = vmul.f32 3.8918573e-05, %v3106_v52  ;;  %v2077_v18 = vclamps-f32 %v1047_v5, 1.0 }
 0x1b9   :  { %vm1118_vm5 = vweird.f32 %v3412_v38  ;;  %v3452_v50 = vadd.f32 1.0, %v1071_v57  ;;  %v1265_v33 = vmul.f32 %v1264_v14, %v3104_v58  ;;  %v1150_v13 = vadd.f32 0.4994258, %v1149_v48 }
 0x1ba   :  { %v1117_v10 = vadd.f32 %v2234_v56, %v1116_v45  ;;  %v1189_v27 = vmul.f32 %v1188_v63, %v2967_v16  ;;  %v1224_v4 = vadd.f32 0.001143296, %v1223_v30  ;;  %v1612_v36 = vmul.f32 2.1237322e-06, %v3430_v47  ;;  %vm1120_vm6 = vmor %vm1118_vm5, %vm1119_vm4 }
 0x1bb   :  { %vm1123_vm7 = vcmp.eq.f32.partialorder %v1122_v1, 8.507059e+37  ;;  %v1125_v62 = vor.u32 1.1754944e-38, %v1124_v19  ;;  %2235 = vrcp.f32 %v3452_v50  ;;  %v1151_v38 = vmul.f32 %v1150_v13, %v2953_v25 }
 0x1bc   :  { %v1121_v49 = vsel %vm1120_vm6, %v2234_v56, %v1117_v10  ;;  %v1190_v51 = vadd.f32 0.4994258, %v1189_v27  ;;  %v1304_v32 = vadd.f32 0.001143296, %v1303_v22  ;;  %v1666_v5 = vadd.f32 1.0, %v2077_v18  ;;  %v3869_v22 = vld [vmem:[#allocation37_spill] sm:$0xff] }
 0x1bd   :  { %v1126_v3 = vsel %vm1123_vm7, %v1125_v62, %v1121_v49  ;;  %v1082_v15 = vand.u32 2147483647, %v3452_v50  ;;  %v1266_v46 = vadd.f32 0.014752088, %v1265_v33  ;;  %v3462_v57 = vadd.f32 1.0, %v1151_v38 }
 0x1be   :  { %v1127_v42 = vmul.f32 %v1126_v3, %v3147_v28  ;;  %v1191_v14 = vmul.f32 %v1190_v51, %v2967_v16  ;;  %v1225_v1 = vmul.f32 %v1224_v4, %v3014_v6  ;;  %v3468_v56 = vmul.f32 %v3414_v29, %v3228_v31 }
 0x1bf   :  { %v3471_v25 = vadd.f32 0.00028619796, %v3428_v8  ;;  %v1084_v19 = vand.u32 2147483648, %v3452_v50  ;;  %v1267_v30 = vmul.f32 %v1266_v46, %v3104_v58  ;;  %v3475_v45 = vadd.f32 0.00028619796, %v1612_v36  ;;  %v3872_v36 = vld [vmem:[#allocation24_spill] sm:$0xff] }
 0x1c0   :  { %v2079_v28 = vclamps-f32 %v1127_v42, 1.0  ;;  %vm1078_vm8 = vweird.f32 %v3452_v50  ;;  %2237 = vrcp.f32 %v3462_v57  ;;  %v3479_v48 = vadd.f32 1.0, %v1191_v14 }
 0x1c1   :  { %v2236_v16 = vpop.eup %2235  ;;  %v1268_v63 = vadd.f32 0.112945676, %v1267_v30  ;;  %v1226_v31 = vadd.f32 0.014752088, %v1225_v1  ;;  %v1305_v29 = vmul.f32 %v1304_v32, %v3106_v52  ;;  %v1698_v18 = vmul.f32 %v1666_v5, %v3869_v22 }
 0x1c2   :  { %v1668_v8 = vadd.f32 1.0, %v2079_v28  ;;  %v1074_v33 = vmul.f32 %v2236_v16, %v3452_v50  ;;  %vm3484_vm9 = vcmp.eq.f32.partialorder %v1082_v15, 8.507059e+37  ;;  %v1085_v13 = vor.u32 1.1754944e-38, %v1084_v19  ;;  %v3875_v50 = vld [vmem:[#allocation28_spill] sm:$0xff] }
 0x1c3   :  { %v1162_v27 = vand.u32 2147483647, %v3462_v57  ;;  %v1164_v4 = vand.u32 2147483648, %v3462_v57  ;;  %2239 = vrcp.f32 %v3479_v48  ;;  %v1269_v38 = vmul.f32 %v1268_v63, %v3104_v58 }
 0x1c4   :  { %v1700_v62 = vmul.f32 %v1668_v8, %v3872_v36  ;;  %v1075_v49 = vsub.f32 1.0, %v1074_v33  ;;  %v1343_v51 = vmul.f32 3.8918573e-05, %v3129_v2  ;;  %vm1158_vm10 = vweird.f32 %v3462_v57 }
 0x1c5   :  { %v1227_v32 = vmul.f32 %v1226_v31, %v3014_v6  ;;  %v1306_v3 = vadd.f32 0.014752088, %v1305_v29  ;;  %v1423_v5 = vmul.f32 3.8918573e-05, %v3252_v21  ;;  %vm1079_vm11 = vweird.f32 %v2236_v16 }
 0x1c6   :  { %v2238_v15 = vpop.eup %2237  ;;  %v1754_v46 = vpack.c.bf16 %v1700_v62, %v1698_v18  ;;  %v1076_v42 = vmul.f32 %v2236_v16, %v1075_v49  ;;  %v1270_v14 = vadd.f32 0.4994258, %v1269_v38  ;;  %vm3498_vm12 = vcmp.eq.f32.partialorder %v1162_v27, 8.507059e+37  ;;  %vm1080_vm14 = vmor %vm1078_vm8, %vm1079_vm11 }
 0x1c7   :  { %v1154_v1 = vmul.f32 %v2238_v15, %v3462_v57  ;;  %v1165_v30 = vor.u32 1.1754944e-38, %v1164_v4  ;;  %v1228_v28 = vadd.f32 0.112945676, %v1227_v32  ;;  %v1307_v63 = vmul.f32 %v1306_v3, %v3106_v52 }
 0x1c8   :  { %1890 = vmatmul.bf16.gmra.mxu2 %v1754_v46  ;;  %v1077_v31 = vadd.f32 %v2236_v16, %v1076_v42  ;;  %vm1198_vm13 = vweird.f32 %v3479_v48  ;;  %v1202_v29 = vand.u32 2147483647, %v3479_v48  ;;  %v1204_v8 = vand.u32 2147483648, %v3479_v48 }
 0x1c9   :  { %v1271_v22 = vmul.f32 %v1270_v14, %v3104_v58  ;;  %v2240_v18 = vpop.eup %2239  ;;  %v1155_v33 = vsub.f32 1.0, %v1154_v1  ;;  %v1229_v27 = vmul.f32 %v1228_v28, %v3014_v6  ;;  %v1308_v4 = vadd.f32 0.112945676, %v1307_v63 }
 0x1ca   :  { %v1344_v36 = vadd.f32 0.001143296, %v1343_v51  ;;  %v1081_v62 = vsel %vm1080_vm14, %v2236_v16, %v1077_v31  ;;  %vm1159_vm15 = vweird.f32 %v2238_v15  ;;  %v1194_v49 = vmul.f32 %v2240_v18, %v3479_v48 }
 0x1cb   :  { %v3511_v38 = vadd.f32 1.0, %v1271_v22  ;;  %v1086_v32 = vsel %vm3484_vm9, %v1085_v13, %v1081_v62  ;;  %v1156_v3 = vmul.f32 %v2238_v15, %v1155_v33  ;;  %v1230_v58 = vadd.f32 0.4994258, %v1229_v27  ;;  %vm1160_vm1 = vmor %vm1158_vm10, %vm1159_vm15 }
 0x1cc   :  { %v1309_v46 = vmul.f32 %v1308_v4, %v3106_v52  ;;  %v1087_v42 = vmul.f32 %v1086_v32, %v3875_v50  ;;  %v1195_v14 = vsub.f32 1.0, %v1194_v49  ;;  %vm3517_vm0 = vcmp.eq.f32.partialorder %v1202_v29, 8.507059e+37 }
 0x1cd   :  { %2241 = vrcp.f32 %v3511_v38  ;;  %v1157_v16 = vadd.f32 %v2238_v15, %v1156_v3  ;;  %v1205_v51 = vor.u32 1.1754944e-38, %v1204_v8  ;;  %v1231_v28 = vmul.f32 %v1230_v58, %v3014_v6 }
 0x1ce   :  { %v1345_v10 = vmul.f32 %v1344_v36, %v3129_v2  ;;  %v2078_v13 = vclamps-f32 %v1087_v42, 1.0  ;;  %v1196_v63 = vmul.f32 %v2240_v18, %v1195_v14  ;;  %vm1199_vm2 = vweird.f32 %v2240_v18  ;;  %v3880_v42 = vld [vmem:[#allocation38_spill] sm:$0xff] }
 0x1cf   :  { %v1310_v31 = vadd.f32 0.4994258, %v1309_v46  ;;  %v1161_v29 = vsel %vm1160_vm1, %v2238_v15, %v1157_v16  ;;  %v1282_v22 = vand.u32 2147483647, %v3511_v38  ;;  %v1284_v33 = vand.u32 2147483648, %v3511_v38  ;;  %vm1200_vm3 = vmor %vm1198_vm13, %vm1199_vm2 }
 0x1d0   :  { %v3529_v27 = vadd.f32 1.0, %v1231_v28  ;;  %v1166_v6 = vsel %vm3498_vm12, %v1165_v30, %v1161_v29  ;;  %v1197_v8 = vadd.f32 %v2240_v18, %v1196_v63  ;;  %v1424_v36 = vadd.f32 0.001143296, %v1423_v5 }
 0x1d1   :  { %v1311_v4 = vmul.f32 %v1310_v31, %v3106_v52  ;;  %v1167_v57 = vmul.f32 %v1166_v6, %v3163_v34  ;;  %v1667_v62 = vadd.f32 1.0, %v2078_v13  ;;  %v1383_v15 = vmul.f32 3.8918573e-05, %v3170_v26  ;;  %v3881_v13 = vld [vmem:[#allocation31_spill] sm:$0xff] }
 0x1d2   :  { %2243 = vrcp.f32 %v3529_v27  ;;  %v1201_v32 = vsel %vm1200_vm3, %v2240_v18, %v1197_v8  ;;  %vm1278_vm4 = vweird.f32 %v3511_v38  ;;  %v1346_v30 = vadd.f32 0.014752088, %v1345_v10 }
 0x1d3   :  { %v2242_v49 = vpop.eup %2241  ;;  %v3540_v19 = vadd.f32 1.0, %v1311_v4  ;;  %v2080_v3 = vclamps-f32 %v1167_v57, 1.0  ;;  %v1206_v52 = vsel %vm3517_vm0, %v1205_v51, %v1201_v32  ;;  %vm3545_vm5 = vcmp.eq.f32.partialorder %v1282_v22, 8.507059e+37 }
 0x1d4   :  { %v1274_v34 = vmul.f32 %v2242_v49, %v3511_v38  ;;  %v1285_v5 = vor.u32 1.1754944e-38, %v1284_v33  ;;  %v1207_v58 = vmul.f32 %v1206_v52, %v3179_v55  ;;  %v1242_v18 = vand.u32 2147483647, %v3529_v27 }
 0x1d5   :  { %v1244_v46 = vand.u32 2147483648, %v3529_v27  ;;  %2245 = vrcp.f32 %v3540_v19  ;;  %v1669_v50 = vadd.f32 1.0, %v2080_v3  ;;  %v1699_v14 = vmul.f32 %v1667_v62, %v3880_v42 }
 0x1d6   :  { %v1275_v1 = vsub.f32 1.0, %v1274_v34  ;;  %vm1279_vm6 = vweird.f32 %v2242_v49  ;;  %v2081_v16 = vclamps-f32 %v1207_v58, 1.0  ;;  %vm1238_vm7 = vweird.f32 %v3529_v27 }
 0x1d7   :  { %v1324_v51 = vand.u32 2147483648, %v3540_v19  ;;  %v1347_v28 = vmul.f32 %v1346_v30, %v3129_v2  ;;  %v1425_v55 = vmul.f32 %v1424_v36, %v3252_v21  ;;  %v1701_v63 = vmul.f32 %v1669_v50, %v3881_v13  ;;  %vm1280_vm11 = vmor %vm1278_vm4, %vm1279_vm6 }
 0x1d8   :  { %v2244_v10 = vpop.eup %2243  ;;  %v1276_v31 = vmul.f32 %v2242_v49, %v1275_v1  ;;  %v1322_v29 = vand.u32 2147483647, %v3540_v19  ;;  %v1384_v22 = vadd.f32 0.001143296, %v1383_v15  ;;  %v1670_v33 = vadd.f32 1.0, %v2081_v16 }
 0x1d9   :  { %v1234_v6 = vmul.f32 %v2244_v10, %v3529_v27  ;;  %vm1239_vm8 = vweird.f32 %v2244_v10  ;;  %vm3561_vm9 = vcmp.eq.f32.partialorder %v1242_v18, 8.507059e+37  ;;  %v1245_v4 = vor.u32 1.1754944e-38, %v1244_v46 }
 0x1da   :  { %v1755_v57 = vpack.c.bf16 %v1701_v63, %v1699_v14  ;;  %v1277_v62 = vadd.f32 %v2242_v49, %v1276_v31  ;;  %vm1318_vm10 = vweird.f32 %v3540_v19  ;;  %v1348_v36 = vadd.f32 0.112945676, %v1347_v28  ;;  %vm1240_vm14 = vmor %vm1238_vm7, %vm1239_vm8 }
 0x1db   :  { %v1426_v32 = vadd.f32 0.014752088, %v1425_v55  ;;  %v2246_v30 = vpop.eup %2245  ;;  %v1235_v15 = vsub.f32 1.0, %v1234_v6  ;;  %v1325_v3 = vor.u32 1.1754944e-38, %v1324_v51  ;;  %v1385_v52 = vmul.f32 %v1384_v22, %v3170_v26 }
 0x1dc   :  { %v1463_v34 = vmul.f32 3.8918573e-05, %v3256_v35  ;;  %1939 = vmatmul.bf16.gmra.mxu3 %v1755_v57  ;;  %v1281_v58 = vsel %vm1280_vm11, %v2242_v49, %v1277_v62  ;;  %v1314_v18 = vmul.f32 %v2246_v30, %v3540_v19  ;;  %vm1319_vm12 = vweird.f32 %v2246_v30 }
 0x1dd   :  { %vm3572_vm13 = vcmp.eq.f32.partialorder %v1322_v29, 8.507059e+37  ;;  %v1349_v50 = vmul.f32 %v1348_v36, %v3129_v2  ;;  %v1286_v38 = vsel %vm3545_vm5, %v1285_v5, %v1281_v58  ;;  %v1236_v42 = vmul.f32 %v2244_v10, %v1235_v15  ;;  %vm1320_vm15 = vmor %vm1318_vm10, %vm1319_vm12 }
 0x1de   :  { %v1427_v14 = vmul.f32 %v1426_v32, %v3252_v21  ;;  %v1386_v1 = vadd.f32 0.014752088, %v1385_v52  ;;  %v1287_v16 = vmul.f32 %v1286_v38, %v3319_v39  ;;  %v1315_v51 = vsub.f32 1.0, %v1314_v18  ;;  %v3886_v39 = vld [vmem:[#allocation36_spill] sm:$0xff] }
 0x1df   :  { %v1350_v49 = vadd.f32 0.4994258, %v1349_v50  ;;  %v1464_v28 = vadd.f32 0.001143296, %v1463_v34  ;;  %v1237_v55 = vadd.f32 %v2244_v10, %v1236_v42  ;;  %v1503_v31 = vmul.f32 3.8918573e-05, %v3310_v41 }
 0x1e0   :  { %v1428_v13 = vadd.f32 0.112945676, %v1427_v14  ;;  %v1387_v63 = vmul.f32 %v1386_v1, %v3170_v26  ;;  %v2083_v29 = vclamps-f32 %v1287_v16, 1.0  ;;  %v1316_v48 = vmul.f32 %v2246_v30, %v1315_v51 }
 0x1e1   :  { %v1351_v5 = vmul.f32 %v1350_v49, %v3129_v2  ;;  %v1465_v22 = vmul.f32 %v1464_v28, %v3256_v35  ;;  %v1702_v6 = vmul.f32 %v1670_v33, %v3886_v39  ;;  %v1241_v57 = vsel %vm1240_vm14, %v2244_v10, %v1237_v55 }
 0x1e2   :  { %v1429_v62 = vmul.f32 %v1428_v13, %v3252_v21  ;;  %v1388_v36 = vadd.f32 0.112945676, %v1387_v63  ;;  %v1672_v32 = vadd.f32 1.0, %v2083_v29  ;;  %v1246_v15 = vsel %vm3561_vm9, %v1245_v4, %v1241_v57 }
 0x1e3   :  { %v1317_v52 = vadd.f32 %v2246_v30, %v1316_v48  ;;  %v3592_v34 = vadd.f32 1.0, %v1351_v5  ;;  %v1247_v27 = vmul.f32 %v1246_v15, %v3195_v24  ;;  %v1466_v10 = vadd.f32 0.014752088, %v1465_v22  ;;  %v3888_v48 = vld [vmem:[#allocation17_spill] sm:$0xff]  ;;  %v3889_v22 = vld [vmem:[#allocation20_spill] sm:$0xff] }
 0x1e4   :  { %v1430_v2 = vadd.f32 0.4994258, %v1429_v62  ;;  %v1389_v33 = vmul.f32 %v1388_v36, %v3170_v26  ;;  %v1704_v58 = vmul.f32 %v1672_v32, %v3200_v17  ;;  %v1504_v8 = vadd.f32 0.001143296, %v1503_v31 }
 0x1e5   :  { %v1321_v18 = vsel %vm1320_vm15, %v2246_v30, %v1317_v52  ;;  %2247 = vrcp.f32 %v3592_v34  ;;  %v1574_v4 = vmul.f32 %v3471_v25, %v3410_v20  ;;  %v1614_v24 = vmul.f32 %v3475_v45, %v3430_v47  ;;  %v3887_v30 = vld [vmem:[#allocation15_spill] sm:$0xff] }
 0x1e6   :  { %v2082_v50 = vclamps-f32 %v1247_v27, 1.0  ;;  %v1326_v19 = vsel %vm3572_vm13, %v1325_v3, %v1321_v18  ;;  %v1756_v38 = vpack.c.bf16 %v1704_v58, %v1702_v6  ;;  %v1431_v14 = vmul.f32 %v1430_v2, %v3252_v21 }
 0x1e7   :  { %v1327_v42 = vmul.f32 %v1326_v19, %v3342_v7  ;;  %v1390_v17 = vadd.f32 0.4994258, %v1389_v33  ;;  %v3611_v1 = vmul.f32 %v3416_v54, %v3887_v30  ;;  %v3614_v16 = vadd.f32 0.18741608, %v3421_v11 }
 0x1e8   :  { %v1671_v25 = vadd.f32 1.0, %v2082_v50  ;;  %v1467_v45 = vmul.f32 %v1466_v10, %v3256_v35  ;;  %1895 = vmatmul.bf16.gmra.mxu2 %v1756_v38  ;;  %v3617_v46 = vadd.f32 1.0, %v1431_v14  ;;  %v1505_v7 = vmul.f32 %v1504_v8, %v3310_v41 }
 0x1e9   :  { %v2084_v51 = vclamps-f32 %v1327_v42, 1.0  ;;  %v1391_v3 = vmul.f32 %v1390_v17, %v3170_v26  ;;  %v3623_v21 = vmul.f32 %v3423_v53, %v3326_v40  ;;  %v1575_v54 = vadd.f32 0.0036580483, %v1574_v4 }
 0x1ea   :  { %v1615_v49 = vadd.f32 0.0036580483, %v1614_v24  ;;  %v1468_v28 = vadd.f32 0.112945676, %v1467_v45  ;;  %v1362_v13 = vand.u32 2147483647, %v3592_v34  ;;  %2249 = vrcp.f32 %v3617_v46 }
 0x1eb   :  { %v2248_v11 = vpop.eup %2247  ;;  %v1673_v55 = vadd.f32 1.0, %v2084_v51  ;;  %v1364_v63 = vand.u32 2147483648, %v3592_v34  ;;  %v3629_v26 = vadd.f32 1.0, %v1391_v3  ;;  %v1583_v29 = vmul.f32 3.8918573e-05, %v3410_v20 }
 0x1ec   :  { %v1354_v31 = vmul.f32 %v2248_v11, %v3592_v34  ;;  %v1543_v53 = vmul.f32 3.8918573e-05, %v3326_v40  ;;  %v1703_v5 = vmul.f32 %v1671_v25, %v3888_v48  ;;  %v1469_v6 = vmul.f32 %v1468_v28, %v3256_v35 }
 0x1ed   :  { %v1705_v39 = vmul.f32 %v1673_v55, %v3889_v22  ;;  %v1506_v57 = vadd.f32 0.014752088, %v1505_v7  ;;  %v3637_v62 = vmul.f32 %v1575_v54, %v3410_v20  ;;  %v3640_v36 = vmul.f32 %v1615_v49, %v3430_v47 }
 0x1ee   :  { %v1355_v32 = vsub.f32 1.0, %v1354_v31  ;;  %2251 = vrcp.f32 %v3629_v26  ;;  %vm1358_vm0 = vweird.f32 %v3592_v34  ;;  %vm1359_vm1 = vweird.f32 %v2248_v11 }
 0x1ef   :  { %v1757_v15 = vpack.c.bf16 %v1705_v39, %v1703_v5  ;;  %v1470_v52 = vadd.f32 0.4994258, %v1469_v6  ;;  %v1507_v2 = vmul.f32 %v1506_v57, %v3310_v41  ;;  %v1584_v33 = vadd.f32 0.001143296, %v1583_v29  ;;  %vm1360_vm4 = vmor %vm1358_vm0, %vm1359_vm1 }
 0x1f0   :  { %v1356_v27 = vmul.f32 %v2248_v11, %v1355_v32  ;;  %v1544_v10 = vadd.f32 0.001143296, %v1543_v53  ;;  %v2250_v58 = vpop.eup %2249  ;;  %vm3645_vm2 = vcmp.eq.f32.partialorder %v1362_v13, 8.507059e+37  ;;  %v1365_v8 = vor.u32 1.1754944e-38, %v1364_v63 }
 0x1f1   :  { %1944 = vmatmul.bf16.gmra.mxu3 %v1757_v15  ;;  %v1442_v4 = vand.u32 2147483647, %v3617_v46  ;;  %v1471_v24 = vmul.f32 %v1470_v52, %v3256_v35  ;;  %v1434_v19 = vmul.f32 %v2250_v58, %v3617_v46  ;;  %vm1438_vm3 = vweird.f32 %v3617_v46 }
 0x1f2   :  { %v1357_v50 = vadd.f32 %v2248_v11, %v1356_v27  ;;  %v1508_v38 = vadd.f32 0.112945676, %v1507_v2  ;;  %v1444_v42 = vand.u32 2147483648, %v3617_v46  ;;  %v1585_v17 = vmul.f32 %v1584_v33, %v3410_v20 }
 0x1f3   :  { %v3657_v14 = vadd.f32 1.0, %v1471_v24  ;;  %v1623_v30 = vmul.f32 3.8918573e-05, %v3430_v47  ;;  %v1435_v45 = vsub.f32 1.0, %v1434_v19  ;;  %v1545_v3 = vmul.f32 %v1544_v10, %v3326_v40 }
 0x1f4   :  { %v2252_v25 = vpop.eup %2251  ;;  %v1361_v35 = vsel %vm1360_vm4, %v2248_v11, %v1357_v50  ;;  %v1509_v51 = vmul.f32 %v1508_v38, %v3310_v41  ;;  %vm3665_vm5 = vcmp.eq.f32.partialorder %v1442_v4, 8.507059e+37  ;;  %vm1439_vm6 = vweird.f32 %v2250_v58 }
 0x1f5   :  { %v1366_v7 = vsel %vm3645_vm2, %v1365_v8, %v1361_v35  ;;  %v1394_v54 = vmul.f32 %v2252_v25, %v3629_v26  ;;  %2253 = vrcp.f32 %v3657_v14  ;;  %v1436_v28 = vmul.f32 %v2250_v58, %v1435_v45  ;;  %vm1440_vm7 = vmor %vm1438_vm3, %vm1439_vm6 }
 0x1f6   :  { %v1367_v49 = vmul.f32 %v1366_v7, %v3350_v60  ;;  %v1402_v11 = vand.u32 2147483647, %v3629_v26  ;;  %v1445_v55 = vor.u32 1.1754944e-38, %v1444_v42  ;;  %v1510_v63 = vadd.f32 0.4994258, %v1509_v51  ;;  %v3894_v7 = vld [vmem:[#allocation26_spill] sm:$0xff] }
 0x1f7   :  { %v1395_v13 = vsub.f32 1.0, %v1394_v54  ;;  %v1586_v31 = vadd.f32 0.014752088, %v1585_v17  ;;  %v1437_v29 = vadd.f32 %v2250_v58, %v1436_v28  ;;  %v1404_v53 = vand.u32 2147483648, %v3629_v26 }
 0x1f8   :  { %v1546_v48 = vadd.f32 0.014752088, %v1545_v3  ;;  %v1624_v5 = vadd.f32 0.001143296, %v1623_v30  ;;  %vm1399_vm8 = vweird.f32 %v2252_v25  ;;  %v1511_v60 = vmul.f32 %v1510_v63, %v3310_v41 }
 0x1f9   :  { %v1396_v22 = vmul.f32 %v2252_v25, %v1395_v13  ;;  %v1587_v39 = vmul.f32 %v1586_v31, %v3410_v20  ;;  %v2085_v6 = vclamps-f32 %v1367_v49, 1.0  ;;  %v1441_v57 = vsel %vm1440_vm7, %v2250_v58, %v1437_v29 }
 0x1fa   :  { %vm1398_vm9 = vweird.f32 %v3629_v26  ;;  %v1547_v32 = vmul.f32 %v1546_v48, %v3326_v40  ;;  %v1446_v52 = vsel %vm3665_vm5, %v1445_v55, %v1441_v57  ;;  %v3682_v2 = vadd.f32 1.0, %v1511_v60 }
 0x1fb   :  { %v2254_v15 = vpop.eup %2253  ;;  %v1397_v27 = vadd.f32 %v2252_v25, %v1396_v22  ;;  %v1588_v46 = vadd.f32 0.112945676, %v1587_v39  ;;  %v1447_v33 = vmul.f32 %v1446_v52, %v3468_v56  ;;  %vm1400_vm10 = vmor %vm1398_vm9, %vm1399_vm8  ;;  %v1405_v10 = vor.u32 1.1754944e-38, %v1404_v53 }
 0x1fc   :  { %v1474_v18 = vmul.f32 %v2254_v15, %v3657_v14  ;;  %v1625_v58 = vmul.f32 %v1624_v5, %v3430_v47  ;;  %vm1403_vm11 = vcmp.eq.f32.partialorder %v1402_v11, 8.507059e+37  ;;  %v1482_v26 = vand.u32 2147483647, %v3657_v14 }
 0x1fd   :  { %v1401_v8 = vsel %vm1400_vm10, %v2252_v25, %v1397_v27  ;;  %2255 = vrcp.f32 %v3682_v2  ;;  %v2087_v4 = vclamps-f32 %v1447_v33, 1.0  ;;  %v1674_v24 = vadd.f32 1.0, %v2085_v6 }
 0x1fe   :  { %v1406_v50 = vsel %vm1403_vm11, %v1405_v10, %v1401_v8  ;;  %v1475_v19 = vsub.f32 1.0, %v1474_v18  ;;  %v1484_v56 = vand.u32 2147483648, %v3657_v14  ;;  %v1589_v42 = vmul.f32 %v1588_v46, %v3410_v20  ;;  %v3897_v8 = vld [vmem:[#allocation32_spill] sm:$0xff] }
 0x1ff   :  { %v1407_v38 = vmul.f32 %v1406_v50, %v3353_v61  ;;  %v1548_v17 = vadd.f32 0.112945676, %v1547_v32  ;;  %v1676_v30 = vadd.f32 1.0, %v2087_v4  ;;  %vm1479_vm12 = vweird.f32 %v2254_v15  ;;  %v1871_v50 = vpop.f32.mrf.mxu2 }
 0x200   :  { %v1476_v35 = vmul.f32 %v2254_v15, %v1475_v19  ;;  %v1626_v25 = vadd.f32 0.014752088, %v1625_v58  ;;  %v1577_v45 = vadd.f32 0.05243302, %v3637_v62  ;;  %vm1478_vm13 = vweird.f32 %v3657_v14  ;;  %v1920_v19 = vpop.f32.mrf.mxu3 }
 0x201   :  { %v1590_v51 = vadd.f32 0.4994258, %v1589_v42  ;;  %v1549_v3 = vmul.f32 %v1548_v17, %v3326_v40  ;;  %v1706_v34 = vmul.f32 %v1674_v24, %v3894_v7  ;;  %v1708_v61 = vmul.f32 %v1676_v30, %v3358_v23  ;;  %vm1480_vm14 = vmor %vm1478_vm13, %vm1479_vm12 }
 0x202   :  { %v1477_v54 = vadd.f32 %v2254_v15, %v1476_v35  ;;  %v1627_v49 = vmul.f32 %v1626_v25, %v3430_v47  ;;  %v2086_v11 = vclamps-f32 %v1407_v38, 1.0  ;;  %v1485_v55 = vor.u32 1.1754944e-38, %v1484_v56 }
 0x203   :  { %v2256_v28 = vpop.eup %2255  ;;  %v1591_v13 = vmul.f32 %v1590_v51, %v3410_v20  ;;  %v1550_v63 = vadd.f32 0.4994258, %v1549_v3  ;;  %v1758_v62 = vpack.c.bf16 %v1708_v61, %v1706_v34  ;;  %vm1483_vm15 = vcmp.eq.f32.partialorder %v1482_v26, 8.507059e+37 }
 0x204   :  { %v1481_v31 = vsel %vm1480_vm14, %v2254_v15, %v1477_v54  ;;  %v1514_v14 = vmul.f32 %v2256_v28, %v3682_v2  ;;  %v1578_v29 = vmul.f32 %v1577_v45, %v3410_v20  ;;  %v1500_v5 = vmul.f32 %v3614_v16, %v3310_v41 }
 0x205   :  { %v1486_v53 = vsel %vm1483_vm15, %v1485_v55, %v1481_v31  ;;  %v3701_v48 = vadd.f32 1.0, %v1591_v13  ;;  %v1551_v23 = vmul.f32 %v1550_v63, %v3326_v40  ;;  %1900 = vmatmul.bf16.gmra.mxu2 %v1758_v62  ;;  %v1628_v39 = vadd.f32 0.112945676, %v1627_v49 }
 0x206   :  { %v1487_v22 = vmul.f32 %v1486_v53, %v3611_v1  ;;  %v1515_v60 = vsub.f32 1.0, %v1514_v14  ;;  %v1617_v6 = vadd.f32 0.05243302, %v3640_v36  ;;  %v1675_v57 = vadd.f32 1.0, %v2086_v11 }
 0x207   :  { %vm1519_vm0 = vweird.f32 %v2256_v28  ;;  %2257 = vrcp.f32 %v3701_v48  ;;  %v3709_v52 = vadd.f32 1.0, %v1551_v23  ;;  %v1629_v27 = vmul.f32 %v1628_v39, %v3430_v47 }
 0x208   :  { %v2088_v32 = vclamps-f32 %v1487_v22, 1.0  ;;  %v1516_v15 = vmul.f32 %v2256_v28, %v1515_v60  ;;  %v1539_v46 = vadd.f32 0.18741608, %v3623_v21  ;;  %v1579_v41 = vadd.f32 0.18741608, %v1578_v29  ;;  %v1873_v29 = vpop.f32.mrf.mxu2  ;;  %v1922_v53 = vpop.f32.mrf.mxu3 }
 0x209   :  { %vm1518_vm1 = vweird.f32 %v3682_v2  ;;  %v1524_v1 = vand.u32 2147483648, %v3682_v2  ;;  %v1522_v36 = vand.u32 2147483647, %v3682_v2  ;;  %2259 = vrcp.f32 %v3709_v52  ;;  %v3730_v2 = vld [vmem:[%s3785_s4] ss:$0 sm:$0xff]  ;;  %s2399_s4 = smov [#allocation10]  }
 0x20a   :  { %v1677_v16 = vadd.f32 1.0, %v2088_v32  ;;  %v1517_v33 = vadd.f32 %v2256_v28, %v1516_v15  ;;  %v1618_v10 = vmul.f32 %v1617_v6, %v3430_v47  ;;  %vm3719_vm2 = vmor %vm1518_vm1, %vm1519_vm0  ;;  %v1630_v58 = vadd.f32 0.4994258, %v1629_v27  ;;  %s1980_s15 = sshll.u32 %s2399_s4, 4  ;;  %s1981_s15 = int_to_ptr.vmem [resolvable:$true] %s1980_s15 }
 0x20b   :  { %v1501_v21 = vadd.f32 1.1283791, %v1500_v5  ;;  %v1707_v26 = vmul.f32 %v1675_v57, %v3897_v8  ;;  %v1580_v56 = vmul.f32 %v1579_v41, %v3410_v20  ;;  %v1525_v42 = vor.u32 1.1754944e-38, %v1524_v1  ;;  %v3898_v41 = vld [vmem:[#allocation19_spill] sm:$0xff] }
 0x20c   :  { %v1709_v4 = vmul.f32 %v1677_v16, %v3361_v44  ;;  %v1521_v24 = vsel %vm3719_vm2, %v2256_v28, %v1517_v33  ;;  %v1631_v17 = vmul.f32 %v1630_v58, %v3430_v47  ;;  %v1540_v30 = vmul.f32 %v1539_v46, %v3326_v40 }
 0x20d   :  { %v2258_v38 = vpop.eup %2257  ;;  %vm1523_vm3 = vcmp.eq.f32.partialorder %v1522_v36, 8.507059e+37  ;;  %v1619_v25 = vadd.f32 0.18741608, %v1618_v10  ;;  %v1872_v3 = vadd.f32 %v3730_v2, %v1871_v50  ;;  %v1502_v34 = vmul.f32 %v1501_v21, %v3278_v12 }
 0x20e   :  { %v1759_v35 = vpack.c.bf16 %v1709_v4, %v1707_v26  ;;  %v1594_v44 = vmul.f32 %v2258_v38, %v3701_v48  ;;  %v1526_v45 = vsel %vm1523_vm3, %v1525_v42, %v1521_v24  ;;  %v3736_v51 = vadd.f32 1.0, %v1631_v17 }
 0x20f   :  { %v2260_v7 = vpop.eup %2259  ;;  %v1604_v61 = vand.u32 2147483648, %v3701_v48  ;;  %v1581_v54 = vadd.f32 1.1283791, %v1580_v56  ;;  %v1527_v49 = vmul.f32 %v1526_v45, %v1502_v34  ;;  %vm1599_vm4 = vweird.f32 %v2258_v38 }
 0x210   :  { %1949 = vmatmul.bf16.gmra.mxu3 %v1759_v35  ;;  %v1595_v20 = vsub.f32 1.0, %v1594_v44  ;;  %v1554_v40 = vmul.f32 %v2260_v7, %v3709_v52  ;;  %2261 = vrcp.f32 %v3736_v51  ;;  %v1602_v11 = vand.u32 2147483647, %v3701_v48  ;;  %v1876_v50 = vpop.f32.mrf.mxu2 }
 0x211   :  { %v1541_v55 = vadd.f32 1.1283791, %v1540_v30  ;;  %v1620_v13 = vmul.f32 %v1619_v25, %v3430_v47  ;;  %v1921_v62 = vadd.f32 %v1920_v19, %v1872_v3  ;;  %vm1598_vm5 = vweird.f32 %v3701_v48 }
 0x212   :  { %v1596_v28 = vmul.f32 %v2258_v38, %v1595_v20  ;;  %v1555_v63 = vsub.f32 1.0, %v1554_v40  ;;  %v1605_v31 = vor.u32 1.1754944e-38, %v1604_v61  ;;  %v1564_v14 = vand.u32 2147483648, %v3709_v52  ;;  %vm1600_vm6 = vmor %vm1598_vm5, %vm1599_vm4 }
 0x213   :  { %vm1559_vm7 = vweird.f32 %v2260_v7  ;;  %v1562_v5 = vand.u32 2147483647, %v3709_v52  ;;  %1960 = vst [vmem:[#allocation10] sm:$0xff] %v1921_v62  ;;  %v1874_v22 = vadd.f32 %v3730_v2, %v1873_v29  ;;  %v1582_v47 = vmul.f32 %v1581_v54, %v3386_v37 }
 0x214   :  { %v1597_v12 = vadd.f32 %v2258_v38, %v1596_v28  ;;  %v1556_v23 = vmul.f32 %v2260_v7, %v1555_v63  ;;  %v2089_v60 = vclamps-f32 %v1527_v49, 1.0  ;;  %vm1603_vm8 = vcmp.eq.f32.partialorder %v1602_v11, 8.507059e+37 }
 0x215   :  { %vm1558_vm9 = vweird.f32 %v3709_v52  ;;  %v1923_v32 = vadd.f32 %v1922_v53, %v1874_v22  ;;  %v1565_v27 = vor.u32 1.1754944e-38, %v1564_v14  ;;  %v334_v1 = vmul.f32 0.5, %v3898_v41 }
 0x216   :  { %v1601_v39 = vsel %vm1600_vm6, %v2258_v38, %v1597_v12  ;;  %v2262_v6 = vpop.eup %2261  ;;  %v1557_v57 = vadd.f32 %v2260_v7, %v1556_v23  ;;  %vm1560_vm10 = vmor %vm1558_vm9, %vm1559_vm7  ;;  %v1542_v16 = vmul.f32 %v1541_v55, %v3296_v59  ;;  %vm1563_vm11 = vcmp.eq.f32.partialorder %v1562_v5, 8.507059e+37  ;;  %v1925_v59 = vpop.f32.mrf.mxu3 }
 0x217   :  { %v1606_v48 = vsel %vm1603_vm8, %v1605_v31, %v1601_v39  ;;  %v1634_v46 = vmul.f32 %v2262_v6, %v3736_v51  ;;  %1961 = vst [vmem:[#allocation10 + $0x8] sm:$0xff] %v1923_v32  ;;  %v1678_v36 = vadd.f32 1.0, %v2089_v60  ;;  %v336_v58 = vmul.f32 0.5, %v3374_v43 }
 0x218   :  { %v1607_v15 = vmul.f32 %v1606_v48, %v1582_v47  ;;  %v1561_v33 = vsel %vm1560_vm10, %v2260_v7, %v1557_v57  ;;  %v1621_v52 = vadd.f32 1.1283791, %v1620_v13  ;;  %v1642_v21 = vand.u32 2147483647, %v3736_v51  ;;  %v1878_v20 = vpop.f32.mrf.mxu2 }
 0x219   :  { %v1566_v10 = vsel %vm1563_vm11, %v1565_v27, %v1561_v33  ;;  %v1635_v18 = vsub.f32 1.0, %v1634_v46  ;;  %v1644_v8 = vand.u32 2147483648, %v3736_v51  ;;  %vm1639_vm12 = vweird.f32 %v2262_v6 }
 0x21a   :  { %v2091_v37 = vclamps-f32 %v1607_v15, 1.0  ;;  %v1567_v4 = vmul.f32 %v1566_v10, %v1542_v16  ;;  %v1877_v19 = vadd.f32 %v3730_v2, %v1876_v50  ;;  %v1710_v38 = vmul.f32 %v1678_v36, %v334_v1 }
 0x21b   :  { %v1636_v24 = vmul.f32 %v2262_v6, %v1635_v18  ;;  %vm1638_vm13 = vweird.f32 %v3736_v51  ;;  %v1622_v43 = vmul.f32 %v1621_v52, %v3395_v0  ;;  %v1645_v17 = vor.u32 1.1754944e-38, %v1644_v8  ;;  %v3899_v51 = vld [vmem:[#allocation21_spill] sm:$0xff] }
 0x21c   :  { %v1680_v26 = vadd.f32 1.0, %v2091_v37  ;;  %vm1640_vm14 = vmor %vm1638_vm13, %vm1639_vm12  ;;  %v1926_v30 = vadd.f32 %v1925_v59, %v1877_v19  ;;  %v2090_v44 = vclamps-f32 %v1567_v4, 1.0  ;;  %vm1643_vm15 = vcmp.eq.f32.partialorder %v1642_v21, 8.507059e+37 }
 0x21d   :  { %v1637_v42 = vadd.f32 %v2262_v6, %v1636_v24  ;;  %v1879_v54 = vadd.f32 %v3730_v2, %v1878_v20  ;;  %v335_v40 = vmul.f32 0.5, %v3899_v51  ;;  %v337_v0 = vmul.f32 0.5, %v3381_v9 }
 0x21e   :  { %v1712_v56 = vmul.f32 %v1680_v26, %v336_v58  ;;  %1962 = vst [vmem:[#allocation10 + $0x10] sm:$0xff] %v1926_v30  ;;  %v1679_v34 = vadd.f32 1.0, %v2090_v44  ;;  %v1927_v61 = vpop.f32.mrf.mxu3 }
 0x21f   :  { %v1641_v25 = vsel %vm1640_vm14, %v2262_v6, %v1637_v42  ;;  %v1928_v28 = vadd.f32 %v1927_v61, %v1879_v54 }
 0x220   :  { %v1760_v35 = vpack.c.bf16 %v1712_v56, %v1710_v38  ;;  %v1646_v45 = vsel %vm1643_vm15, %v1645_v17, %v1641_v25  ;;  %v1711_v11 = vmul.f32 %v1679_v34, %v335_v40  ;;  %v1881_v63 = vpop.f32.mrf.mxu2 }
 0x221   :  { %v1647_v3 = vmul.f32 %v1646_v45, %v1622_v43  ;;  %1963 = vst [vmem:[#allocation10 + $0x18] sm:$0xff] %v1928_v28  ;;  %v1882_v12 = vadd.f32 %v3730_v2, %v1881_v63 }
 0x222   :  { %1905 = vmatmul.bf16.gmra.mxu2 %v1760_v35 }
 0x223   :  { %v2092_v7 = vclamps-f32 %v1647_v3, 1.0 }
 0x225   :  { %v1681_v49 = vadd.f32 1.0, %v2092_v7 }
 0x226   :  { %v1930_v62 = vpop.f32.mrf.mxu3 }
 0x227   :  { %v1713_v55 = vmul.f32 %v1681_v49, %v337_v0  ;;  %v1931_v31 = vadd.f32 %v1930_v62, %v1882_v12 }
 0x228   :  { %v1883_v14 = vpop.f32.mrf.mxu2 }
 0x229   :  { %v1761_v13 = vpack.c.bf16 %v1713_v55, %v1711_v11  ;;  %1964 = vst [vmem:[#allocation10 + $0x20] sm:$0xff] %v1931_v31  ;;  %v1884_v53 = vadd.f32 %v3730_v2, %v1883_v14 }
 0x22b   :  { %1954 = vmatmul.bf16.gmra.mxu3 %v1761_v13 }
 0x22e   :  { %v1932_v29 = vpop.f32.mrf.mxu3 }
 0x22f   :  { %v1933_v23 = vadd.f32 %v1932_v29, %v1884_v53 }
 0x230   :  { %v1886_v9 = vpop.f32.mrf.mxu2 }
 0x231   :  { %1965 = vst [vmem:[#allocation10 + $0x28] sm:$0xff] %v1933_v23  ;;  %v1887_v22 = vadd.f32 %v3730_v2, %v1886_v9 }
 0x238   :  { %v1888_v60 = vpop.f32.mrf.mxu2 }
 0x239   :  { %v1935_v5 = vpop.f32.mrf.mxu3  ;;  %v1889_v39 = vadd.f32 %v3730_v2, %v1888_v60 }
 0x23a   :  { %v1936_v47 = vadd.f32 %v1935_v5, %v1887_v22 }
 0x23c   :  { %1966 = vst [vmem:[#allocation10 + $0x30] sm:$0xff] %v1936_v47 }
 0x241   :  { %v1937_v6 = vpop.f32.mrf.mxu3 }
 0x242   :  { %v1938_v48 = vadd.f32 %v1937_v6, %v1889_v39 }
 0x244   :  { %1967 = vst [vmem:[#allocation10 + $0x38] sm:$0xff] %v1938_v48 }
 0x24b   :  { %v1891_v57 = vpop.f32.mrf.mxu2 }
 0x24c   :  { %v1892_v32 = vadd.f32 %v3730_v2, %v1891_v57 }
 0x253   :  { %v1893_v46 = vpop.f32.mrf.mxu2 }
 0x254   :  { %v1894_v41 = vadd.f32 %v3730_v2, %v1893_v46 }
 0x25f   :  { %v1940_v15 = vpop.f32.mrf.mxu3 }
 0x260   :  { %v1941_v27 = vadd.f32 %v1940_v15, %v1892_v32 }
 0x262   :  { %1968 = vst [vmem:[#allocation10 + $0x40] sm:$0xff] %v1941_v27 }
 0x267   :  { %v1942_v1 = vpop.f32.mrf.mxu3 }
 0x268   :  { %v1943_v16 = vadd.f32 %v1942_v1, %v1894_v41 }
 0x26a   :  { %1969 = vst [vmem:[#allocation10 + $0x48] sm:$0xff] %v1943_v16 }
 0x26b   :  { %v1896_v33 = vpop.f32.mrf.mxu2 }
 0x26c   :  { %v1897_v37 = vadd.f32 %v3730_v2, %v1896_v33 }
 0x273   :  { %v1898_v18 = vpop.f32.mrf.mxu2 }
 0x274   :  { %v1945_v36 = vpop.f32.mrf.mxu3  ;;  %v1899_v58 = vadd.f32 %v3730_v2, %v1898_v18 }
 0x275   :  { %v1946_v10 = vadd.f32 %v1945_v36, %v1897_v37 }
 0x277   :  { %1970 = vst [vmem:[#allocation10 + $0x50] sm:$0xff] %v1946_v10 }
 0x27c   :  { %v1947_v52 = vpop.f32.mrf.mxu3 }
 0x27d   :  { %v1948_v21 = vadd.f32 %v1947_v52, %v1899_v58 }
 0x27f   :  { %1971 = vst [vmem:[#allocation10 + $0x58] sm:$0xff] %v1948_v21 }
 0x288   :  { %v1901_v8 = vpop.f32.mrf.mxu2 }
 0x289   :  { %v1902_v26 = vadd.f32 %v3730_v2, %v1901_v8 }
 0x290   :  { %v1903_v50 = vpop.f32.mrf.mxu2 }
 0x291   :  { %v1904_v59 = vadd.f32 %v3730_v2, %v1903_v50 }
 0x293   :  { %v1950_v4 = vpop.f32.mrf.mxu3 }
 0x294   :  { %v1951_v24 = vadd.f32 %v1950_v4, %v1902_v26 }
 0x296   :  { %1972 = vst [vmem:[#allocation10 + $0x60] sm:$0xff] %v1951_v24 }
 0x29b   :  { %v1952_v19 = vpop.f32.mrf.mxu3 }
 0x29c   :  { %v1953_v38 = vadd.f32 %v1952_v19, %v1904_v59 }
 0x29e   :  { %1973 = vst [vmem:[#allocation10 + $0x68] sm:$0xff] %v1953_v38 }
 0x2a5   :  { %v1906_v56 = vpop.f32.mrf.mxu2 }
 0x2a6   :  { %v1907_v42 = vadd.f32 %v3730_v2, %v1906_v56 }
 0x2ad   :  { %v1908_v30 = vpop.f32.mrf.mxu2 }
 0x2ae   :  { %v1955_v43 = vpop.f32.mrf.mxu3  ;;  %v1909_v35 = vadd.f32 %v3730_v2, %v1908_v30 }
 0x2af   :  { %v1956_v17 = vadd.f32 %v1955_v43, %v1907_v42 }
 0x2b1   :  { %1974 = vst [vmem:[#allocation10 + $0x70] sm:$0xff] %v1956_v17 }
 0x2b6   :  { %v1957_v44 = vpop.f32.mrf.mxu3 }
 0x2b7   :  { %v1958_v25 = vadd.f32 %v1957_v44, %v1909_v35 }
 0x2b9   :  { %1975 = vst [vmem:[#allocation10 + $0x78] sm:$0xff] %v1958_v25 }
 0x2ba   :  { %1988 = dma.vmem_to_hbm [thread:$0]  %s1981_s15, 2048, %s1983_s18, [#allocation4], %s2392_s26, %s2392_s26, %s2393_s27  }
 0x2bb   :  { %2389 = dma.done.wait [#allocation4], 2048  }
 0x2bc   :  { %2390 = vsyncadd [#allocation4], 4294965248 }
 0x2bd   :  { %1993 = vsyncpa [#allocation3], 1 }
 0x2be   :  { %1994 = vsyncpa [#allocation6], 1 }
 0x2bf   :  { %1995 = vsyncpa [#allocation9], 1 }
 0x2c0   :  { %1996 = vsyncpa [#allocation4], 1 }

// kernel: tpu_custom_call.1
= control target key start
LH: loop header
LB: loop body
LE: loop exit
PB: predicated region body
PF: predicated region fallthrough
CT: control target
= control target key end

     0   :  { %10 = vsyncpa [#allocation3], 0  ;;  %s3781_s0 = inlined_call_operand.hbm [shape: f32[128,128], index: 0, kind: input, shape index: {}]   ;;  %s3782_s1 = inlined_call_operand.hbm [shape: bf16[128,256], index: 1, kind: input, shape index: {}]   ;;  %s3783_s2 = inlined_call_operand.hbm [shape: f32[1,256], index: 2, kind: input, shape index: {}]   ;;  %s3784_s3 = inlined_call_operand.hbm [shape: bf16[256,128], index: 3, kind: input, shape index: {}]   ;;  %s3785_s4 = inlined_call_operand.vmem [shape: f32[1,128], index: 4, kind: input, shape index: {}]   ;;  %s3786_s5 = inlined_call_operand.hbm [shape: f32[128,128], index: 5, kind: output, shape index: {}]  }
   0x1   :  { %11 = vsyncpa [#allocation6], 0 }
   0x2   :  { %12 = vsyncpa [#allocation9], 0 }
   0x3   :  { %13 = vsyncpa [#allocation4], 0  ;;  %s31_s20 = sshll.u32 %s3782_s1, 4  ;;  %s2391_s21 = smov [#allocation5]   ;;  %s32_s20 = int_to_ptr.hbm [resolvable:$true] %s31_s20 }
   0x4   :  { %s33_s22 = sshll.u32 %s2391_s21, 4  ;;  %s18_s25 = sshll.u32 %s3781_s0, 4  ;;  %s34_s22 = int_to_ptr.vmem [resolvable:$true] %s33_s22  ;;  %s19_s25 = int_to_ptr.hbm [resolvable:$true] %s18_s25 }
   0x5   :  { %s2392_s26 = smov 128   ;;  %s2393_s27 = smov 8  }
   0x6   :  { %39 = dma.hbm_to_vmem [thread:$0]  %s32_s20, 2048, %s34_s22, [#allocation6], %s2392_s26, %s2392_s26, %s2393_s27  }
   0x7   :  { %s2394_s28 = smov [#allocation2]   ;;  %s45_s1 = sshll.u32 %s3783_s2, 4  ;;  %s46_s1 = int_to_ptr.hbm [resolvable:$true] %s45_s1 }
   0x8   :  { %s20_s29 = sshll.u32 %s2394_s28, 4  ;;  %s55_s8 = sshll.u32 %s3784_s3, 4  ;;  %s21_s29 = int_to_ptr.vmem [resolvable:$true] %s20_s29  ;;  %s56_s8 = int_to_ptr.hbm [resolvable:$true] %s55_s8 }
   0x9   :  { %26 = dma.hbm_to_vmem [thread:$0]  %s19_s25, 2048, %s21_s29, [#allocation3], %s2392_s26, %s2392_s26, %s2393_s27  }
   0xa   :  { %s2395_s9 = smov [#allocation7]   ;;  %s2396_s11 = smov [#allocation8]  }
   0xb   :  { %s47_s10 = sshll.u32 %s2395_s9, 4  ;;  %s57_s12 = sshll.u32 %s2396_s11, 4  ;;  %s48_s10 = int_to_ptr.vmem [resolvable:$true] %s47_s10  ;;  %s58_s12 = int_to_ptr.vmem [resolvable:$true] %s57_s12 }
   0xc   :  { %50 = dma.hbm_to_vmem [thread:$0]  %s46_s1, 32, %s48_s10, [#allocation6]  }
   0xd   :  { %s2397_s13 = smov 64   ;;  %s2398_s2 = smov 4  }
   0xe   :  { %63 = dma.hbm_to_vmem [thread:$0]  %s56_s8, 2048, %s58_s12, [#allocation9], %s2397_s13, %s2397_s13, %s2398_s2  }
   0xf   :  { %2383 = dma.done.wait [#allocation3], 2048  }
  0x10   :  { %2384 = vsyncadd [#allocation3], 4294965248 }
  0x11   :  { %2385 = dma.done.wait [#allocation6], 2080  }
  0x12   :  { %2386 = vsyncadd [#allocation6], 4294965216 }
  0x13   :  { %2387 = dma.done.wait [#allocation9], 2048  }
  0x14   :  { %2388 = vsyncadd [#allocation9], 4294965248  ;;  %v2055_v0 = vld [vmem:[#allocation5 + $0x70] sm:$0xf]  ;;  %v2172_v1 = vld [vmem:[#allocation5 + $0x74] sm:$0xf0] }
  0x15   :  { %v2171_v2 = vld [vmem:[#allocation5 + $0x74] sm:$0xf]  ;;  %v2056_v3 = vor.u32 %v2172_v1, %v2055_v0  ;;  %v2057_v4 = vld [vmem:[#allocation5 + $0x78] sm:$0xf0]  ;;  %v2047_v5 = vld [vmem:[#allocation5 + $0x60] sm:$0xf] }
  0x16   :  { %v2170_v6 = vld [vmem:[#allocation5 + $0x64] sm:$0xf0]  ;;  %v2060_v7 = vor.u32 %v2171_v2, %v2057_v4  ;;  %v2169_v8 = vld [vmem:[#allocation5 + $0x64] sm:$0xf]  ;;  %v2049_v9 = vld [vmem:[#allocation5 + $0x68] sm:$0xf0] }
  0x17   :  { %208 = vmatpush.bf16.msra.mxu0 %v2056_v3  ;;  %v2048_v10 = vor.u32 %v2170_v6, %v2047_v5  ;;  %v2052_v11 = vor.u32 %v2169_v8, %v2049_v9  ;;  %v2039_v12 = vld [vmem:[#allocation5 + $0x50] sm:$0xf]  ;;  %v2168_v13 = vld [vmem:[#allocation5 + $0x54] sm:$0xf0]  ;;  %v2167_v14 = vld [vmem:[#allocation5 + $0x54] sm:$0xf] }
  0x18   :  { %257 = vmatpush.bf16.msra.mxu1 %v2060_v7  ;;  %v2041_v15 = vld [vmem:[#allocation5 + $0x58] sm:$0xf0]  ;;  %v2040_v16 = vor.u32 %v2168_v13, %v2039_v12  ;;  %v2031_v18 = vld [vmem:[#allocation5 + $0x40] sm:$0xf]  ;;  %v2166_v19 = vld [vmem:[#allocation5 + $0x44] sm:$0xf0] }
  0x19   :  { %v2044_v17 = vor.u32 %v2167_v14, %v2041_v15  ;;  %v2165_v20 = vld [vmem:[#allocation5 + $0x44] sm:$0xf]  ;;  %v2033_v21 = vld [vmem:[#allocation5 + $0x48] sm:$0xf0]  ;;  %v2032_v22 = vor.u32 %v2166_v19, %v2031_v18  ;;  %v2023_v24 = vld [vmem:[#allocation5 + $0x30] sm:$0xf] }
  0x1a   :  { %v2036_v23 = vor.u32 %v2165_v20, %v2033_v21  ;;  %v2164_v25 = vld [vmem:[#allocation5 + $0x34] sm:$0xf0]  ;;  %v2163_v26 = vld [vmem:[#allocation5 + $0x34] sm:$0xf]  ;;  %v2025_v27 = vld [vmem:[#allocation5 + $0x38] sm:$0xf0] }
  0x1b   :  { %209 = vmatpush.bf16.msra.mxu0 %v2048_v10  ;;  %v2024_v28 = vor.u32 %v2164_v25, %v2023_v24  ;;  %v2028_v29 = vor.u32 %v2163_v26, %v2025_v27  ;;  %v2015_v30 = vld [vmem:[#allocation5 + $0x20] sm:$0xf]  ;;  %v2162_v31 = vld [vmem:[#allocation5 + $0x24] sm:$0xf0]  ;;  %v2161_v32 = vld [vmem:[#allocation5 + $0x24] sm:$0xf] }
  0x1c   :  { %258 = vmatpush.bf16.msra.mxu1 %v2052_v11  ;;  %v2017_v33 = vld [vmem:[#allocation5 + $0x28] sm:$0xf0]  ;;  %v2016_v34 = vor.u32 %v2162_v31, %v2015_v30  ;;  %v2007_v36 = vld [vmem:[#allocation5 + $0x10] sm:$0xf]  ;;  %v2160_v37 = vld [vmem:[#allocation5 + $0x14] sm:$0xf0] }
  0x1d   :  { %v2020_v35 = vor.u32 %v2161_v32, %v2017_v33  ;;  %v2159_v38 = vld [vmem:[#allocation5 + $0x14] sm:$0xf]  ;;  %v2009_v39 = vld [vmem:[#allocation5 + $0x18] sm:$0xf0]  ;;  %v2008_v40 = vor.u32 %v2160_v37, %v2007_v36  ;;  %v1999_v42 = vld [vmem:[#allocation5] sm:$0xf] }
  0x1e   :  { %v2012_v41 = vor.u32 %v2159_v38, %v2009_v39  ;;  %v2158_v43 = vld [vmem:[#allocation5 + $0x4] sm:$0xf0]  ;;  %v2157_v44 = vld [vmem:[#allocation5 + $0x4] sm:$0xf]  ;;  %v2001_v45 = vld [vmem:[#allocation5 + $0x8] sm:$0xf0] }
  0x1f   :  { %210 = vmatpush.bf16.msra.mxu0 %v2040_v16  ;;  %v2000_v46 = vor.u32 %v2158_v43, %v1999_v42  ;;  %v82_v47 = vld [vmem:[#allocation2] sm:$0xff]  ;;  %v83_v48 = vld [vmem:[#allocation2 + $0x8] sm:$0xff]  ;;  %v2004_v49 = vor.u32 %v2157_v44, %v2001_v45  ;;  %v84_v51 = vld [vmem:[#allocation2 + $0x10] sm:$0xff]  ;;  %s1982_s18 = sshll.u32 %s3786_s5, 4  ;;  %s1983_s18 = int_to_ptr.hbm [resolvable:$true] %s1982_s18 }
  0x20   :  { %259 = vmatpush.bf16.msra.mxu1 %v2044_v17  ;;  %v98_v50 = vpack.c.bf16 %v83_v48, %v82_v47  ;;  %v85_v52 = vld [vmem:[#allocation2 + $0x18] sm:$0xff]  ;;  %v86_v54 = vld [vmem:[#allocation2 + $0x20] sm:$0xff]  ;;  %v87_v55 = vld [vmem:[#allocation2 + $0x28] sm:$0xff] }
  0x21   :  { %v99_v53 = vpack.c.bf16 %v85_v52, %v84_v51  ;;  %v100_v56 = vpack.c.bf16 %v87_v55, %v86_v54  ;;  %v88_v57 = vld [vmem:[#allocation2 + $0x30] sm:$0xff]  ;;  %v89_v58 = vld [vmem:[#allocation2 + $0x38] sm:$0xff]  ;;  %v90_v60 = vld [vmem:[#allocation2 + $0x40] sm:$0xff] }
  0x22   :  { %v101_v59 = vpack.c.bf16 %v89_v58, %v88_v57  ;;  %v91_v61 = vld [vmem:[#allocation2 + $0x48] sm:$0xff]  ;;  %v92_v63 = vld [vmem:[#allocation2 + $0x50] sm:$0xff]  ;;  %v93_v0 = vld [vmem:[#allocation2 + $0x58] sm:$0xff] }
  0x23   :  { %211 = vmatpush.bf16.msra.mxu0 %v2032_v22  ;;  %v102_v62 = vpack.c.bf16 %v91_v61, %v90_v60  ;;  %v103_v1 = vpack.c.bf16 %v93_v0, %v92_v63  ;;  %v94_v2 = vld [vmem:[#allocation2 + $0x60] sm:$0xff]  ;;  %v95_v3 = vld [vmem:[#allocation2 + $0x68] sm:$0xff]  ;;  %v96_v5 = vld [vmem:[#allocation2 + $0x70] sm:$0xff] }
  0x24   :  { %260 = vmatpush.bf16.msra.mxu1 %v2036_v23  ;;  %v104_v4 = vpack.c.bf16 %v95_v3, %v94_v2  ;;  %v97_v6 = vld [vmem:[#allocation2 + $0x78] sm:$0xff]  ;;  %v122_v8 = vld [vmem:[#allocation7] sm:$0x3]  ;;  %v2178_v26 = vld [vmem:[#allocation8 + $0x28] sm:$0xff] }
  0x25   :  { %v105_v7 = vpack.c.bf16 %v97_v6, %v96_v5  ;;  %v2448_v9 = vperm.slane %v122_v8, 0  ;;  %v2450_v11 = vperm.slane %v122_v8, 1  ;;  %v2180_v13 = vld [vmem:[#allocation8 + $0x38] sm:$0xff]  ;;  %v2179_v17 = vld [vmem:[#allocation8 + $0x30] sm:$0xff]  ;;  %v2177_v33 = vld [vmem:[#allocation8 + $0x20] sm:$0xff] }
  0x26   :  { %v2188_v14 = vld [vmem:[#allocation8 + $0x78] sm:$0xff]  ;;  %1862 = vmatpush.bf16.msra.mxu2 %v2180_v13  ;;  %v2187_v18 = vld [vmem:[#allocation8 + $0x70] sm:$0xff]  ;;  %v2182_v2 = vld [vmem:[#allocation8 + $0x48] sm:$0xff] }
  0x27   :  { %212 = vmatpush.bf16.msra.mxu0 %v2024_v28  ;;  %1911 = vmatpush.bf16.msra.mxu3 %v2188_v14  ;;  %v2176_v44 = vld [vmem:[#allocation8 + $0x18] sm:$0xff]  ;;  %v2175_v52 = vld [vmem:[#allocation8 + $0x10] sm:$0xff] }
  0x28   :  { %261 = vmatpush.bf16.msra.mxu1 %v2028_v29  ;;  %v2186_v29 = vld [vmem:[#allocation8 + $0x68] sm:$0xff]  ;;  %v2184_v45 = vld [vmem:[#allocation8 + $0x58] sm:$0xff] }
  0x2a   :  { %1863 = vmatpush.bf16.msra.mxu2 %v2179_v17 }
  0x2b   :  { %213 = vmatpush.bf16.msra.mxu0 %v2016_v34  ;;  %1912 = vmatpush.bf16.msra.mxu3 %v2187_v18  ;;  %v2185_v34 = vld [vmem:[#allocation8 + $0x60] sm:$0xff] }
  0x2c   :  { %262 = vmatpush.bf16.msra.mxu1 %v2020_v35 }
  0x2e   :  { %1864 = vmatpush.bf16.msra.mxu2 %v2178_v26 }
  0x2f   :  { %214 = vmatpush.bf16.msra.mxu0 %v2008_v40  ;;  %1913 = vmatpush.bf16.msra.mxu3 %v2186_v29 }
  0x30   :  { %263 = vmatpush.bf16.msra.mxu1 %v2012_v41 }
  0x32   :  { %1865 = vmatpush.bf16.msra.mxu2 %v2177_v33 }
  0x33   :  { %215 = vmatpush.bf16.msra.mxu0 %v2000_v46  ;;  %1914 = vmatpush.bf16.msra.mxu3 %v2185_v34 }
  0x34   :  { %264 = vmatpush.bf16.msra.mxu1 %v2004_v49 }
  0x36   :  { %216 = vmatmul.bf16.vlgmr.msra.gmra.mxu0 %v98_v50  ;;  %1866 = vmatpush.bf16.msra.mxu2 %v2176_v44 }
  0x37   :  { %265 = vmatmul.bf16.vlgmr.msra.gmra.mxu1 %v98_v50  ;;  %1915 = vmatpush.bf16.msra.mxu3 %v2184_v45 }
  0x3a   :  { %1867 = vmatpush.bf16.msra.mxu2 %v2175_v52 }
  0x46   :  { %221 = vmatmul.bf16.gmra.mxu0 %v99_v53 }
  0x47   :  { %270 = vmatmul.bf16.gmra.mxu1 %v99_v53 }
  0x56   :  { %226 = vmatmul.bf16.gmra.mxu0 %v100_v56 }
  0x57   :  { %275 = vmatmul.bf16.gmra.mxu1 %v100_v56  ;;  %v2183_v56 = vld [vmem:[#allocation8 + $0x50] sm:$0xff] }
  0x58   :  { %1916 = vmatpush.bf16.msra.mxu3 %v2183_v56 }
  0x5c   :  { %1917 = vmatpush.bf16.msra.mxu3 %v2182_v2 }
  0x66   :  { %231 = vmatmul.bf16.gmra.mxu0 %v101_v59 }
  0x67   :  { %280 = vmatmul.bf16.gmra.mxu1 %v101_v59 }
  0x76   :  { %236 = vmatmul.bf16.gmra.mxu0 %v102_v62 }
  0x77   :  { %285 = vmatmul.bf16.gmra.mxu1 %v102_v62 }
  0x86   :  { %241 = vmatmul.bf16.gmra.mxu0 %v103_v1 }
  0x87   :  { %290 = vmatmul.bf16.gmra.mxu1 %v103_v1  ;;  %v2174_v1 = vld [vmem:[#allocation8 + $0x8] sm:$0xff] }
  0x88   :  { %1868 = vmatpush.bf16.msra.mxu2 %v2174_v1 }
  0x96   :  { %246 = vmatmul.bf16.gmra.mxu0 %v104_v4 }
  0x97   :  { %295 = vmatmul.bf16.gmra.mxu1 %v104_v4 }
  0xa6   :  { %251 = vmatmul.bf16.gmra.mxu0 %v105_v7 }
  0xa7   :  { %300 = vmatmul.bf16.gmra.mxu1 %v105_v7 }
  0xb3   :  { %v217_v10 = vpop.f32.mrf.mxu0 }
  0xb4   :  { %v266_v12 = vpop.f32.mrf.mxu1  ;;  %v2453_v15 = vadd.f32 %v217_v10, %v2448_v9 }
  0xb5   :  { %v2456_v16 = vadd.f32 %v266_v12, %v2450_v11 }
  0xb6   :  { %v2459_v19 = vmul.f32 0.70710677, %v2453_v15 }
  0xb7   :  { %v2462_v21 = vmul.f32 0.70710677, %v2456_v16 }
  0xb8   :  { %v370_v25 = vmul.f32 %v2459_v19, %v2459_v19 }
  0xb9   :  { %v410_v27 = vmul.f32 %v2462_v21, %v2462_v21 }
  0xba   :  { %v2480_v31 = vmin.f32 %v370_v25, 16.0  ;;  %v2181_v25 = vld [vmem:[#allocation8 + $0x40] sm:$0xff] }
  0xbb   :  { %v219_v20 = vpop.f32.mrf.mxu0  ;;  %v2482_v35 = vmin.f32 %v410_v27, 16.0  ;;  %1918 = vmatpush.bf16.msra.mxu3 %v2181_v25  ;;  %v2582_v25 = vmul.f32 0.5, %v2453_v15 }
  0xbc   :  { %v2465_v22 = vadd.f32 %v219_v20, %v2448_v9  ;;  %v268_v23 = vpop.f32.mrf.mxu1  ;;  %v372_v40 = vmul.f32 2.1237322e-06, %v2480_v31  ;;  %v383_v48 = vmul.f32 3.8918573e-05, %v2480_v31 }
  0xbd   :  { %v2468_v24 = vadd.f32 %v268_v23, %v2450_v11  ;;  %v412_v42 = vmul.f32 2.1237322e-06, %v2482_v35  ;;  %v2173_v23 = vld [vmem:[#allocation8] sm:$0xff] }
  0xbe   :  { %v2475_v28 = vmul.f32 0.70710677, %v2465_v22  ;;  %v373_v49 = vadd.f32 0.00028619796, %v372_v40  ;;  %v384_v3 = vadd.f32 0.001143296, %v383_v48  ;;  %1869 = vmatpush.bf16.msra.mxu2 %v2173_v23 }
  0xbf   :  { %v2478_v30 = vmul.f32 0.70710677, %v2468_v24  ;;  %v413_v53 = vadd.f32 0.00028619796, %v412_v42 }
  0xc0   :  { %v450_v36 = vmul.f32 %v2475_v28, %v2475_v28  ;;  %v374_v61 = vmul.f32 %v373_v49, %v2480_v31  ;;  %v385_v26 = vmul.f32 %v384_v3, %v2480_v31 }
  0xc1   :  { %v490_v38 = vmul.f32 %v2478_v30, %v2478_v30  ;;  %v414_v63 = vmul.f32 %v413_v53, %v2482_v35 }
  0xc2   :  { %v2496_v43 = vmin.f32 %v450_v36, 16.0  ;;  %v375_v8 = vadd.f32 0.0036580483, %v374_v61  ;;  %v386_v44 = vadd.f32 0.014752088, %v385_v26 }
  0xc3   :  { %v222_v32 = vpop.f32.mrf.mxu0  ;;  %v2498_v46 = vmin.f32 %v490_v38, 16.0  ;;  %v415_v14 = vadd.f32 0.0036580483, %v414_v63 }
  0xc4   :  { %v271_v37 = vpop.f32.mrf.mxu1  ;;  %v2489_v39 = vadd.f32 %v222_v32, %v2448_v9  ;;  %v452_v54 = vmul.f32 2.1237322e-06, %v2496_v43  ;;  %v387_v3 = vmul.f32 %v386_v44, %v2480_v31 }
  0xc5   :  { %v2493_v41 = vadd.f32 %v271_v37, %v2450_v11  ;;  %v492_v57 = vmul.f32 2.1237322e-06, %v2498_v46  ;;  %v376_v37 = vmul.f32 %v375_v8, %v2480_v31  ;;  %v416_v40 = vmul.f32 %v415_v14, %v2482_v35 }
  0xc6   :  { %v2501_v47 = vmul.f32 0.70710677, %v2489_v39  ;;  %v453_v0 = vadd.f32 0.00028619796, %v452_v54 }
  0xc7   :  { %v2505_v50 = vmul.f32 0.70710677, %v2493_v41  ;;  %v493_v4 = vadd.f32 0.00028619796, %v492_v57 }
  0xc8   :  { %v530_v58 = vmul.f32 %v2501_v47, %v2501_v47  ;;  %v454_v27 = vmul.f32 %v453_v0, %v2496_v43 }
  0xc9   :  { %v570_v62 = vmul.f32 %v2505_v50, %v2505_v50  ;;  %v494_v29 = vmul.f32 %v493_v4, %v2498_v46 }
  0xca   :  { %v2521_v5 = vmin.f32 %v530_v58, 16.0  ;;  %v455_v45 = vadd.f32 0.0036580483, %v454_v27  ;;  %v417_v58 = vadd.f32 0.05243302, %v416_v40 }
  0xcb   :  { %v224_v51 = vpop.f32.mrf.mxu0  ;;  %v2529_v10 = vmin.f32 %v570_v62, 16.0  ;;  %v495_v48 = vadd.f32 0.0036580483, %v494_v29  ;;  %v388_v40 = vadd.f32 0.112945676, %v387_v3 }
  0xcc   :  { %v273_v55 = vpop.f32.mrf.mxu1  ;;  %v2512_v59 = vadd.f32 %v224_v51, %v2448_v9  ;;  %v532_v32 = vmul.f32 2.1237322e-06, %v2521_v5  ;;  %v456_v0 = vmul.f32 %v455_v45, %v2496_v43  ;;  %v418_v26 = vmul.f32 %v417_v58, %v2482_v35 }
  0xcd   :  { %v2515_v60 = vadd.f32 %v273_v55, %v2450_v11  ;;  %v572_v38 = vmul.f32 2.1237322e-06, %v2529_v10  ;;  %v377_v55 = vadd.f32 0.05243302, %v376_v37  ;;  %v496_v4 = vmul.f32 %v495_v48, %v2498_v46 }
  0xce   :  { %v2524_v6 = vmul.f32 0.70710677, %v2512_v59  ;;  %v533_v49 = vadd.f32 0.00028619796, %v532_v32  ;;  %v2590_v32 = vmul.f32 0.5, %v2456_v16  ;;  %v2593_v37 = vmul.f32 0.5, %v2465_v22 }
  0xcf   :  { %v2527_v7 = vmul.f32 0.70710677, %v2515_v60  ;;  %v573_v56 = vadd.f32 0.00028619796, %v572_v38  ;;  %v378_v14 = vmul.f32 %v377_v55, %v2480_v31  ;;  %v457_v44 = vadd.f32 0.05243302, %v456_v0 }
  0xd0   :  { %v610_v12 = vmul.f32 %v2524_v6, %v2524_v6  ;;  %v534_v1 = vmul.f32 %v533_v49, %v2521_v5  ;;  %v497_v45 = vadd.f32 0.05243302, %v496_v4  ;;  %v419_v16 = vadd.f32 0.18741608, %v418_v26 }
  0xd1   :  { %v650_v17 = vmul.f32 %v2527_v7, %v2527_v7  ;;  %v379_v49 = vadd.f32 0.18741608, %v378_v14  ;;  %v458_v0 = vmul.f32 %v457_v44, %v2496_v43 }
  0xd2   :  { %v2542_v33 = vmin.f32 %v610_v12, 16.0  ;;  %v535_v38 = vadd.f32 0.0036580483, %v534_v1  ;;  %v498_v1 = vmul.f32 %v497_v45, %v2498_v46  ;;  %v420_v26 = vmul.f32 %v419_v16, %v2482_v35 }
  0xd3   :  { %v227_v13 = vpop.f32.mrf.mxu0  ;;  %v2544_v34 = vmin.f32 %v650_v17, 16.0  ;;  %v574_v17 = vmul.f32 %v573_v56, %v2529_v10 }
  0xd4   :  { %v2536_v18 = vadd.f32 %v227_v13, %v2448_v9  ;;  %v276_v20 = vpop.f32.mrf.mxu1  ;;  %v612_v51 = vmul.f32 2.1237322e-06, %v2542_v33  ;;  %v536_v58 = vmul.f32 %v535_v38, %v2521_v5 }
  0xd5   :  { %v2547_v36 = vadd.f32 %v276_v20, %v2450_v11  ;;  %v652_v52 = vmul.f32 2.1237322e-06, %v2544_v34 }
  0xd6   :  { %v2553_v42 = vmul.f32 0.70710677, %v2536_v18  ;;  %v613_v8 = vadd.f32 0.00028619796, %v612_v51  ;;  %v575_v51 = vadd.f32 0.0036580483, %v574_v17 }
  0xd7   :  { %v2560_v54 = vmul.f32 0.70710677, %v2547_v36  ;;  %v653_v12 = vadd.f32 0.00028619796, %v652_v52 }
  0xd8   :  { %v690_v53 = vmul.f32 %v2553_v42, %v2553_v42  ;;  %v614_v15 = vmul.f32 %v613_v8, %v2542_v33 }
  0xd9   :  { %v730_v62 = vmul.f32 %v2560_v54, %v2560_v54  ;;  %v654_v48 = vmul.f32 %v653_v12, %v2544_v34  ;;  %v2613_v12 = vmul.f32 0.5, %v2489_v39 }
  0xda   :  { %v2562_v61 = vmin.f32 %v690_v53, 16.0  ;;  %v615_v3 = vadd.f32 0.0036580483, %v614_v15  ;;  %v459_v15 = vadd.f32 0.18741608, %v458_v0 }
  0xdb   :  { %v229_v57 = vpop.f32.mrf.mxu0  ;;  %v2573_v13 = vmin.f32 %v730_v62, 16.0  ;;  %v655_v4 = vadd.f32 0.0036580483, %v654_v48  ;;  %3798 = vst [vmem:[#allocation17_spill] sm:$0xff] %v2613_v12  ;;  %v499_v48 = vadd.f32 0.18741608, %v498_v1 }
  0xdc   :  { %v278_v63 = vpop.f32.mrf.mxu1  ;;  %v2569_v2 = vadd.f32 %v229_v57, %v2448_v9  ;;  %v692_v20 = vmul.f32 2.1237322e-06, %v2562_v61  ;;  %v2603_v57 = vmul.f32 0.5, %v2468_v24  ;;  %v576_v24 = vmul.f32 %v575_v51, %v2529_v10 }
  0xdd   :  { %3796 = vst [vmem:[#allocation15_spill] sm:$0xff] %v2573_v13  ;;  %v732_v27 = vmul.f32 2.1237322e-06, %v2573_v13  ;;  %v2587_v29 = vadd.f32 %v278_v63, %v2450_v11  ;;  %v389_v63 = vmul.f32 %v388_v40, %v2480_v31  ;;  %v537_v40 = vadd.f32 0.05243302, %v536_v58 }
  0xde   :  { %v2579_v23 = vmul.f32 0.70710677, %v2569_v2  ;;  %v693_v52 = vadd.f32 0.00028619796, %v692_v20  ;;  %v380_v20 = vmul.f32 %v379_v49, %v2480_v31  ;;  %v616_v51 = vmul.f32 %v615_v3, %v2542_v33 }
  0xdf   :  { %v733_v56 = vadd.f32 0.00028619796, %v732_v27  ;;  %v2600_v22 = vmul.f32 0.70710677, %v2587_v29  ;;  %v390_v45 = vadd.f32 0.4994258, %v389_v63  ;;  %v656_v49 = vmul.f32 %v655_v4, %v2544_v34 }
  0xe0   :  { %v770_v53 = vmul.f32 %v2579_v23, %v2579_v23  ;;  %v694_v14 = vmul.f32 %v693_v52, %v2562_v61  ;;  %v577_v52 = vadd.f32 0.05243302, %v576_v24  ;;  %v381_v16 = vadd.f32 1.1283791, %v380_v20 }
  0xe1   :  { %3797 = vst [vmem:[#allocation16_spill] sm:$0xff] %v2600_v22  ;;  %v734_v27 = vmul.f32 %v733_v56, %v2573_v13  ;;  %v810_v38 = vmul.f32 %v2600_v22, %v2600_v22  ;;  %v2634_v56 = vmul.f32 0.5, %v2493_v41  ;;  %v391_v3 = vmul.f32 %v390_v45, %v2480_v31 }
  0xe2   :  { %v2617_v17 = vmin.f32 %v770_v53, 16.0  ;;  %v695_v53 = vadd.f32 0.0036580483, %v694_v14  ;;  %v421_v4 = vadd.f32 1.1283791, %v420_v26  ;;  %v460_v24 = vmul.f32 %v459_v15, %v2496_v43 }
  0xe3   :  { %v232_v55 = vpop.f32.mrf.mxu0  ;;  %3800 = vst [vmem:[#allocation19_spill] sm:$0xff] %v2634_v56  ;;  %v735_v58 = vadd.f32 0.0036580483, %v734_v27  ;;  %v2636_v12 = vmin.f32 %v810_v38, 16.0  ;;  %v617_v14 = vadd.f32 0.05243302, %v616_v51  ;;  %v500_v20 = vmul.f32 %v499_v48, %v2498_v46 }
  0xe4   :  { %v2607_v62 = vadd.f32 %v232_v55, %v2448_v9  ;;  %v281_v8 = vpop.f32.mrf.mxu1  ;;  %v772_v55 = vmul.f32 2.1237322e-06, %v2617_v17  ;;  %v657_v41 = vadd.f32 0.05243302, %v656_v49  ;;  %v578_v27 = vmul.f32 %v577_v52, %v2529_v10 }
  0xe5   :  { %v2628_v39 = vadd.f32 %v281_v8, %v2450_v11  ;;  %v538_v8 = vmul.f32 %v537_v40, %v2521_v5  ;;  %v696_v38 = vmul.f32 %v695_v53, %v2562_v61  ;;  %v2650_v56 = vmul.f32 %v381_v16, %v2459_v19 }
  0xe6   :  { %v2625_v44 = vmul.f32 0.70710677, %v2607_v62  ;;  %v773_v40 = vadd.f32 0.00028619796, %v772_v55  ;;  %v812_v22 = vmul.f32 2.1237322e-06, %v2636_v12  ;;  %v618_v19 = vmul.f32 %v617_v14, %v2542_v33 }
  0xe7   :  { %v2642_v0 = vmul.f32 0.70710677, %v2628_v39  ;;  %v539_v26 = vadd.f32 0.18741608, %v538_v8  ;;  %v2661_v48 = vadd.f32 1.0, %v391_v3  ;;  %v2664_v49 = vmul.f32 0.5, %v2512_v59 }
  0xe8   :  { %3799 = vst [vmem:[#allocation18_spill] sm:$0xff] %v2625_v44  ;;  %v850_v63 = vmul.f32 %v2625_v44, %v2625_v44  ;;  %v736_v44 = vmul.f32 %v735_v58, %v2573_v13  ;;  %v461_v51 = vadd.f32 1.1283791, %v460_v24  ;;  %v658_v52 = vmul.f32 %v657_v41, %v2544_v34 }
  0xe9   :  { %v890_v15 = vmul.f32 %v2642_v0, %v2642_v0  ;;  %3801 = vst [vmem:[#allocation20_spill] sm:$0xff] %v2664_v49  ;;  %v501_v53 = vadd.f32 1.1283791, %v500_v20  ;;  %v579_v55 = vadd.f32 0.18741608, %v578_v27  ;;  %v774_v58 = vmul.f32 %v773_v40, %v2617_v17 }
  0xea   :  { %v2657_v45 = vmin.f32 %v850_v63, 16.0  ;;  %v697_v16 = vadd.f32 0.05243302, %v696_v38  ;;  %v2670_v63 = vmul.f32 %v421_v4, %v2462_v21  ;;  %v813_v3 = vadd.f32 0.00028619796, %v812_v22 }
  0xeb   :  { %v234_v1 = vpop.f32.mrf.mxu0  ;;  %v540_v59 = vmul.f32 %v539_v26, %v2521_v5  ;;  %v2677_v49 = vmin.f32 %v890_v15, 16.0  ;;  %2199 = vrcp.f32 %v2661_v48  ;;  %v619_v41 = vadd.f32 0.18741608, %v618_v19 }
  0xec   :  { %v2655_v31 = vadd.f32 %v234_v1, %v2448_v9  ;;  %v283_v8 = vpop.f32.mrf.mxu1  ;;  %v737_v1 = vadd.f32 0.05243302, %v736_v44  ;;  %v852_v14 = vmul.f32 2.1237322e-06, %v2657_v45  ;;  %v2681_v20 = vmul.f32 0.5, %v2515_v60 }
  0xed   :  { %v659_v27 = vadd.f32 0.18741608, %v658_v52  ;;  %v2684_v21 = vadd.f32 %v283_v8, %v2450_v11  ;;  %v580_v22 = vmul.f32 %v579_v55, %v2529_v10  ;;  %v2688_v44 = vmul.f32 0.5, %v2536_v18 }
  0xee   :  { %v2673_v24 = vmul.f32 0.70710677, %v2655_v31  ;;  %3802 = vst [vmem:[#allocation21_spill] sm:$0xff] %v2681_v20  ;;  %v698_v4 = vmul.f32 %v697_v16, %v2562_v61  ;;  %v775_v38 = vadd.f32 0.0036580483, %v774_v58  ;;  %v2692_v40 = vmul.f32 %v461_v51, %v2475_v28 }
  0xef   :  { %3803 = vst [vmem:[#allocation22_spill] sm:$0xff] %v2688_v44  ;;  %v738_v26 = vmul.f32 %v737_v1, %v2573_v13  ;;  %v814_v60 = vmul.f32 %v813_v3, %v2636_v12  ;;  %v2699_v19 = vmul.f32 %v501_v53, %v2478_v30  ;;  %v541_v52 = vadd.f32 1.1283791, %v540_v59 }
  0xf0   :  { %v930_v15 = vmul.f32 %v2673_v24, %v2673_v24  ;;  %v853_v55 = vadd.f32 0.00028619796, %v852_v14  ;;  %v892_v18 = vmul.f32 2.1237322e-06, %v2677_v49  ;;  %v620_v16 = vmul.f32 %v619_v41, %v2542_v33 }
  0xf1   :  { %v660_v28 = vmul.f32 %v659_v27, %v2544_v34  ;;  %v2705_v51 = vmul.f32 0.5, %v2547_v36  ;;  %v2708_v58 = vmul.f32 0.70710677, %v2684_v21  ;;  %v2710_v1 = vpop.eup %2199  ;;  %v581_v3 = vadd.f32 1.1283791, %v580_v22 }
  0xf2   :  { %v699_v30 = vadd.f32 0.18741608, %v698_v4  ;;  %v776_v53 = vmul.f32 %v775_v38, %v2617_v17  ;;  %v463_v59 = vmul.f32 3.8918573e-05, %v2496_v43  ;;  %v739_v14 = vadd.f32 0.18741608, %v738_v26 }
  0xf3   :  { %v237_v8 = vpop.f32.mrf.mxu0  ;;  %3804 = vst [vmem:[#allocation23_spill] sm:$0xff] %v2705_v51  ;;  %v815_v44 = vadd.f32 0.0036580483, %v814_v60  ;;  %v2714_v20 = vmin.f32 %v930_v15, 16.0  ;;  %v2720_v36 = vmul.f32 %v541_v52, %v2501_v47  ;;  %v2723_v27 = vmul.f32 0.5, %v2569_v2 }
  0xf4   :  { %v2717_v41 = vadd.f32 %v237_v8, %v2448_v9  ;;  %v854_v22 = vmul.f32 %v853_v55, %v2657_v45  ;;  %v893_v4 = vadd.f32 0.00028619796, %v892_v18  ;;  %v621_v51 = vadd.f32 1.1283791, %v620_v16 }
  0xf5   :  { %3805 = vst [vmem:[#allocation24_spill] sm:$0xff] %v2720_v36  ;;  %v661_v38 = vadd.f32 1.1283791, %v660_v28  ;;  %v970_v26 = vmul.f32 %v2708_v58, %v2708_v58  ;;  %v394_v60 = vmul.f32 %v2710_v1, %v2661_v48  ;;  %v2731_v15 = vmul.f32 %v581_v3, %v2505_v50 }
  0xf6   :  { %3806 = vst [vmem:[#allocation25_spill] sm:$0xff] %v2723_v27  ;;  %v700_v47 = vmul.f32 %v699_v30, %v2562_v61  ;;  %v777_v52 = vadd.f32 0.05243302, %v776_v53  ;;  %v2735_v2 = vmul.f32 0.5, %v2587_v29  ;;  %v740_v55 = vmul.f32 %v739_v14, %v2573_v13 }
  0xf7   :  { %3807 = vst [vmem:[#allocation26_spill] sm:$0xff] %v2731_v15  ;;  %v816_v18 = vmul.f32 %v815_v44, %v2636_v12  ;;  %v932_v8 = vmul.f32 2.1237322e-06, %v2714_v20  ;;  %v2741_v16 = vmul.f32 0.70710677, %v2717_v41  ;;  %v2744_v28 = vmul.f32 0.5, %v2607_v62 }
  0xf8   :  { %3808 = vst [vmem:[#allocation27_spill] sm:$0xff] %v2735_v2  ;;  %v855_v50 = vadd.f32 0.0036580483, %v854_v22  ;;  %v2747_v3 = vmul.f32 0.5, %v2628_v39  ;;  %v894_v30 = vmul.f32 %v893_v4, %v2677_v49  ;;  %v2751_v29 = vmul.f32 %v621_v51, %v2524_v6  ;;  %v286_v22 = vpop.f32.mrf.mxu1 }
  0xf9   :  { %3809 = vst [vmem:[#allocation28_spill] sm:$0xff] %v2741_v16  ;;  %v2754_v53 = vmul.f32 %v661_v38, %v2527_v7  ;;  %v2756_v44 = vmin.f32 %v970_v26, 16.0  ;;  %v395_v14 = vsub.f32 1.0, %v394_v60  ;;  %v701_v2 = vadd.f32 1.1283791, %v700_v47 }
  0xfa   :  { %3810 = vst [vmem:[#allocation29_spill] sm:$0xff] %v2744_v28  ;;  %v778_v27 = vmul.f32 %v777_v52, %v2617_v17  ;;  %v2760_v62 = vmul.f32 0.5, %v2655_v31  ;;  %v464_v39 = vadd.f32 0.001143296, %v463_v59  ;;  %v817_v4 = vadd.f32 0.05243302, %v816_v18 }
  0xfb   :  { %3811 = vst [vmem:[#allocation30_spill] sm:$0xff] %v2747_v3  ;;  %v2762_v3 = vadd.f32 1.1283791, %v740_v55  ;;  %v933_v28 = vadd.f32 0.00028619796, %v932_v8  ;;  %v1010_v6 = vmul.f32 %v2741_v16, %v2741_v16  ;;  %v856_v7 = vmul.f32 %v855_v50, %v2657_v45 }
  0xfc   :  { %3812 = vst [vmem:[#allocation31_spill] sm:$0xff] %v2751_v29  ;;  %v895_v51 = vadd.f32 0.0036580483, %v894_v30  ;;  %v465_v38 = vmul.f32 %v464_v39, %v2496_v43  ;;  %v423_v26 = vmul.f32 3.8918573e-05, %v2482_v35  ;;  %v2771_v31 = vadd.f32 %v286_v22, %v2450_v11 }
  0xfd   :  { %3813 = vst [vmem:[#allocation32_spill] sm:$0xff] %v2754_v53  ;;  %v972_v60 = vmul.f32 2.1237322e-06, %v2756_v44  ;;  %v396_v59 = vmul.f32 %v2710_v1, %v395_v14  ;;  %v503_v47 = vmul.f32 3.8918573e-05, %v2498_v46  ;;  %v2776_v52 = vmul.f32 %v701_v2, %v2553_v42 }
  0xfe   :  { %3814 = vst [vmem:[#allocation33_spill] sm:$0xff] %v2760_v62  ;;  %v2779_v55 = vmul.f32 0.5, %v2684_v21  ;;  %v466_v18 = vadd.f32 0.014752088, %v465_v38  ;;  %v424_v8 = vadd.f32 0.001143296, %v423_v26  ;;  %v818_v30 = vmul.f32 %v817_v4, %v2636_v12 }
  0xff   :  { %3815 = vst [vmem:[#allocation34_spill] sm:$0xff] %v2776_v52  ;;  %v779_v50 = vadd.f32 0.18741608, %v778_v27  ;;  %v934_v39 = vmul.f32 %v933_v28, %v2714_v20  ;;  %v2783_v62 = vmin.f32 %v1010_v6, 16.0  ;;  %v857_v22 = vadd.f32 0.05243302, %v856_v7 }
 0x100   :  { %3816 = vst [vmem:[#allocation35_spill] sm:$0xff] %v2779_v55  ;;  %v467_v14 = vmul.f32 %v466_v18, %v2496_v43  ;;  %v425_v53 = vmul.f32 %v424_v8, %v2482_v35  ;;  %v504_v13 = vadd.f32 0.001143296, %v503_v47  ;;  %v896_v42 = vmul.f32 %v895_v51, %v2677_v49 }
 0x101   :  { %v973_v2 = vadd.f32 0.00028619796, %v972_v60  ;;  %v2789_v21 = vmul.f32 0.70710677, %v2771_v31  ;;  %v397_v27 = vadd.f32 %v2710_v1, %v396_v59  ;;  %vm399_vm0 = vweird.f32 %v2710_v1 }
 0x102   :  { %v468_v4 = vadd.f32 0.112945676, %v467_v14  ;;  %v426_v28 = vadd.f32 0.014752088, %v425_v53  ;;  %v505_v6 = vmul.f32 %v504_v13, %v2498_v46  ;;  %v935_v7 = vadd.f32 0.0036580483, %v934_v39 }
 0x103   :  { %3817 = vst [vmem:[#allocation36_spill] sm:$0xff] %v2789_v21  ;;  %v1012_v38 = vmul.f32 2.1237322e-06, %v2783_v62  ;;  %vm398_vm1 = vweird.f32 %v2661_v48  ;;  %v404_v26 = vand.u32 2147483648, %v2661_v48  ;;  %v402_v51 = vand.u32 2147483647, %v2661_v48 }
 0x104   :  { %v469_v60 = vmul.f32 %v468_v4, %v2496_v43  ;;  %v427_v47 = vmul.f32 %v426_v28, %v2482_v35  ;;  %v506_v59 = vadd.f32 0.014752088, %v505_v6  ;;  %v897_v18 = vadd.f32 0.05243302, %v896_v42  ;;  %vm2805_vm2 = vmor %vm398_vm1, %vm399_vm0 }
 0x105   :  { %v974_v8 = vmul.f32 %v973_v2, %v2756_v44  ;;  %v1050_v13 = vmul.f32 %v2789_v21, %v2789_v21  ;;  %v543_v39 = vmul.f32 3.8918573e-05, %v2521_v5  ;;  %v401_v48 = vsel %vm2805_vm2, %v2710_v1, %v397_v27 }
 0x106   :  { %v470_v14 = vadd.f32 0.4994258, %v469_v60  ;;  %v428_v4 = vadd.f32 0.112945676, %v427_v47  ;;  %v507_v42 = vmul.f32 %v506_v59, %v2498_v46  ;;  %v936_v2 = vmul.f32 %v935_v7, %v2714_v20 }
 0x107   :  { %v1013_v28 = vadd.f32 0.00028619796, %v1012_v38  ;;  %v405_v6 = vor.u32 1.1754944e-38, %v404_v26  ;;  %v544_v55 = vadd.f32 0.001143296, %v543_v39  ;;  %vm403_vm3 = vcmp.eq.f32.partialorder %v402_v51, 8.507059e+37 }
 0x108   :  { %v471_v52 = vmul.f32 %v470_v14, %v2496_v43  ;;  %v429_v15 = vmul.f32 %v428_v4, %v2482_v35  ;;  %v508_v21 = vadd.f32 0.112945676, %v507_v42  ;;  %v819_v29 = vadd.f32 0.18741608, %v818_v30 }
 0x109   :  { %v975_v36 = vadd.f32 0.0036580483, %v974_v8  ;;  %v406_v16 = vsel %vm403_vm3, %v405_v6, %v401_v48  ;;  %v545_v1 = vmul.f32 %v544_v55, %v2521_v5  ;;  %v2818_v27 = vmin.f32 %v1050_v13, 16.0 }
 0x10a   :  { %v2820_v60 = vadd.f32 1.0, %v471_v52  ;;  %v430_v47 = vadd.f32 0.4994258, %v429_v15  ;;  %v509_v7 = vmul.f32 %v508_v21, %v2498_v46  ;;  %v780_v38 = vmul.f32 %v779_v50, %v2617_v17 }
 0x10b   :  { %v858_v26 = vmul.f32 %v857_v22, %v2657_v45  ;;  %v898_v43 = vmul.f32 %v897_v18, %v2677_v49  ;;  %v546_v51 = vadd.f32 0.014752088, %v545_v1  ;;  %v937_v59 = vadd.f32 0.05243302, %v936_v2 }
 0x10c   :  { %v1014_v30 = vmul.f32 %v1013_v28, %v2783_v62  ;;  %v407_v8 = vmul.f32 %v406_v16, %v2650_v56  ;;  %2201 = vrcp.f32 %v2820_v60  ;;  %v976_v52 = vmul.f32 %v975_v36, %v2756_v44 }
 0x10d   :  { %v431_v15 = vmul.f32 %v430_v47, %v2482_v35  ;;  %v510_v55 = vadd.f32 0.4994258, %v509_v7  ;;  %v547_v21 = vmul.f32 %v546_v51, %v2521_v5  ;;  %v2834_v50 = vmul.f32 %v2762_v3, %v2560_v54  ;;  %v239_v7 = vpop.f32.mrf.mxu0 }
 0x10e   :  { %v820_v22 = vmul.f32 %v819_v29, %v2636_v12  ;;  %v1052_v18 = vmul.f32 2.1237322e-06, %v2818_v27  ;;  %v623_v13 = vmul.f32 3.8918573e-05, %v2542_v33  ;;  %v859_v56 = vadd.f32 0.18741608, %v858_v26 }
 0x10f   :  { %v899_v16 = vadd.f32 0.18741608, %v898_v43  ;;  %v2839_v53 = vadd.f32 1.0, %v431_v15  ;;  %v511_v36 = vmul.f32 %v510_v55, %v2498_v46  ;;  %v2842_v35 = vadd.f32 1.1283791, %v780_v38 }
 0x110   :  { %v2845_v39 = vmul.f32 0.5, %v2717_v41  ;;  %v1015_v48 = vadd.f32 0.0036580483, %v1014_v30  ;;  %v2061_v54 = vclamps-f32 %v407_v8, 1.0  ;;  %v938_v3 = vmul.f32 %v937_v59, %v2714_v20 }
 0x111   :  { %v977_v29 = vadd.f32 0.05243302, %v976_v52  ;;  %2203 = vrcp.f32 %v2839_v53  ;;  %v548_v14 = vadd.f32 0.112945676, %v547_v21  ;;  %v2850_v42 = vmul.f32 0.5, %v2771_v31 }
 0x112   :  { %3820 = vst [vmem:[#allocation37_spill] sm:$0xff] %v2845_v39  ;;  %v2202_v4 = vpop.eup %2201  ;;  %v1053_v2 = vadd.f32 0.00028619796, %v1052_v18  ;;  %v2852_v28 = vadd.f32 1.0, %v511_v36  ;;  %v624_v46 = vadd.f32 0.001143296, %v623_v13  ;;  %v2857_v41 = vmul.f32 %v859_v56, %v2657_v45  ;;  %v288_v36 = vpop.f32.mrf.mxu1 }
 0x113   :  { %3821 = vst [vmem:[#allocation38_spill] sm:$0xff] %v2850_v42  ;;  %v2854_v6 = vadd.f32 1.1283791, %v820_v22  ;;  %v2860_v1 = vmul.f32 %v899_v16, %v2677_v49  ;;  %v474_v47 = vmul.f32 %v2202_v4, %v2820_v60  ;;  %v2864_v38 = vmul.f32 %v1015_v48, %v2783_v62 }
 0x114   :  { %v1650_v31 = vadd.f32 1.0, %v2061_v54  ;;  %2205 = vrcp.f32 %v2852_v28  ;;  %v583_v26 = vmul.f32 3.8918573e-05, %v2529_v10  ;;  %v2868_v43 = vadd.f32 0.18741608, %v938_v3 }
 0x115   :  { %v475_v51 = vsub.f32 1.0, %v474_v47  ;;  %v482_v59 = vand.u32 2147483647, %v2820_v60  ;;  %v549_v30 = vmul.f32 %v548_v14, %v2521_v5  ;;  %v2873_v8 = vmul.f32 %v977_v29, %v2756_v44 }
 0x116   :  { %v2876_v52 = vmul.f32 %v1053_v2, %v2818_v27  ;;  %v484_v15 = vand.u32 2147483648, %v2820_v60  ;;  %v625_v55 = vmul.f32 %v624_v46, %v2542_v33  ;;  %vm479_vm4 = vweird.f32 %v2202_v4 }
 0x117   :  { %v2204_v21 = vpop.eup %2203  ;;  %v476_v22 = vmul.f32 %v2202_v4, %v475_v51  ;;  %v2881_v18 = vadd.f32 %v239_v7, %v2448_v9  ;;  %v550_v13 = vadd.f32 0.4994258, %v549_v30  ;;  %vm478_vm5 = vweird.f32 %v2820_v60 }
 0x118   :  { %v2885_v56 = vmul.f32 %v1650_v31, %v2582_v25  ;;  %v434_v16 = vmul.f32 %v2204_v21, %v2839_v53  ;;  %v584_v48 = vadd.f32 0.001143296, %v583_v26  ;;  %vm483_vm6 = vcmp.eq.f32.partialorder %v482_v59, 8.507059e+37  ;;  %vm480_vm7 = vmor %vm478_vm5, %vm479_vm4 }
 0x119   :  { %v477_v54 = vadd.f32 %v2202_v4, %v476_v22  ;;  %v442_v3 = vand.u32 2147483647, %v2839_v53  ;;  %v444_v29 = vand.u32 2147483648, %v2839_v53  ;;  %v485_v2 = vor.u32 1.1754944e-38, %v484_v15 }
 0x11a   :  { %v2206_v14 = vpop.eup %2205  ;;  %v435_v46 = vsub.f32 1.0, %v434_v16  ;;  %v551_v47 = vmul.f32 %v550_v13, %v2521_v5  ;;  %v626_v60 = vadd.f32 0.014752088, %v625_v55  ;;  %v2893_v31 = vmul.f32 0.70710677, %v2881_v18  ;;  %v242_v55 = vpop.f32.mrf.mxu0 }
 0x11b   :  { %v481_v7 = vsel %vm480_vm7, %v2202_v4, %v477_v54  ;;  %v514_v25 = vmul.f32 %v2206_v14, %v2852_v28  ;;  %v2896_v26 = vadd.f32 %v288_v36, %v2450_v11  ;;  %vm438_vm8 = vweird.f32 %v2839_v53 }
 0x11c   :  { %v486_v51 = vsel %vm483_vm6, %v485_v2, %v481_v7  ;;  %v436_v59 = vmul.f32 %v2204_v21, %v435_v46  ;;  %vm439_vm9 = vweird.f32 %v2204_v21  ;;  %vm2900_vm10 = vcmp.eq.f32.partialorder %v442_v3, 8.507059e+37 }
 0x11d   :  { %v487_v30 = vmul.f32 %v486_v51, %v2692_v40  ;;  %v445_v5 = vor.u32 1.1754944e-38, %v444_v29  ;;  %v515_v4 = vsub.f32 1.0, %v514_v25  ;;  %v522_v13 = vand.u32 2147483647, %v2852_v28  ;;  %vm440_vm11 = vmor %vm438_vm8, %vm439_vm9 }
 0x11e   :  { %v437_v22 = vadd.f32 %v2204_v21, %v436_v59  ;;  %v524_v16 = vand.u32 2147483648, %v2852_v28  ;;  %v2906_v36 = vadd.f32 1.0, %v551_v47  ;;  %vm519_vm12 = vweird.f32 %v2206_v14 }
 0x11f   :  { %v2063_v54 = vclamps-f32 %v487_v30, 1.0  ;;  %v516_v53 = vmul.f32 %v2206_v14, %v515_v4  ;;  %v1090_v40 = vmul.f32 %v2893_v31, %v2893_v31  ;;  %vm518_vm13 = vweird.f32 %v2852_v28 }
 0x120   :  { %v441_v3 = vsel %vm440_vm11, %v2204_v21, %v437_v22  ;;  %v2912_v29 = vadd.f32 %v242_v55, %v2448_v9  ;;  %2207 = vrcp.f32 %v2906_v36  ;;  %v2918_v7 = vmul.f32 0.70710677, %v2896_v26  ;;  %vm520_vm14 = vmor %vm518_vm13, %vm519_vm12 }
 0x121   :  { %v1652_v2 = vadd.f32 1.0, %v2063_v54  ;;  %v446_v46 = vsel %vm2900_vm10, %v445_v5, %v441_v3  ;;  %v517_v47 = vadd.f32 %v2206_v14, %v516_v53  ;;  %v525_v51 = vor.u32 1.1754944e-38, %v524_v16 }
 0x122   :  { %v447_v25 = vmul.f32 %v446_v46, %v2670_v63  ;;  %v627_v21 = vmul.f32 %v626_v60, %v2542_v33  ;;  %v585_v28 = vmul.f32 %v584_v48, %v2529_v10  ;;  %vm523_vm15 = vcmp.eq.f32.partialorder %v522_v13, 8.507059e+37 }
 0x123   :  { %v1684_v59 = vmul.f32 %v1652_v2, %v2593_v37  ;;  %v521_v30 = vsel %vm520_vm14, %v2206_v14, %v517_v47  ;;  %v2924_v4 = vmin.f32 %v1090_v40, 16.0  ;;  %v1017_v15 = vadd.f32 0.05243302, %v2864_v38 }
 0x124   :  { %v2062_v5 = vclamps-f32 %v447_v25, 1.0  ;;  %v526_v55 = vsel %vm523_vm15, %v525_v51, %v521_v30  ;;  %v2928_v22 = vmul.f32 0.70710677, %v2912_v29  ;;  %v1055_v63 = vadd.f32 0.0036580483, %v2876_v52 }
 0x125   :  { %v1746_v16 = vpack.c.bf16 %v1684_v59, %v2885_v56  ;;  %v527_v60 = vmul.f32 %v526_v55, %v2699_v19  ;;  %v1130_v37 = vmul.f32 %v2918_v7, %v2918_v7  ;;  %v2939_v14 = vmul.f32 %v2842_v35, %v2579_v23 }
 0x126   :  { %v2935_v48 = vpop.eup %2207  ;;  %v861_v38 = vadd.f32 1.1283791, %v2857_v41  ;;  %v628_v13 = vadd.f32 0.112945676, %v627_v21  ;;  %v586_v54 = vadd.f32 0.014752088, %v585_v28  ;;  %v940_v3 = vmul.f32 %v2868_v43, %v2714_v20  ;;  %v291_v41 = vpop.f32.mrf.mxu1 }
 0x127   :  { %1870 = vmatmul.bf16.vlgmr.msra.gmra.mxu2 %v1746_v16  ;;  %v2064_v53 = vclamps-f32 %v527_v60, 1.0  ;;  %v1651_v52 = vadd.f32 1.0, %v2062_v5  ;;  %v1092_v56 = vmul.f32 2.1237322e-06, %v2924_v4  ;;  %v554_v19 = vmul.f32 %v2935_v48, %v2906_v36  ;;  %v3825_v60 = vld [vmem:[#allocation18_spill] sm:$0xff] }
 0x128   :  { %v901_v40 = vadd.f32 1.1283791, %v2860_v1  ;;  %v1018_v23 = vmul.f32 %v1017_v15, %v2783_v62  ;;  %v1170_v35 = vmul.f32 %v2928_v22, %v2928_v22  ;;  %v979_v2 = vadd.f32 0.18741608, %v2873_v8  ;;  %v3824_v8 = vld [vmem:[#allocation16_spill] sm:$0xff] }
 0x129   :  { %v1056_v46 = vmul.f32 %v1055_v63, %v2818_v27  ;;  %v1653_v47 = vadd.f32 1.0, %v2064_v53  ;;  %v2953_v25 = vmin.f32 %v1130_v37, 16.0  ;;  %v555_v51 = vsub.f32 1.0, %v554_v19 }
 0x12a   :  { %v629_v21 = vmul.f32 %v628_v13, %v2542_v33  ;;  %v587_v1 = vmul.f32 %v586_v54, %v2529_v10  ;;  %v663_v43 = vmul.f32 3.8918573e-05, %v2544_v34  ;;  %v1683_v28 = vmul.f32 %v1651_v52, %v2590_v32 }
 0x12b   :  { %v1685_v59 = vmul.f32 %v1653_v47, %v2603_v57  ;;  %v1093_v30 = vadd.f32 0.00028619796, %v1092_v56  ;;  %v2961_v15 = vadd.f32 %v291_v41, %v2450_v11  ;;  %v2965_v5 = vmul.f32 %v2854_v6, %v3824_v8 }
 0x12c   :  { %v941_v55 = vadd.f32 1.1283791, %v940_v3  ;;  %v1019_v63 = vadd.f32 0.18741608, %v1018_v23  ;;  %v2967_v16 = vmin.f32 %v1170_v35, 16.0  ;;  %v2970_v37 = vmul.f32 %v861_v38, %v3825_v60 }
 0x12d   :  { %v1057_v13 = vadd.f32 0.05243302, %v1056_v46  ;;  %v1747_v54 = vpack.c.bf16 %v1685_v59, %v1683_v28  ;;  %v1132_v32 = vmul.f32 2.1237322e-06, %v2953_v25  ;;  %v2974_v57 = vmul.f32 %v901_v40, %v2642_v0 }
 0x12e   :  { %v980_v53 = vmul.f32 %v979_v2, %v2756_v44  ;;  %v556_v52 = vmul.f32 %v2935_v48, %v555_v51  ;;  %v630_v6 = vadd.f32 0.4994258, %v629_v21  ;;  %v1094_v56 = vmul.f32 %v1093_v30, %v2924_v4 }
 0x12f   :  { %1919 = vmatmul.bf16.vlgmr.msra.gmra.mxu3 %v1747_v54  ;;  %v2980_v19 = vmul.f32 0.70710677, %v2961_v15  ;;  %v588_v38 = vadd.f32 0.112945676, %v587_v1  ;;  %v664_v3 = vadd.f32 0.001143296, %v663_v43  ;;  %v2983_v23 = vmul.f32 %v941_v55, %v2673_v24 }
 0x130   :  { %v1020_v35 = vmul.f32 %v1019_v63, %v2783_v62  ;;  %v1172_v0 = vmul.f32 2.1237322e-06, %v2967_v16  ;;  %v631_v40 = vmul.f32 %v630_v6, %v2542_v33  ;;  %v1058_v41 = vmul.f32 %v1057_v13, %v2818_v27 }
 0x131   :  { %v1133_v2 = vadd.f32 0.00028619796, %v1132_v32  ;;  %vm559_vm0 = vweird.f32 %v2935_v48  ;;  %v589_v46 = vmul.f32 %v588_v38, %v2529_v10  ;;  %v557_v47 = vadd.f32 %v2935_v48, %v556_v52 }
 0x132   :  { %v2992_v51 = vadd.f32 1.0, %v631_v40  ;;  %v665_v24 = vmul.f32 %v664_v3, %v2544_v34  ;;  %v703_v21 = vmul.f32 3.8918573e-05, %v2562_v61  ;;  %v1095_v1 = vadd.f32 0.0036580483, %v1094_v56 }
 0x133   :  { %v1210_v43 = vmul.f32 %v2980_v19, %v2980_v19  ;;  %v564_v33 = vand.u32 2147483648, %v2906_v36  ;;  %v590_v28 = vadd.f32 0.4994258, %v589_v46  ;;  %v1173_v59 = vadd.f32 0.00028619796, %v1172_v0 }
 0x134   :  { %vm558_vm1 = vweird.f32 %v2906_v36  ;;  %v562_v30 = vand.u32 2147483647, %v2906_v36  ;;  %2209 = vrcp.f32 %v2992_v51  ;;  %v981_v8 = vadd.f32 1.1283791, %v980_v53 }
 0x135   :  { %v1059_v55 = vadd.f32 0.18741608, %v1058_v41  ;;  %v1134_v63 = vmul.f32 %v1133_v2, %v2953_v25  ;;  %vm3005_vm2 = vmor %vm558_vm1, %vm559_vm0  ;;  %v591_v13 = vmul.f32 %v590_v28, %v2529_v10  ;;  %v1021_v54 = vadd.f32 1.1283791, %v1020_v35 }
 0x136   :  { %v561_v32 = vsel %vm3005_vm2, %v2935_v48, %v557_v47  ;;  %v666_v36 = vadd.f32 0.014752088, %v665_v24  ;;  %v704_v52 = vadd.f32 0.001143296, %v703_v21  ;;  %v1096_v53 = vmul.f32 %v1095_v1, %v2924_v4  ;;  %v3829_v21 = vld [vmem:[#allocation28_spill] sm:$0xff] }
 0x137   :  { %v3014_v6 = vmin.f32 %v1210_v43, 16.0  ;;  %v565_v56 = vor.u32 1.1754944e-38, %v564_v33  ;;  %v3016_v38 = vadd.f32 1.0, %v591_v13  ;;  %v1174_v3 = vmul.f32 %v1173_v59, %v2967_v16 }
 0x138   :  { %vm563_vm3 = vcmp.eq.f32.partialorder %v562_v30, 8.507059e+37  ;;  %v667_v0 = vmul.f32 %v666_v36, %v2544_v34  ;;  %v705_v10 = vmul.f32 %v704_v52, %v2562_v61  ;;  %v1060_v35 = vmul.f32 %v1059_v55, %v2818_v27  ;;  %v3831_v30 = vld [vmem:[#allocation24_spill] sm:$0xff] }
 0x139   :  { %v1135_v40 = vadd.f32 0.0036580483, %v1134_v63  ;;  %v566_v48 = vsel %vm563_vm3, %v565_v56, %v561_v32  ;;  %2211 = vrcp.f32 %v3016_v38  ;;  %v3024_v2 = vmul.f32 %v981_v8, %v2708_v58 }
 0x13a   :  { %v2210_v41 = vpop.eup %2209  ;;  %v668_v46 = vadd.f32 0.112945676, %v667_v0  ;;  %v706_v47 = vadd.f32 0.014752088, %v705_v10  ;;  %v783_v24 = vmul.f32 3.8918573e-05, %v2617_v17  ;;  %v3028_v1 = vmul.f32 %v1021_v54, %v3829_v21  ;;  %v244_v21 = vpop.f32.mrf.mxu0 }
 0x13b   :  { %3828 = vst [vmem:[#allocation16_spill] sm:$0xff] %v3024_v2  ;;  %v1097_v43 = vadd.f32 0.05243302, %v1096_v53  ;;  %v1212_v33 = vmul.f32 2.1237322e-06, %v3014_v6  ;;  %v634_v28 = vmul.f32 %v2210_v41, %v2992_v51  ;;  %v567_v55 = vmul.f32 %v566_v48, %v3831_v30 }
 0x13c   :  { %3830 = vst [vmem:[#allocation18_spill] sm:$0xff] %v3028_v1  ;;  %v1175_v59 = vadd.f32 0.0036580483, %v1174_v3  ;;  %v669_v63 = vmul.f32 %v668_v46, %v2544_v34  ;;  %v707_v58 = vmul.f32 %v706_v47, %v2562_v61  ;;  %v1061_v8 = vadd.f32 1.1283791, %v1060_v35 }
 0x13d   :  { %v635_v60 = vsub.f32 1.0, %v634_v28  ;;  %v642_v13 = vand.u32 2147483647, %v2992_v51  ;;  %v644_v32 = vand.u32 2147483648, %v2992_v51  ;;  %v1136_v54 = vmul.f32 %v1135_v40, %v2953_v25  ;;  %v293_v40 = vpop.f32.mrf.mxu1 }
 0x13e   :  { %v670_v36 = vadd.f32 0.4994258, %v669_v63  ;;  %v708_v52 = vadd.f32 0.112945676, %v707_v58  ;;  %v784_v53 = vadd.f32 0.001143296, %v783_v24  ;;  %v1098_v3 = vmul.f32 %v1097_v43, %v2924_v4 }
 0x13f   :  { %v2212_v56 = vpop.eup %2211  ;;  %v1213_v0 = vadd.f32 0.00028619796, %v1212_v33  ;;  %v636_v10 = vmul.f32 %v2210_v41, %v635_v60  ;;  %vm639_vm4 = vweird.f32 %v2210_v41  ;;  %v1176_v48 = vmul.f32 %v1175_v59, %v2967_v16 }
 0x140   :  { %v2065_v46 = vclamps-f32 %v567_v55, 1.0  ;;  %v594_v35 = vmul.f32 %v2212_v56, %v3016_v38  ;;  %v671_v47 = vmul.f32 %v670_v36, %v2544_v34  ;;  %vm638_vm5 = vweird.f32 %v2992_v51 }
 0x141   :  { %v637_v28 = vadd.f32 %v2210_v41, %v636_v10  ;;  %vm643_vm6 = vcmp.eq.f32.partialorder %v642_v13, 8.507059e+37  ;;  %v709_v24 = vmul.f32 %v708_v52, %v2562_v61  ;;  %vm640_vm7 = vmor %vm638_vm5, %vm639_vm4  ;;  %v645_v43 = vor.u32 1.1754944e-38, %v644_v32  ;;  %v3832_v32 = vld [vmem:[#allocation31_spill] sm:$0xff] }
 0x142   :  { %v595_v33 = vsub.f32 1.0, %v594_v35  ;;  %v3044_v30 = vadd.f32 1.0, %v671_v47  ;;  %v785_v59 = vmul.f32 %v784_v53, %v2617_v17  ;;  %vm599_vm8 = vweird.f32 %v2212_v56  ;;  %v3833_v47 = vld [vmem:[#allocation36_spill] sm:$0xff] }
 0x143   :  { %v641_v55 = vsel %vm640_vm7, %v2210_v41, %v637_v28  ;;  %v3048_v63 = vadd.f32 %v244_v21, %v2448_v9  ;;  %v710_v34 = vadd.f32 0.4994258, %v709_v24  ;;  %v3052_v51 = vadd.f32 %v293_v40, %v2450_v11 }
 0x144   :  { %v646_v58 = vsel %vm643_vm6, %v645_v43, %v641_v55  ;;  %v596_v60 = vmul.f32 %v2212_v56, %v595_v33  ;;  %2213 = vrcp.f32 %v3044_v30  ;;  %v1214_v13 = vmul.f32 %v1213_v0, %v3014_v6 }
 0x145   :  { %v647_v36 = vmul.f32 %v646_v58, %v3832_v32  ;;  %vm598_vm9 = vweird.f32 %v3016_v38  ;;  %v604_v41 = vand.u32 2147483648, %v3016_v38  ;;  %v602_v53 = vand.u32 2147483647, %v3016_v38  ;;  %v247_v58 = vpop.f32.mrf.mxu0  ;;  %v296_v42 = vpop.f32.mrf.mxu1 }
 0x146   :  { %v597_v52 = vadd.f32 %v2212_v56, %v596_v60  ;;  %v711_v10 = vmul.f32 %v710_v34, %v2562_v61  ;;  %v786_v35 = vadd.f32 0.014752088, %v785_v59  ;;  %v3061_v21 = vmul.f32 %v1061_v8, %v3833_v47  ;;  %vm3064_vm10 = vmor %vm598_vm9, %vm599_vm8  ;;  %v3838_v60 = vld [vmem:[#allocation17_spill] sm:$0xff] }
 0x147   :  { %v1137_v28 = vadd.f32 0.05243302, %v1136_v54  ;;  %v2067_v40 = vclamps-f32 %v647_v36, 1.0  ;;  %v1654_v24 = vadd.f32 1.0, %v2065_v46  ;;  %v1177_v43 = vadd.f32 0.05243302, %v1176_v48 }
 0x148   :  { %3834 = vst [vmem:[#allocation28_spill] sm:$0xff] %v3061_v21  ;;  %v601_v33 = vsel %vm3064_vm10, %v2212_v56, %v597_v52  ;;  %v3071_v38 = vmul.f32 0.70710677, %v3048_v63  ;;  %v3074_v61 = vmul.f32 0.70710677, %v3052_v51  ;;  %v3077_v8 = vmul.f32 0.5, %v2881_v18 }
 0x149   :  { %v1215_v54 = vadd.f32 0.0036580483, %v1214_v13  ;;  %v1656_v46 = vadd.f32 1.0, %v2067_v40  ;;  %v605_v59 = vor.u32 1.1754944e-38, %v604_v41  ;;  %v1099_v34 = vadd.f32 0.18741608, %v1098_v3 }
 0x14a   :  { %3837 = vst [vmem:[#allocation24_spill] sm:$0xff] %v3077_v8  ;;  %v2214_v55 = vpop.eup %2213  ;;  %vm603_vm11 = vcmp.eq.f32.partialorder %v602_v53, 8.507059e+37  ;;  %v3079_v48 = vadd.f32 1.0, %v711_v10  ;;  %v787_v56 = vmul.f32 %v786_v35, %v2617_v17  ;;  %v1686_v32 = vmul.f32 %v1654_v24, %v3838_v60  ;;  %v3839_v36 = vld [vmem:[#allocation20_spill] sm:$0xff]  ;;  %v3840_v24 = vld [vmem:[#allocation26_spill] sm:$0xff]  ;;  %v3841_v60 = vld [vmem:[#allocation15_spill] sm:$0xff] }
 0x14b   :  { %v1688_v52 = vmul.f32 %v1656_v46, %v3839_v36  ;;  %v606_v47 = vsel %vm603_vm11, %v605_v59, %v601_v33  ;;  %v674_v0 = vmul.f32 %v2214_v55, %v3044_v30  ;;  %v1138_v18 = vmul.f32 %v1137_v28, %v2953_v25  ;;  %v3843_v8 = vld [vmem:[#allocation32_spill] sm:$0xff] }
 0x14c   :  { %v1178_v13 = vmul.f32 %v1177_v43, %v2967_v16  ;;  %v1250_v3 = vmul.f32 %v3071_v38, %v3071_v38  ;;  %v1290_v41 = vmul.f32 %v3074_v61, %v3074_v61  ;;  %v1216_v53 = vmul.f32 %v1215_v54, %v3014_v6 }
 0x14d   :  { %v1748_v10 = vpack.c.bf16 %v1688_v52, %v1686_v32  ;;  %v675_v35 = vsub.f32 1.0, %v674_v0  ;;  %v3093_v40 = vadd.f32 %v247_v58, %v2448_v9  ;;  %v607_v33 = vmul.f32 %v606_v47, %v3840_v24 }
 0x14e   :  { %v684_v46 = vand.u32 2147483648, %v3044_v30  ;;  %2215 = vrcp.f32 %v3079_v48  ;;  %v788_v28 = vadd.f32 0.112945676, %v787_v56  ;;  %vm679_vm12 = vweird.f32 %v2214_v55 }
 0x14f   :  { %1875 = vmatmul.bf16.gmra.mxu2 %v1748_v10  ;;  %v676_v43 = vmul.f32 %v2214_v55, %v675_v35  ;;  %v682_v59 = vand.u32 2147483647, %v3044_v30  ;;  %v743_v36 = vmul.f32 3.8918573e-05, %v3841_v60  ;;  %v1100_v54 = vmul.f32 %v1099_v34, %v2924_v4 }
 0x150   :  { %v3102_v32 = vmul.f32 0.5, %v2896_v26  ;;  %v3104_v58 = vmin.f32 %v1250_v3, 16.0  ;;  %v3106_v52 = vmin.f32 %v1290_v41, 16.0  ;;  %v1139_v47 = vadd.f32 0.18741608, %v1138_v18 }
 0x151   :  { %v677_v0 = vadd.f32 %v2214_v55, %v676_v43  ;;  %vm678_vm13 = vweird.f32 %v3044_v30  ;;  %v3110_v56 = vmul.f32 0.70710677, %v3093_v40  ;;  %v1179_v10 = vadd.f32 0.18741608, %v1178_v13 }
 0x152   :  { %3842 = vst [vmem:[#allocation31_spill] sm:$0xff] %v3102_v32  ;;  %v2066_v35 = vclamps-f32 %v607_v33, 1.0  ;;  %vm680_vm14 = vmor %vm678_vm13, %vm679_vm12  ;;  %v685_v24 = vor.u32 1.1754944e-38, %v684_v46  ;;  %v789_v34 = vmul.f32 %v788_v28, %v2617_v17  ;;  %v1217_v26 = vadd.f32 0.05243302, %v1216_v53 }
 0x153   :  { %v681_v32 = vsel %vm680_vm14, %v2214_v55, %v677_v0  ;;  %vm683_vm15 = vcmp.eq.f32.partialorder %v682_v59, 8.507059e+37  ;;  %v744_v3 = vadd.f32 0.001143296, %v743_v36  ;;  %v1252_v18 = vmul.f32 2.1237322e-06, %v3104_v58 }
 0x154   :  { %v2216_v41 = vpop.eup %2215  ;;  %v686_v21 = vsel %vm683_vm15, %v685_v24, %v681_v32  ;;  %v1292_v30 = vmul.f32 2.1237322e-06, %v3106_v52  ;;  %v790_v43 = vadd.f32 0.4994258, %v789_v34  ;;  %v1330_v13 = vmul.f32 %v3110_v56, %v3110_v56 }
 0x155   :  { %v687_v39 = vmul.f32 %v686_v21, %v3843_v8  ;;  %v3119_v33 = vadd.f32 %v296_v42, %v2450_v11  ;;  %v714_v53 = vmul.f32 %v2216_v41, %v3079_v48  ;;  %v1101_v55 = vadd.f32 1.1283791, %v1100_v54 }
 0x156   :  { %v1140_v46 = vmul.f32 %v1139_v47, %v2953_v25  ;;  %v1655_v28 = vadd.f32 1.0, %v2066_v35  ;;  %v791_v59 = vmul.f32 %v790_v43, %v2617_v17  ;;  %v1180_v36 = vmul.f32 %v1179_v10, %v2967_v16  ;;  %v3844_v17 = vld [vmem:[#allocation19_spill] sm:$0xff]  ;;  %v3845_v10 = vld [vmem:[#allocation21_spill] sm:$0xff] }
 0x157   :  { %v2068_v32 = vclamps-f32 %v687_v39, 1.0  ;;  %v715_v0 = vsub.f32 1.0, %v714_v53  ;;  %v745_v21 = vmul.f32 %v744_v3, %v3841_v60  ;;  %v1218_v8 = vmul.f32 %v1217_v26, %v3014_v6 }
 0x158   :  { %v1253_v24 = vadd.f32 0.00028619796, %v1252_v18  ;;  %v1293_v34 = vadd.f32 0.00028619796, %v1292_v30  ;;  %v3127_v42 = vadd.f32 1.0, %v791_v59  ;;  %v3129_v2 = vmin.f32 %v1330_v13, 16.0 }
 0x159   :  { %v1657_v1 = vadd.f32 1.0, %v2068_v32  ;;  %v3132_v54 = vmul.f32 0.70710677, %v3119_v33  ;;  %v716_v47 = vmul.f32 %v2216_v41, %v715_v0  ;;  %v1687_v35 = vmul.f32 %v1655_v28, %v3844_v17  ;;  %v3850_v0 = vld [vmem:[#allocation34_spill] sm:$0xff] }
 0x15a   :  { %vm719_vm0 = vweird.f32 %v2216_v41  ;;  %v722_v39 = vand.u32 2147483647, %v3079_v48  ;;  %2217 = vrcp.f32 %v3127_v42  ;;  %v724_v18 = vand.u32 2147483648, %v3079_v48 }
 0x15b   :  { %v1689_v26 = vmul.f32 %v1657_v1, %v3845_v10  ;;  %v717_v3 = vadd.f32 %v2216_v41, %v716_v47  ;;  %v746_v30 = vadd.f32 0.014752088, %v745_v21  ;;  %v1141_v43 = vadd.f32 1.1283791, %v1140_v46 }
 0x15c   :  { %v3140_v13 = vmul.f32 0.5, %v2912_v29  ;;  %v3143_v53 = vmul.f32 0.5, %v2961_v15  ;;  %vm718_vm1 = vweird.f32 %v3079_v48  ;;  %v3147_v28 = vmul.f32 %v1101_v55, %v2893_v31 }
 0x15d   :  { %v1749_v59 = vpack.c.bf16 %v1689_v26, %v1687_v35  ;;  %v1254_v32 = vmul.f32 %v1253_v24, %v3104_v58  ;;  %v1294_v1 = vmul.f32 %v1293_v34, %v3106_v52  ;;  %vm3152_vm2 = vmor %vm718_vm1, %vm719_vm0  ;;  %v1181_v29 = vadd.f32 1.1283791, %v1180_v36 }
 0x15e   :  { %3846 = vst [vmem:[#allocation36_spill] sm:$0xff] %v3140_v13  ;;  %v1219_v46 = vadd.f32 0.18741608, %v1218_v8  ;;  %v1370_v15 = vmul.f32 %v3132_v54, %v3132_v54  ;;  %v721_v48 = vsel %vm3152_vm2, %v2216_v41, %v717_v3  ;;  %v1332_v31 = vmul.f32 2.1237322e-06, %v3129_v2 }
 0x15f   :  { %3847 = vst [vmem:[#allocation17_spill] sm:$0xff] %v3143_v53  ;;  %1924 = vmatmul.bf16.gmra.mxu3 %v1749_v59  ;;  %vm723_vm3 = vcmp.eq.f32.partialorder %v722_v39, 8.507059e+37  ;;  %v725_v55 = vor.u32 1.1754944e-38, %v724_v18  ;;  %v747_v21 = vmul.f32 %v746_v30, %v3841_v60  ;;  %v3163_v34 = vmul.f32 %v1141_v43, %v2918_v7 }
 0x160   :  { %v2218_v24 = vpop.eup %2217  ;;  %v823_v36 = vmul.f32 3.8918573e-05, %v2636_v12  ;;  %v863_v8 = vmul.f32 3.8918573e-05, %v2657_v45  ;;  %v943_v47 = vmul.f32 3.8918573e-05, %v2714_v20  ;;  %v1220_v39 = vmul.f32 %v1219_v46, %v3014_v6 }
 0x161   :  { %v1255_v17 = vadd.f32 0.0036580483, %v1254_v32  ;;  %v1295_v35 = vadd.f32 0.0036580483, %v1294_v1  ;;  %v726_v41 = vsel %vm723_vm3, %v725_v55, %v721_v48  ;;  %v794_v10 = vmul.f32 %v2218_v24, %v3127_v42 }
 0x162   :  { %v3170_v26 = vmin.f32 %v1370_v15, 16.0  ;;  %v748_v3 = vadd.f32 0.112945676, %v747_v21  ;;  %v824_v18 = vadd.f32 0.001143296, %v823_v36  ;;  %v804_v43 = vand.u32 2147483648, %v3127_v42 }
 0x163   :  { %v1333_v30 = vadd.f32 0.00028619796, %v1332_v31  ;;  %v795_v7 = vsub.f32 1.0, %v794_v10  ;;  %v864_v59 = vadd.f32 0.001143296, %v863_v8  ;;  %v727_v53 = vmul.f32 %v726_v41, %v3850_v0 }
 0x164   :  { %v749_v13 = vmul.f32 %v748_v3, %v3841_v60  ;;  %v825_v32 = vmul.f32 %v824_v18, %v2636_v12  ;;  %v944_v1 = vadd.f32 0.001143296, %v943_v47  ;;  %vm799_vm4 = vweird.f32 %v2218_v24 }
 0x165   :  { %v796_v48 = vmul.f32 %v2218_v24, %v795_v7  ;;  %v802_v46 = vand.u32 2147483647, %v3127_v42  ;;  %v865_v15 = vmul.f32 %v864_v59, %v2657_v45  ;;  %v3179_v55 = vmul.f32 %v1181_v29, %v2928_v22 }
 0x166   :  { %v1372_v31 = vmul.f32 2.1237322e-06, %v3170_v26  ;;  %v750_v21 = vadd.f32 0.4994258, %v749_v13  ;;  %v826_v36 = vadd.f32 0.014752088, %v825_v32  ;;  %vm798_vm5 = vweird.f32 %v3127_v42 }
 0x167   :  { %v797_v8 = vadd.f32 %v2218_v24, %v796_v48  ;;  %v866_v41 = vadd.f32 0.014752088, %v865_v15  ;;  %v945_v10 = vmul.f32 %v944_v1, %v2714_v20  ;;  %v2069_v47 = vclamps-f32 %v727_v53, 1.0  ;;  %vm800_vm6 = vmor %vm798_vm5, %vm799_vm4 }
 0x168   :  { %v805_v3 = vor.u32 1.1754944e-38, %v804_v43  ;;  %v751_v18 = vmul.f32 %v750_v21, %v3841_v60  ;;  %v827_v7 = vmul.f32 %v826_v36, %v2636_v12  ;;  %v1221_v59 = vadd.f32 1.1283791, %v1220_v39 }
 0x169   :  { %v801_v22 = vsel %vm800_vm6, %v2218_v24, %v797_v8  ;;  %vm803_vm7 = vcmp.eq.f32.partialorder %v802_v46, 8.507059e+37  ;;  %v867_v29 = vmul.f32 %v866_v41, %v2657_v45  ;;  %v1334_v13 = vmul.f32 %v1333_v30, %v3129_v2 }
 0x16a   :  { %v806_v0 = vsel %vm803_vm7, %v805_v3, %v801_v22  ;;  %v3188_v32 = vadd.f32 1.0, %v751_v18  ;;  %v828_v42 = vadd.f32 0.112945676, %v827_v7  ;;  %v1256_v1 = vmul.f32 %v1255_v17, %v3104_v58  ;;  %v3852_v18 = vld [vmem:[#allocation22_spill] sm:$0xff]  ;;  %v3853_v22 = vld [vmem:[#allocation25_spill] sm:$0xff] }
 0x16b   :  { %v807_v53 = vmul.f32 %v806_v0, %v2939_v14  ;;  %v868_v43 = vadd.f32 0.112945676, %v867_v29  ;;  %v946_v48 = vadd.f32 0.014752088, %v945_v10  ;;  %v1296_v60 = vmul.f32 %v1295_v35, %v3106_v52 }
 0x16c   :  { %v1373_v15 = vadd.f32 0.00028619796, %v1372_v31  ;;  %v1658_v39 = vadd.f32 1.0, %v2069_v47  ;;  %2219 = vrcp.f32 %v3188_v32  ;;  %v3195_v24 = vmul.f32 %v1221_v59, %v2980_v19  ;;  %v249_v59 = vpop.f32.mrf.mxu0 }
 0x16d   :  { %v2071_v30 = vclamps-f32 %v807_v53, 1.0  ;;  %v829_v46 = vmul.f32 %v828_v42, %v2636_v12  ;;  %v869_v21 = vmul.f32 %v868_v43, %v2657_v45  ;;  %v3200_v17 = vmul.f32 0.5, %v3048_v63  ;;  %v298_v63 = vpop.f32.mrf.mxu1 }
 0x16e   :  { %v3203_v14 = vmul.f32 0.5, %v3052_v51  ;;  %v1335_v36 = vadd.f32 0.0036580483, %v1334_v13  ;;  %v903_v35 = vmul.f32 3.8918573e-05, %v2677_v49  ;;  %v947_v19 = vmul.f32 %v946_v48, %v2714_v20 }
 0x16f   :  { %v1660_v31 = vadd.f32 1.0, %v2071_v30  ;;  %v830_v8 = vadd.f32 0.4994258, %v829_v46  ;;  %v870_v41 = vadd.f32 0.4994258, %v869_v21  ;;  %v1374_v3 = vmul.f32 %v1373_v15, %v3170_v26 }
 0x170   :  { %3851 = vst [vmem:[#allocation20_spill] sm:$0xff] %v3203_v14  ;;  %v1257_v10 = vadd.f32 0.05243302, %v1256_v1  ;;  %v1297_v47 = vadd.f32 0.05243302, %v1296_v60  ;;  %v1690_v7 = vmul.f32 %v1658_v39, %v3852_v18  ;;  %v3212_v13 = vadd.f32 %v249_v59, %v2448_v9 }
 0x171   :  { %v1692_v29 = vmul.f32 %v1660_v31, %v3853_v22  ;;  %v831_v51 = vmul.f32 %v830_v8, %v2636_v12  ;;  %v3215_v0 = vadd.f32 %v298_v63, %v2450_v11  ;;  %v3218_v1 = vmul.f32 0.5, %v3093_v40 }
 0x172   :  { %v2220_v42 = vpop.eup %2219  ;;  %v1336_v53 = vmul.f32 %v1335_v36, %v3129_v2  ;;  %v871_v43 = vmul.f32 %v870_v41, %v2657_v45  ;;  %v904_v48 = vadd.f32 0.001143296, %v903_v35  ;;  %v948_v12 = vadd.f32 0.112945676, %v947_v19 }
 0x173   :  { %3854 = vst [vmem:[#allocation26_spill] sm:$0xff] %v3218_v1  ;;  %v1750_v60 = vpack.c.bf16 %v1692_v29, %v1690_v7  ;;  %v754_v15 = vmul.f32 %v2220_v42, %v3188_v32  ;;  %v3223_v39 = vadd.f32 1.0, %v831_v51  ;;  %v1258_v30 = vmul.f32 %v1257_v10, %v3104_v58 }
 0x174   :  { %v1298_v46 = vmul.f32 %v1297_v47, %v3106_v52  ;;  %v1375_v21 = vadd.f32 0.0036580483, %v1374_v3  ;;  %v3228_v31 = vmul.f32 0.70710677, %v3212_v13  ;;  %v3232_v45 = vmul.f32 0.70710677, %v3215_v0 }
 0x175   :  { %1880 = vmatmul.bf16.gmra.mxu2 %v1750_v60  ;;  %v755_v40 = vsub.f32 1.0, %v754_v15  ;;  %2221 = vrcp.f32 %v3223_v39  ;;  %v983_v36 = vmul.f32 3.8918573e-05, %v2756_v44  ;;  %v1337_v35 = vadd.f32 0.05243302, %v1336_v53 }
 0x176   :  { %3855 = vst [vmem:[#allocation15_spill] sm:$0xff] %v3232_v45  ;;  %v764_v8 = vand.u32 2147483648, %v3188_v32  ;;  %v3236_v41 = vadd.f32 1.0, %v871_v43  ;;  %v905_v19 = vmul.f32 %v904_v48, %v2677_v49  ;;  %vm759_vm8 = vweird.f32 %v2220_v42  ;;  %v252_v48 = vpop.f32.mrf.mxu0 }
 0x177   :  { %v756_v10 = vmul.f32 %v2220_v42, %v755_v40  ;;  %v1410_v47 = vmul.f32 %v3228_v31, %v3228_v31  ;;  %v949_v3 = vmul.f32 %v948_v12, %v2714_v20  ;;  %v1259_v18 = vadd.f32 0.18741608, %v1258_v30 }
 0x178   :  { %v1376_v7 = vmul.f32 %v1375_v21, %v3170_v26  ;;  %v762_v59 = vand.u32 2147483647, %v3188_v32  ;;  %2223 = vrcp.f32 %v3236_v41  ;;  %vm758_vm9 = vweird.f32 %v3188_v32 }
 0x179   :  { %v757_v63 = vadd.f32 %v2220_v42, %v756_v10  ;;  %v1450_v22 = vmul.f32 %v3232_v45, %v3232_v45  ;;  %v984_v29 = vadd.f32 0.001143296, %v983_v36  ;;  %v1299_v51 = vadd.f32 0.18741608, %v1298_v46  ;;  %vm760_vm10 = vmor %vm758_vm9, %vm759_vm8 }
 0x17a   :  { %v1338_v53 = vmul.f32 %v1337_v35, %v3129_v2  ;;  %v3250_v43 = vmul.f32 0.5, %v3119_v33  ;;  %v906_v60 = vadd.f32 0.014752088, %v905_v19  ;;  %v765_v30 = vor.u32 1.1754944e-38, %v764_v8 }
 0x17b   :  { %v2222_v15 = vpop.eup %2221  ;;  %v761_v12 = vsel %vm760_vm10, %v2220_v42, %v757_v63  ;;  %v3252_v21 = vmin.f32 %v1410_v47, 16.0  ;;  %v950_v40 = vadd.f32 0.4994258, %v949_v3  ;;  %v1260_v32 = vmul.f32 %v1259_v18, %v3104_v58 }
 0x17c   :  { %3856 = vst [vmem:[#allocation32_spill] sm:$0xff] %v3250_v43  ;;  %v1377_v10 = vadd.f32 0.05243302, %v1376_v7  ;;  %vm763_vm11 = vcmp.eq.f32.partialorder %v762_v59, 8.507059e+37  ;;  %v834_v46 = vmul.f32 %v2222_v15, %v3223_v39  ;;  %v3256_v35 = vmin.f32 %v1450_v22, 16.0 }
 0x17d   :  { %v766_v36 = vsel %vm763_vm11, %v765_v30, %v761_v12  ;;  %v3259_v33 = vadd.f32 %v252_v48, %v2448_v9  ;;  %v985_v19 = vmul.f32 %v984_v29, %v2756_v44  ;;  %v3265_v42 = vmul.f32 %v1299_v51, %v3106_v52  ;;  %v301_v48 = vpop.f32.mrf.mxu1 }
 0x17e   :  { %v3262_v43 = vpop.eup %2223  ;;  %v1339_v8 = vadd.f32 0.18741608, %v1338_v53  ;;  %v835_v47 = vsub.f32 1.0, %v834_v46  ;;  %v907_v3 = vmul.f32 %v906_v60, %v2677_v49  ;;  %v842_v18 = vand.u32 2147483647, %v3223_v39 }
 0x17f   :  { %3857 = vst [vmem:[#allocation19_spill] sm:$0xff] %v3259_v33  ;;  %v844_v7 = vand.u32 2147483648, %v3223_v39  ;;  %v1412_v59 = vmul.f32 2.1237322e-06, %v3252_v21  ;;  %v951_v63 = vmul.f32 %v950_v40, %v2714_v20  ;;  %v767_v22 = vmul.f32 %v766_v36, %v2834_v50 }
 0x180   :  { %v836_v29 = vmul.f32 %v2222_v15, %v835_v47  ;;  %vm839_vm12 = vweird.f32 %v2222_v15  ;;  %v874_v51 = vmul.f32 %v3262_v43, %v3236_v41  ;;  %v1378_v53 = vmul.f32 %v1377_v10, %v3170_v26 }
 0x181   :  { %v1452_v60 = vmul.f32 2.1237322e-06, %v3256_v35  ;;  %v3278_v12 = vmul.f32 0.70710677, %v3259_v33  ;;  %v986_v30 = vadd.f32 0.014752088, %v985_v19  ;;  %vm838_vm13 = vweird.f32 %v3223_v39 }
 0x182   :  { %v837_v46 = vadd.f32 %v2222_v15, %v836_v29  ;;  %v875_v20 = vsub.f32 1.0, %v874_v51  ;;  %v908_v40 = vadd.f32 0.112945676, %v907_v3  ;;  %vm840_vm14 = vmor %vm838_vm13, %vm839_vm12  ;;  %vm843_vm15 = vcmp.eq.f32.partialorder %v842_v18, 8.507059e+37 }
 0x183   :  { %v845_v50 = vor.u32 1.1754944e-38, %v844_v7  ;;  %v1413_v36 = vadd.f32 0.00028619796, %v1412_v59  ;;  %v3282_v47 = vadd.f32 %v301_v48, %v2450_v11  ;;  %v2070_v1 = vclamps-f32 %v767_v22, 1.0 }
 0x184   :  { %v841_v10 = vsel %vm840_vm14, %v2222_v15, %v837_v46  ;;  %v876_v14 = vmul.f32 %v3262_v43, %v875_v20  ;;  %v3285_v45 = vadd.f32 1.0, %v951_v63  ;;  %v1453_v19 = vadd.f32 0.00028619796, %v1452_v60 }
 0x185   :  { %3858 = vst [vmem:[#allocation21_spill] sm:$0xff] %v3282_v47  ;;  %v846_v33 = vsel %vm843_vm15, %v845_v50, %v841_v10  ;;  %v1490_v39 = vmul.f32 %v3278_v12, %v3278_v12  ;;  %vm879_vm0 = vweird.f32 %v3262_v43  ;;  %v884_v7 = vand.u32 2147483648, %v3236_v41 }
 0x186   :  { %v847_v3 = vmul.f32 %v846_v33, %v2965_v5  ;;  %v877_v18 = vadd.f32 %v3262_v43, %v876_v14  ;;  %2225 = vrcp.f32 %v3285_v45  ;;  %v1414_v15 = vmul.f32 %v1413_v36, %v3252_v21 }
 0x187   :  { %v3296_v59 = vmul.f32 0.70710677, %v3282_v47  ;;  %vm878_vm1 = vweird.f32 %v3236_v41  ;;  %v882_v63 = vand.u32 2147483647, %v3236_v41  ;;  %v1261_v22 = vadd.f32 1.1283791, %v1260_v32 }
 0x188   :  { %v2072_v29 = vclamps-f32 %v847_v3, 1.0  ;;  %v1659_v48 = vadd.f32 1.0, %v2070_v1  ;;  %vm3300_vm2 = vmor %vm878_vm1, %vm879_vm0  ;;  %v909_v14 = vmul.f32 %v908_v40, %v2677_v49  ;;  %v1340_v33 = vmul.f32 %v1339_v8, %v3129_v2  ;;  %v3861_v40 = vld [vmem:[#allocation23_spill] sm:$0xff] }
 0x189   :  { %v1379_v51 = vadd.f32 0.18741608, %v1378_v53  ;;  %v1454_v60 = vmul.f32 %v1453_v19, %v3256_v35  ;;  %v881_v46 = vsel %vm3300_vm2, %v3262_v43, %v877_v18  ;;  %v3310_v41 = vmin.f32 %v1490_v39, 16.0  ;;  %v3862_v19 = vld [vmem:[#allocation27_spill] sm:$0xff] }
 0x18a   :  { %v1661_v20 = vadd.f32 1.0, %v2072_v29  ;;  %v885_v32 = vor.u32 1.1754944e-38, %v884_v7  ;;  %v1023_v1 = vmul.f32 3.8918573e-05, %v2783_v62  ;;  %v1415_v50 = vadd.f32 0.0036580483, %v1414_v15 }
 0x18b   :  { %v1530_v36 = vmul.f32 %v3296_v59, %v3296_v59  ;;  %vm883_vm3 = vcmp.eq.f32.partialorder %v882_v63, 8.507059e+37  ;;  %v987_v8 = vmul.f32 %v986_v30, %v2756_v44  ;;  %v1691_v10 = vmul.f32 %v1659_v48, %v3861_v40 }
 0x18c   :  { %v2226_v53 = vpop.eup %2225  ;;  %v1693_v3 = vmul.f32 %v1661_v20, %v3862_v19  ;;  %v886_v5 = vsel %vm883_vm3, %v885_v32, %v881_v46  ;;  %v910_v43 = vadd.f32 0.4994258, %v909_v14  ;;  %v3319_v39 = vmul.f32 %v1261_v22, %v3071_v38 }
 0x18d   :  { %v1301_v18 = vadd.f32 1.1283791, %v3265_v42  ;;  %v1455_v7 = vadd.f32 0.0036580483, %v1454_v60  ;;  %v954_v15 = vmul.f32 %v2226_v53, %v3285_v45  ;;  %v1341_v29 = vadd.f32 1.1283791, %v1340_v33 }
 0x18e   :  { %v1380_v63 = vmul.f32 %v1379_v51, %v3170_v26  ;;  %v1751_v47 = vpack.c.bf16 %v1693_v3, %v1691_v10  ;;  %v1492_v30 = vmul.f32 2.1237322e-06, %v3310_v41  ;;  %v1416_v48 = vmul.f32 %v1415_v50, %v3252_v21 }
 0x18f   :  { %v3326_v40 = vmin.f32 %v1530_v36, 16.0  ;;  %v887_v14 = vmul.f32 %v886_v5, %v2970_v37  ;;  %v955_v46 = vsub.f32 1.0, %v954_v15  ;;  %v964_v38 = vand.u32 2147483648, %v3285_v45 }
 0x190   :  { %1929 = vmatmul.bf16.gmra.mxu3 %v1751_v47  ;;  %v911_v42 = vmul.f32 %v910_v43, %v2677_v49  ;;  %v988_v22 = vadd.f32 0.112945676, %v987_v8  ;;  %v1024_v60 = vadd.f32 0.001143296, %v1023_v1  ;;  %v1456_v33 = vmul.f32 %v1455_v7, %v3256_v35 }
 0x191   :  { %v956_v51 = vmul.f32 %v2226_v53, %v955_v46  ;;  %vm959_vm4 = vweird.f32 %v2226_v53  ;;  %v962_v20 = vand.u32 2147483647, %v3285_v45  ;;  %v1103_v47 = vmul.f32 3.8918573e-05, %v2924_v4 }
 0x192   :  { %v3333_v32 = vadd.f32 1.0, %v911_v42  ;;  %v989_v50 = vmul.f32 %v988_v22, %v2756_v44  ;;  %v1025_v37 = vmul.f32 %v1024_v60, %v2783_v62  ;;  %v1493_v36 = vadd.f32 0.00028619796, %v1492_v30 }
 0x193   :  { %v1532_v10 = vmul.f32 2.1237322e-06, %v3326_v40  ;;  %v957_v49 = vadd.f32 %v2226_v53, %v956_v51  ;;  %vm958_vm5 = vweird.f32 %v3285_v45  ;;  %v1417_v1 = vadd.f32 0.05243302, %v1416_v48 }
 0x194   :  { %v2073_v8 = vclamps-f32 %v887_v14, 1.0  ;;  %vm960_vm6 = vmor %vm958_vm5, %vm959_vm4  ;;  %v965_v19 = vor.u32 1.1754944e-38, %v964_v38  ;;  %2227 = vrcp.f32 %v3333_v32  ;;  %v1381_v3 = vadd.f32 1.1283791, %v1380_v63 }
 0x195   :  { %v961_v5 = vsel %vm960_vm6, %v2226_v53, %v957_v49  ;;  %vm963_vm7 = vcmp.eq.f32.partialorder %v962_v20, 8.507059e+37  ;;  %v990_v43 = vadd.f32 0.4994258, %v989_v50  ;;  %v3342_v7 = vmul.f32 %v1301_v18, %v3074_v61 }
 0x196   :  { %v966_v15 = vsel %vm963_vm7, %v965_v19, %v961_v5  ;;  %v1026_v30 = vadd.f32 0.014752088, %v1025_v37  ;;  %v1104_v46 = vadd.f32 0.001143296, %v1103_v47  ;;  %v1457_v42 = vadd.f32 0.05243302, %v1456_v33 }
 0x197   :  { %v1494_v22 = vmul.f32 %v1493_v36, %v3310_v41  ;;  %v967_v45 = vmul.f32 %v966_v15, %v2983_v23  ;;  %v991_v48 = vmul.f32 %v990_v43, %v2756_v44  ;;  %v1418_v14 = vmul.f32 %v1417_v1, %v3252_v21  ;;  %v3864_v1 = vld [vmem:[#allocation33_spill] sm:$0xff]  ;;  %v303_v15 = vpop.f32.mrf.mxu1 }
 0x198   :  { %v1533_v38 = vadd.f32 0.00028619796, %v1532_v10  ;;  %v1662_v63 = vadd.f32 1.0, %v2073_v8  ;;  %v1027_v53 = vmul.f32 %v1026_v30, %v2783_v62  ;;  %v3350_v60 = vmul.f32 %v1341_v29, %v3110_v56 }
 0x199   :  { %v3353_v61 = vmul.f32 %v1381_v3, %v3132_v54  ;;  %v2075_v18 = vclamps-f32 %v967_v45, 1.0  ;;  %v3355_v33 = vadd.f32 1.0, %v991_v48  ;;  %v3358_v23 = vmul.f32 0.5, %v3212_v13  ;;  %v254_v54 = vpop.f32.mrf.mxu0  ;;  %v3863_v13 = vld [vmem:[#allocation29_spill] sm:$0xff] }
 0x19a   :  { %v2228_v51 = vpop.eup %2227  ;;  %v3361_v44 = vmul.f32 0.5, %v3215_v0  ;;  %v1028_v20 = vadd.f32 0.112945676, %v1027_v53  ;;  %v1105_v50 = vmul.f32 %v1104_v46, %v2924_v4  ;;  %v1458_v37 = vmul.f32 %v1457_v42, %v3256_v35 }
 0x19b   :  { %v1664_v56 = vadd.f32 1.0, %v2075_v18  ;;  %v914_v29 = vmul.f32 %v2228_v51, %v3333_v32  ;;  %2229 = vrcp.f32 %v3355_v33  ;;  %v1419_v47 = vadd.f32 0.18741608, %v1418_v14 }
 0x19c   :  { %v1495_v36 = vadd.f32 0.0036580483, %v1494_v22  ;;  %v1534_v10 = vmul.f32 %v1533_v38, %v3326_v40  ;;  %v1694_v49 = vmul.f32 %v1662_v63, %v3863_v13  ;;  %v922_v19 = vand.u32 2147483647, %v3333_v32 }
 0x19d   :  { %v1696_v0 = vmul.f32 %v1664_v56, %v3864_v1  ;;  %v915_v8 = vsub.f32 1.0, %v914_v29  ;;  %v1029_v3 = vmul.f32 %v1028_v20, %v2783_v62  ;;  %v924_v5 = vand.u32 2147483648, %v3333_v32 }
 0x19e   :  { %v3374_v43 = vadd.f32 %v254_v54, %v2448_v9  ;;  %v1106_v30 = vadd.f32 0.014752088, %v1105_v50  ;;  %v1063_v46 = vmul.f32 3.8918573e-05, %v2818_v27  ;;  %vm919_vm8 = vweird.f32 %v2228_v51 }
 0x19f   :  { %v1752_v42 = vpack.c.bf16 %v1696_v0, %v1694_v49  ;;  %v916_v22 = vmul.f32 %v2228_v51, %v915_v8  ;;  %v1030_v45 = vadd.f32 0.4994258, %v1029_v3  ;;  %v1459_v48 = vadd.f32 0.18741608, %v1458_v37 }
 0x1a0   :  { %v1496_v14 = vmul.f32 %v1495_v36, %v3310_v41  ;;  %v1535_v38 = vadd.f32 0.0036580483, %v1534_v10  ;;  %v1107_v63 = vmul.f32 %v1106_v30, %v2924_v4  ;;  %vm918_vm9 = vweird.f32 %v3333_v32 }
 0x1a1   :  { %v2230_v53 = vpop.eup %2229  ;;  %1885 = vmatmul.bf16.gmra.mxu2 %v1752_v42  ;;  %v917_v18 = vadd.f32 %v2228_v51, %v916_v22  ;;  %v3381_v9 = vadd.f32 %v303_v15, %v2450_v11  ;;  %v1031_v20 = vmul.f32 %v1030_v45, %v2783_v62  ;;  %vm920_vm10 = vmor %vm918_vm9, %vm919_vm8  ;;  %v925_v50 = vor.u32 1.1754944e-38, %v924_v5 }
 0x1a2   :  { %v994_v56 = vmul.f32 %v2230_v53, %v3355_v33  ;;  %v3386_v37 = vmul.f32 0.70710677, %v3374_v43  ;;  %v1108_v29 = vadd.f32 0.112945676, %v1107_v63  ;;  %vm923_vm11 = vcmp.eq.f32.partialorder %v922_v19, 8.507059e+37 }
 0x1a3   :  { %v921_v54 = vsel %vm920_vm10, %v2228_v51, %v917_v18  ;;  %v3388_v36 = vadd.f32 1.0, %v1031_v20  ;;  %v1064_v10 = vadd.f32 0.001143296, %v1063_v46  ;;  %v1420_v32 = vmul.f32 %v1419_v47, %v3252_v21 }
 0x1a4   :  { %v926_v13 = vsel %vm923_vm11, %v925_v50, %v921_v54  ;;  %v995_v11 = vsub.f32 1.0, %v994_v56  ;;  %v1109_v49 = vmul.f32 %v1108_v29, %v2924_v4  ;;  %v1002_v62 = vand.u32 2147483647, %v3355_v33 }
 0x1a5   :  { %v1004_v1 = vand.u32 2147483648, %v3355_v33  ;;  %v3395_v0 = vmul.f32 0.70710677, %v3381_v9  ;;  %2231 = vrcp.f32 %v3388_v36  ;;  %v927_v51 = vmul.f32 %v926_v13, %v2974_v57 }
 0x1a6   :  { %v996_v8 = vmul.f32 %v2230_v53, %v995_v11  ;;  %vm999_vm12 = vweird.f32 %v2230_v53  ;;  %v1570_v47 = vmul.f32 %v3386_v37, %v3386_v37  ;;  %v1460_v19 = vmul.f32 %v1459_v48, %v3256_v35 }
 0x1a7   :  { %v1110_v3 = vadd.f32 0.4994258, %v1109_v49  ;;  %v1065_v5 = vmul.f32 %v1064_v10, %v2818_v27  ;;  %v1143_v15 = vmul.f32 3.8918573e-05, %v2953_v25  ;;  %v1497_v30 = vadd.f32 0.05243302, %v1496_v14 }
 0x1a8   :  { %v1536_v46 = vmul.f32 %v1535_v38, %v3326_v40  ;;  %v997_v42 = vadd.f32 %v2230_v53, %v996_v8  ;;  %vm998_vm13 = vweird.f32 %v3355_v33  ;;  %v1005_v57 = vor.u32 1.1754944e-38, %v1004_v1  ;;  %v3865_v10 = vld [vmem:[#allocation16_spill] sm:$0xff] }
 0x1a9   :  { %vm1000_vm14 = vmor %vm998_vm13, %vm999_vm12  ;;  %v1610_v22 = vmul.f32 %v3395_v0, %v3395_v0  ;;  %v1111_v45 = vmul.f32 %v1110_v3, %v2924_v4  ;;  %v1183_v48 = vmul.f32 3.8918573e-05, %v2967_v16  ;;  %v2074_v63 = vclamps-f32 %v927_v51, 1.0 }
 0x1aa   :  { %v1001_v18 = vsel %vm1000_vm14, %v2230_v53, %v997_v42  ;;  %vm1003_vm15 = vcmp.eq.f32.partialorder %v1002_v62, 8.507059e+37  ;;  %v3410_v20 = vmin.f32 %v1570_v47, 16.0  ;;  %v1066_v56 = vadd.f32 0.014752088, %v1065_v5 }
 0x1ab   :  { %v2232_v14 = vpop.eup %2231  ;;  %v1006_v50 = vsel %vm1003_vm15, %v1005_v57, %v1001_v18  ;;  %v3412_v38 = vadd.f32 1.0, %v1111_v45  ;;  %v1144_v33 = vadd.f32 0.001143296, %v1143_v15  ;;  %v3414_v29 = vadd.f32 1.1283791, %v1420_v32  ;;  %v3866_v45 = vld [vmem:[#allocation30_spill] sm:$0xff] }
 0x1ac   :  { %v3416_v54 = vadd.f32 1.1283791, %v1460_v19  ;;  %v1007_v13 = vmul.f32 %v1006_v50, %v3865_v10  ;;  %v1034_v4 = vmul.f32 %v2232_v14, %v3388_v36  ;;  %v3421_v11 = vmul.f32 %v1497_v30, %v3310_v41 }
 0x1ad   :  { %v3423_v53 = vadd.f32 0.05243302, %v1536_v46  ;;  %2233 = vrcp.f32 %v3412_v38  ;;  %v1184_v49 = vadd.f32 0.001143296, %v1183_v48  ;;  %v1663_v1 = vadd.f32 1.0, %v2074_v63  ;;  %v3867_v63 = vld [vmem:[#allocation35_spill] sm:$0xff] }
 0x1ae   :  { %v2076_v62 = vclamps-f32 %v1007_v13, 1.0  ;;  %v1035_v51 = vsub.f32 1.0, %v1034_v4  ;;  %v1044_v32 = vand.u32 2147483648, %v3388_v36  ;;  %v3428_v8 = vmul.f32 2.1237322e-06, %v3410_v20 }
 0x1af   :  { %v3430_v47 = vmin.f32 %v1610_v22, 16.0  ;;  %v1067_v19 = vmul.f32 %v1066_v56, %v2818_v27  ;;  %v1145_v3 = vmul.f32 %v1144_v33, %v2953_v25  ;;  %vm1039_vm0 = vweird.f32 %v2232_v14 }
 0x1b0   :  { %v1665_v5 = vadd.f32 1.0, %v2076_v62  ;;  %v1036_v15 = vmul.f32 %v2232_v14, %v1035_v51  ;;  %v1042_v30 = vand.u32 2147483647, %v3388_v36  ;;  %vm1038_vm1 = vweird.f32 %v3388_v36 }
 0x1b1   :  { %v1068_v46 = vadd.f32 0.112945676, %v1067_v19  ;;  %v1146_v42 = vadd.f32 0.014752088, %v1145_v3  ;;  %v1185_v57 = vmul.f32 %v1184_v49, %v2967_v16  ;;  %v1695_v48 = vmul.f32 %v1663_v1, %v3866_v45  ;;  %vm1040_vm2 = vmor %vm1038_vm1, %vm1039_vm0  ;;  %v3868_v3 = vld [vmem:[#allocation18_spill] sm:$0xff] }
 0x1b2   :  { %v1697_v22 = vmul.f32 %v1665_v5, %v3867_v63  ;;  %v1037_v18 = vadd.f32 %v2232_v14, %v1036_v15  ;;  %v1045_v50 = vor.u32 1.1754944e-38, %v1044_v32  ;;  %v1263_v4 = vmul.f32 3.8918573e-05, %v3104_v58 }
 0x1b3   :  { %v2234_v56 = vpop.eup %2233  ;;  %v1069_v33 = vmul.f32 %v1068_v46, %v2818_v27  ;;  %v1147_v10 = vmul.f32 %v1146_v42, %v2953_v25  ;;  %v1186_v13 = vadd.f32 0.014752088, %v1185_v57  ;;  %vm1043_vm3 = vcmp.eq.f32.partialorder %v1042_v30, 8.507059e+37 }
 0x1b4   :  { %v1753_v36 = vpack.c.bf16 %v1697_v22, %v1695_v48  ;;  %v1041_v62 = vsel %vm1040_vm2, %v2232_v14, %v1037_v18  ;;  %v1114_v49 = vmul.f32 %v2234_v56, %v3412_v38  ;;  %v1122_v1 = vand.u32 2147483647, %v3412_v38 }
 0x1b5   :  { %v1046_v51 = vsel %vm1043_vm3, %v1045_v50, %v1041_v62  ;;  %v1124_v19 = vand.u32 2147483648, %v3412_v38  ;;  %v1070_v32 = vadd.f32 0.4994258, %v1069_v33  ;;  %v1148_v46 = vadd.f32 0.112945676, %v1147_v10 }
 0x1b6   :  { %1934 = vmatmul.bf16.gmra.mxu3 %v1753_v36  ;;  %v1047_v5 = vmul.f32 %v1046_v51, %v3868_v3  ;;  %v1115_v15 = vsub.f32 1.0, %v1114_v49  ;;  %v1187_v42 = vmul.f32 %v1186_v13, %v2967_v16  ;;  %vm1119_vm4 = vweird.f32 %v2234_v56 }
 0x1b7   :  { %v1071_v57 = vmul.f32 %v1070_v32, %v2818_v27  ;;  %v1264_v14 = vadd.f32 0.001143296, %v1263_v4  ;;  %v1223_v30 = vmul.f32 3.8918573e-05, %v3014_v6  ;;  %v1149_v48 = vmul.f32 %v1148_v46, %v2953_v25 }
 0x1b8   :  { %v1116_v45 = vmul.f32 %v2234_v56, %v1115_v15  ;;  %v1188_v63 = vadd.f32 0.112945676, %v1187_v42  ;;  %v1303_v22 = vmul.f32 3.8918573e-05, %v3106_v52  ;;  %v2077_v18 = vclamps-f32 %v1047_v5, 1.0 }
 0x1b9   :  { %vm1118_vm5 = vweird.f32 %v3412_v38  ;;  %v3452_v50 = vadd.f32 1.0, %v1071_v57  ;;  %v1265_v33 = vmul.f32 %v1264_v14, %v3104_v58  ;;  %v1150_v13 = vadd.f32 0.4994258, %v1149_v48 }
 0x1ba   :  { %v1117_v10 = vadd.f32 %v2234_v56, %v1116_v45  ;;  %v1189_v27 = vmul.f32 %v1188_v63, %v2967_v16  ;;  %v1224_v4 = vadd.f32 0.001143296, %v1223_v30  ;;  %v1612_v36 = vmul.f32 2.1237322e-06, %v3430_v47  ;;  %vm1120_vm6 = vmor %vm1118_vm5, %vm1119_vm4 }
 0x1bb   :  { %vm1123_vm7 = vcmp.eq.f32.partialorder %v1122_v1, 8.507059e+37  ;;  %v1125_v62 = vor.u32 1.1754944e-38, %v1124_v19  ;;  %2235 = vrcp.f32 %v3452_v50  ;;  %v1151_v38 = vmul.f32 %v1150_v13, %v2953_v25 }
 0x1bc   :  { %v1121_v49 = vsel %vm1120_vm6, %v2234_v56, %v1117_v10  ;;  %v1190_v51 = vadd.f32 0.4994258, %v1189_v27  ;;  %v1304_v32 = vadd.f32 0.001143296, %v1303_v22  ;;  %v1666_v5 = vadd.f32 1.0, %v2077_v18  ;;  %v3869_v22 = vld [vmem:[#allocation37_spill] sm:$0xff] }
 0x1bd   :  { %v1126_v3 = vsel %vm1123_vm7, %v1125_v62, %v1121_v49  ;;  %v1082_v15 = vand.u32 2147483647, %v3452_v50  ;;  %v1266_v46 = vadd.f32 0.014752088, %v1265_v33  ;;  %v3462_v57 = vadd.f32 1.0, %v1151_v38 }
 0x1be   :  { %v1127_v42 = vmul.f32 %v1126_v3, %v3147_v28  ;;  %v1191_v14 = vmul.f32 %v1190_v51, %v2967_v16  ;;  %v1225_v1 = vmul.f32 %v1224_v4, %v3014_v6  ;;  %v3468_v56 = vmul.f32 %v3414_v29, %v3228_v31 }
 0x1bf   :  { %v3471_v25 = vadd.f32 0.00028619796, %v3428_v8  ;;  %v1084_v19 = vand.u32 2147483648, %v3452_v50  ;;  %v1267_v30 = vmul.f32 %v1266_v46, %v3104_v58  ;;  %v3475_v45 = vadd.f32 0.00028619796, %v1612_v36  ;;  %v3872_v36 = vld [vmem:[#allocation24_spill] sm:$0xff] }
 0x1c0   :  { %v2079_v28 = vclamps-f32 %v1127_v42, 1.0  ;;  %vm1078_vm8 = vweird.f32 %v3452_v50  ;;  %2237 = vrcp.f32 %v3462_v57  ;;  %v3479_v48 = vadd.f32 1.0, %v1191_v14 }
 0x1c1   :  { %v2236_v16 = vpop.eup %2235  ;;  %v1268_v63 = vadd.f32 0.112945676, %v1267_v30  ;;  %v1226_v31 = vadd.f32 0.014752088, %v1225_v1  ;;  %v1305_v29 = vmul.f32 %v1304_v32, %v3106_v52  ;;  %v1698_v18 = vmul.f32 %v1666_v5, %v3869_v22 }
 0x1c2   :  { %v1668_v8 = vadd.f32 1.0, %v2079_v28  ;;  %v1074_v33 = vmul.f32 %v2236_v16, %v3452_v50  ;;  %vm3484_vm9 = vcmp.eq.f32.partialorder %v1082_v15, 8.507059e+37  ;;  %v1085_v13 = vor.u32 1.1754944e-38, %v1084_v19  ;;  %v3875_v50 = vld [vmem:[#allocation28_spill] sm:$0xff] }
 0x1c3   :  { %v1162_v27 = vand.u32 2147483647, %v3462_v57  ;;  %v1164_v4 = vand.u32 2147483648, %v3462_v57  ;;  %2239 = vrcp.f32 %v3479_v48  ;;  %v1269_v38 = vmul.f32 %v1268_v63, %v3104_v58 }
 0x1c4   :  { %v1700_v62 = vmul.f32 %v1668_v8, %v3872_v36  ;;  %v1075_v49 = vsub.f32 1.0, %v1074_v33  ;;  %v1343_v51 = vmul.f32 3.8918573e-05, %v3129_v2  ;;  %vm1158_vm10 = vweird.f32 %v3462_v57 }
 0x1c5   :  { %v1227_v32 = vmul.f32 %v1226_v31, %v3014_v6  ;;  %v1306_v3 = vadd.f32 0.014752088, %v1305_v29  ;;  %v1423_v5 = vmul.f32 3.8918573e-05, %v3252_v21  ;;  %vm1079_vm11 = vweird.f32 %v2236_v16 }
 0x1c6   :  { %v2238_v15 = vpop.eup %2237  ;;  %v1754_v46 = vpack.c.bf16 %v1700_v62, %v1698_v18  ;;  %v1076_v42 = vmul.f32 %v2236_v16, %v1075_v49  ;;  %v1270_v14 = vadd.f32 0.4994258, %v1269_v38  ;;  %vm3498_vm12 = vcmp.eq.f32.partialorder %v1162_v27, 8.507059e+37  ;;  %vm1080_vm14 = vmor %vm1078_vm8, %vm1079_vm11 }
 0x1c7   :  { %v1154_v1 = vmul.f32 %v2238_v15, %v3462_v57  ;;  %v1165_v30 = vor.u32 1.1754944e-38, %v1164_v4  ;;  %v1228_v28 = vadd.f32 0.112945676, %v1227_v32  ;;  %v1307_v63 = vmul.f32 %v1306_v3, %v3106_v52 }
 0x1c8   :  { %1890 = vmatmul.bf16.gmra.mxu2 %v1754_v46  ;;  %v1077_v31 = vadd.f32 %v2236_v16, %v1076_v42  ;;  %vm1198_vm13 = vweird.f32 %v3479_v48  ;;  %v1202_v29 = vand.u32 2147483647, %v3479_v48  ;;  %v1204_v8 = vand.u32 2147483648, %v3479_v48 }
 0x1c9   :  { %v1271_v22 = vmul.f32 %v1270_v14, %v3104_v58  ;;  %v2240_v18 = vpop.eup %2239  ;;  %v1155_v33 = vsub.f32 1.0, %v1154_v1  ;;  %v1229_v27 = vmul.f32 %v1228_v28, %v3014_v6  ;;  %v1308_v4 = vadd.f32 0.112945676, %v1307_v63 }
 0x1ca   :  { %v1344_v36 = vadd.f32 0.001143296, %v1343_v51  ;;  %v1081_v62 = vsel %vm1080_vm14, %v2236_v16, %v1077_v31  ;;  %vm1159_vm15 = vweird.f32 %v2238_v15  ;;  %v1194_v49 = vmul.f32 %v2240_v18, %v3479_v48 }
 0x1cb   :  { %v3511_v38 = vadd.f32 1.0, %v1271_v22  ;;  %v1086_v32 = vsel %vm3484_vm9, %v1085_v13, %v1081_v62  ;;  %v1156_v3 = vmul.f32 %v2238_v15, %v1155_v33  ;;  %v1230_v58 = vadd.f32 0.4994258, %v1229_v27  ;;  %vm1160_vm1 = vmor %vm1158_vm10, %vm1159_vm15 }
 0x1cc   :  { %v1309_v46 = vmul.f32 %v1308_v4, %v3106_v52  ;;  %v1087_v42 = vmul.f32 %v1086_v32, %v3875_v50  ;;  %v1195_v14 = vsub.f32 1.0, %v1194_v49  ;;  %vm3517_vm0 = vcmp.eq.f32.partialorder %v1202_v29, 8.507059e+37 }
 0x1cd   :  { %2241 = vrcp.f32 %v3511_v38  ;;  %v1157_v16 = vadd.f32 %v2238_v15, %v1156_v3  ;;  %v1205_v51 = vor.u32 1.1754944e-38, %v1204_v8  ;;  %v1231_v28 = vmul.f32 %v1230_v58, %v3014_v6 }
 0x1ce   :  { %v1345_v10 = vmul.f32 %v1344_v36, %v3129_v2  ;;  %v2078_v13 = vclamps-f32 %v1087_v42, 1.0  ;;  %v1196_v63 = vmul.f32 %v2240_v18, %v1195_v14  ;;  %vm1199_vm2 = vweird.f32 %v2240_v18  ;;  %v3880_v42 = vld [vmem:[#allocation38_spill] sm:$0xff] }
 0x1cf   :  { %v1310_v31 = vadd.f32 0.4994258, %v1309_v46  ;;  %v1161_v29 = vsel %vm1160_vm1, %v2238_v15, %v1157_v16  ;;  %v1282_v22 = vand.u32 2147483647, %v3511_v38  ;;  %v1284_v33 = vand.u32 2147483648, %v3511_v38  ;;  %vm1200_vm3 = vmor %vm1198_vm13, %vm1199_vm2 }
 0x1d0   :  { %v3529_v27 = vadd.f32 1.0, %v1231_v28  ;;  %v1166_v6 = vsel %vm3498_vm12, %v1165_v30, %v1161_v29  ;;  %v1197_v8 = vadd.f32 %v2240_v18, %v1196_v63  ;;  %v1424_v36 = vadd.f32 0.001143296, %v1423_v5 }
 0x1d1   :  { %v1311_v4 = vmul.f32 %v1310_v31, %v3106_v52  ;;  %v1167_v57 = vmul.f32 %v1166_v6, %v3163_v34  ;;  %v1667_v62 = vadd.f32 1.0, %v2078_v13  ;;  %v1383_v15 = vmul.f32 3.8918573e-05, %v3170_v26  ;;  %v3881_v13 = vld [vmem:[#allocation31_spill] sm:$0xff] }
 0x1d2   :  { %2243 = vrcp.f32 %v3529_v27  ;;  %v1201_v32 = vsel %vm1200_vm3, %v2240_v18, %v1197_v8  ;;  %vm1278_vm4 = vweird.f32 %v3511_v38  ;;  %v1346_v30 = vadd.f32 0.014752088, %v1345_v10 }
 0x1d3   :  { %v2242_v49 = vpop.eup %2241  ;;  %v3540_v19 = vadd.f32 1.0, %v1311_v4  ;;  %v2080_v3 = vclamps-f32 %v1167_v57, 1.0  ;;  %v1206_v52 = vsel %vm3517_vm0, %v1205_v51, %v1201_v32  ;;  %vm3545_vm5 = vcmp.eq.f32.partialorder %v1282_v22, 8.507059e+37 }
 0x1d4   :  { %v1274_v34 = vmul.f32 %v2242_v49, %v3511_v38  ;;  %v1285_v5 = vor.u32 1.1754944e-38, %v1284_v33  ;;  %v1207_v58 = vmul.f32 %v1206_v52, %v3179_v55  ;;  %v1242_v18 = vand.u32 2147483647, %v3529_v27 }
 0x1d5   :  { %v1244_v46 = vand.u32 2147483648, %v3529_v27  ;;  %2245 = vrcp.f32 %v3540_v19  ;;  %v1669_v50 = vadd.f32 1.0, %v2080_v3  ;;  %v1699_v14 = vmul.f32 %v1667_v62, %v3880_v42 }
 0x1d6   :  { %v1275_v1 = vsub.f32 1.0, %v1274_v34  ;;  %vm1279_vm6 = vweird.f32 %v2242_v49  ;;  %v2081_v16 = vclamps-f32 %v1207_v58, 1.0  ;;  %vm1238_vm7 = vweird.f32 %v3529_v27 }
 0x1d7   :  { %v1324_v51 = vand.u32 2147483648, %v3540_v19  ;;  %v1347_v28 = vmul.f32 %v1346_v30, %v3129_v2  ;;  %v1425_v55 = vmul.f32 %v1424_v36, %v3252_v21  ;;  %v1701_v63 = vmul.f32 %v1669_v50, %v3881_v13  ;;  %vm1280_vm11 = vmor %vm1278_vm4, %vm1279_vm6 }
 0x1d8   :  { %v2244_v10 = vpop.eup %2243  ;;  %v1276_v31 = vmul.f32 %v2242_v49, %v1275_v1  ;;  %v1322_v29 = vand.u32 2147483647, %v3540_v19  ;;  %v1384_v22 = vadd.f32 0.001143296, %v1383_v15  ;;  %v1670_v33 = vadd.f32 1.0, %v2081_v16 }
 0x1d9   :  { %v1234_v6 = vmul.f32 %v2244_v10, %v3529_v27  ;;  %vm1239_vm8 = vweird.f32 %v2244_v10  ;;  %vm3561_vm9 = vcmp.eq.f32.partialorder %v1242_v18, 8.507059e+37  ;;  %v1245_v4 = vor.u32 1.1754944e-38, %v1244_v46 }
 0x1da   :  { %v1755_v57 = vpack.c.bf16 %v1701_v63, %v1699_v14  ;;  %v1277_v62 = vadd.f32 %v2242_v49, %v1276_v31  ;;  %vm1318_vm10 = vweird.f32 %v3540_v19  ;;  %v1348_v36 = vadd.f32 0.112945676, %v1347_v28  ;;  %vm1240_vm14 = vmor %vm1238_vm7, %vm1239_vm8 }
 0x1db   :  { %v1426_v32 = vadd.f32 0.014752088, %v1425_v55  ;;  %v2246_v30 = vpop.eup %2245  ;;  %v1235_v15 = vsub.f32 1.0, %v1234_v6  ;;  %v1325_v3 = vor.u32 1.1754944e-38, %v1324_v51  ;;  %v1385_v52 = vmul.f32 %v1384_v22, %v3170_v26 }
 0x1dc   :  { %v1463_v34 = vmul.f32 3.8918573e-05, %v3256_v35  ;;  %1939 = vmatmul.bf16.gmra.mxu3 %v1755_v57  ;;  %v1281_v58 = vsel %vm1280_vm11, %v2242_v49, %v1277_v62  ;;  %v1314_v18 = vmul.f32 %v2246_v30, %v3540_v19  ;;  %vm1319_vm12 = vweird.f32 %v2246_v30 }
 0x1dd   :  { %vm3572_vm13 = vcmp.eq.f32.partialorder %v1322_v29, 8.507059e+37  ;;  %v1349_v50 = vmul.f32 %v1348_v36, %v3129_v2  ;;  %v1286_v38 = vsel %vm3545_vm5, %v1285_v5, %v1281_v58  ;;  %v1236_v42 = vmul.f32 %v2244_v10, %v1235_v15  ;;  %vm1320_vm15 = vmor %vm1318_vm10, %vm1319_vm12 }
 0x1de   :  { %v1427_v14 = vmul.f32 %v1426_v32, %v3252_v21  ;;  %v1386_v1 = vadd.f32 0.014752088, %v1385_v52  ;;  %v1287_v16 = vmul.f32 %v1286_v38, %v3319_v39  ;;  %v1315_v51 = vsub.f32 1.0, %v1314_v18  ;;  %v3886_v39 = vld [vmem:[#allocation36_spill] sm:$0xff] }
 0x1df   :  { %v1350_v49 = vadd.f32 0.4994258, %v1349_v50  ;;  %v1464_v28 = vadd.f32 0.001143296, %v1463_v34  ;;  %v1237_v55 = vadd.f32 %v2244_v10, %v1236_v42  ;;  %v1503_v31 = vmul.f32 3.8918573e-05, %v3310_v41 }
 0x1e0   :  { %v1428_v13 = vadd.f32 0.112945676, %v1427_v14  ;;  %v1387_v63 = vmul.f32 %v1386_v1, %v3170_v26  ;;  %v2083_v29 = vclamps-f32 %v1287_v16, 1.0  ;;  %v1316_v48 = vmul.f32 %v2246_v30, %v1315_v51 }
 0x1e1   :  { %v1351_v5 = vmul.f32 %v1350_v49, %v3129_v2  ;;  %v1465_v22 = vmul.f32 %v1464_v28, %v3256_v35  ;;  %v1702_v6 = vmul.f32 %v1670_v33, %v3886_v39  ;;  %v1241_v57 = vsel %vm1240_vm14, %v2244_v10, %v1237_v55 }
 0x1e2   :  { %v1429_v62 = vmul.f32 %v1428_v13, %v3252_v21  ;;  %v1388_v36 = vadd.f32 0.112945676, %v1387_v63  ;;  %v1672_v32 = vadd.f32 1.0, %v2083_v29  ;;  %v1246_v15 = vsel %vm3561_vm9, %v1245_v4, %v1241_v57 }
 0x1e3   :  { %v1317_v52 = vadd.f32 %v2246_v30, %v1316_v48  ;;  %v3592_v34 = vadd.f32 1.0, %v1351_v5  ;;  %v1247_v27 = vmul.f32 %v1246_v15, %v3195_v24  ;;  %v1466_v10 = vadd.f32 0.014752088, %v1465_v22  ;;  %v3888_v48 = vld [vmem:[#allocation17_spill] sm:$0xff]  ;;  %v3889_v22 = vld [vmem:[#allocation20_spill] sm:$0xff] }
 0x1e4   :  { %v1430_v2 = vadd.f32 0.4994258, %v1429_v62  ;;  %v1389_v33 = vmul.f32 %v1388_v36, %v3170_v26  ;;  %v1704_v58 = vmul.f32 %v1672_v32, %v3200_v17  ;;  %v1504_v8 = vadd.f32 0.001143296, %v1503_v31 }
 0x1e5   :  { %v1321_v18 = vsel %vm1320_vm15, %v2246_v30, %v1317_v52  ;;  %2247 = vrcp.f32 %v3592_v34  ;;  %v1574_v4 = vmul.f32 %v3471_v25, %v3410_v20  ;;  %v1614_v24 = vmul.f32 %v3475_v45, %v3430_v47  ;;  %v3887_v30 = vld [vmem:[#allocation15_spill] sm:$0xff] }
 0x1e6   :  { %v2082_v50 = vclamps-f32 %v1247_v27, 1.0  ;;  %v1326_v19 = vsel %vm3572_vm13, %v1325_v3, %v1321_v18  ;;  %v1756_v38 = vpack.c.bf16 %v1704_v58, %v1702_v6  ;;  %v1431_v14 = vmul.f32 %v1430_v2, %v3252_v21 }
 0x1e7   :  { %v1327_v42 = vmul.f32 %v1326_v19, %v3342_v7  ;;  %v1390_v17 = vadd.f32 0.4994258, %v1389_v33  ;;  %v3611_v1 = vmul.f32 %v3416_v54, %v3887_v30  ;;  %v3614_v16 = vadd.f32 0.18741608, %v3421_v11 }
 0x1e8   :  { %v1671_v25 = vadd.f32 1.0, %v2082_v50  ;;  %v1467_v45 = vmul.f32 %v1466_v10, %v3256_v35  ;;  %1895 = vmatmul.bf16.gmra.mxu2 %v1756_v38  ;;  %v3617_v46 = vadd.f32 1.0, %v1431_v14  ;;  %v1505_v7 = vmul.f32 %v1504_v8, %v3310_v41 }
 0x1e9   :  { %v2084_v51 = vclamps-f32 %v1327_v42, 1.0  ;;  %v1391_v3 = vmul.f32 %v1390_v17, %v3170_v26  ;;  %v3623_v21 = vmul.f32 %v3423_v53, %v3326_v40  ;;  %v1575_v54 = vadd.f32 0.0036580483, %v1574_v4 }
 0x1ea   :  { %v1615_v49 = vadd.f32 0.0036580483, %v1614_v24  ;;  %v1468_v28 = vadd.f32 0.112945676, %v1467_v45  ;;  %v1362_v13 = vand.u32 2147483647, %v3592_v34  ;;  %2249 = vrcp.f32 %v3617_v46 }
 0x1eb   :  { %v2248_v11 = vpop.eup %2247  ;;  %v1673_v55 = vadd.f32 1.0, %v2084_v51  ;;  %v1364_v63 = vand.u32 2147483648, %v3592_v34  ;;  %v3629_v26 = vadd.f32 1.0, %v1391_v3  ;;  %v1583_v29 = vmul.f32 3.8918573e-05, %v3410_v20 }
 0x1ec   :  { %v1354_v31 = vmul.f32 %v2248_v11, %v3592_v34  ;;  %v1543_v53 = vmul.f32 3.8918573e-05, %v3326_v40  ;;  %v1703_v5 = vmul.f32 %v1671_v25, %v3888_v48  ;;  %v1469_v6 = vmul.f32 %v1468_v28, %v3256_v35 }
 0x1ed   :  { %v1705_v39 = vmul.f32 %v1673_v55, %v3889_v22  ;;  %v1506_v57 = vadd.f32 0.014752088, %v1505_v7  ;;  %v3637_v62 = vmul.f32 %v1575_v54, %v3410_v20  ;;  %v3640_v36 = vmul.f32 %v1615_v49, %v3430_v47 }
 0x1ee   :  { %v1355_v32 = vsub.f32 1.0, %v1354_v31  ;;  %2251 = vrcp.f32 %v3629_v26  ;;  %vm1358_vm0 = vweird.f32 %v3592_v34  ;;  %vm1359_vm1 = vweird.f32 %v2248_v11 }
 0x1ef   :  { %v1757_v15 = vpack.c.bf16 %v1705_v39, %v1703_v5  ;;  %v1470_v52 = vadd.f32 0.4994258, %v1469_v6  ;;  %v1507_v2 = vmul.f32 %v1506_v57, %v3310_v41  ;;  %v1584_v33 = vadd.f32 0.001143296, %v1583_v29  ;;  %vm1360_vm4 = vmor %vm1358_vm0, %vm1359_vm1 }
 0x1f0   :  { %v1356_v27 = vmul.f32 %v2248_v11, %v1355_v32  ;;  %v1544_v10 = vadd.f32 0.001143296, %v1543_v53  ;;  %v2250_v58 = vpop.eup %2249  ;;  %vm3645_vm2 = vcmp.eq.f32.partialorder %v1362_v13, 8.507059e+37  ;;  %v1365_v8 = vor.u32 1.1754944e-38, %v1364_v63 }
 0x1f1   :  { %1944 = vmatmul.bf16.gmra.mxu3 %v1757_v15  ;;  %v1442_v4 = vand.u32 2147483647, %v3617_v46  ;;  %v1471_v24 = vmul.f32 %v1470_v52, %v3256_v35  ;;  %v1434_v19 = vmul.f32 %v2250_v58, %v3617_v46  ;;  %vm1438_vm3 = vweird.f32 %v3617_v46 }
 0x1f2   :  { %v1357_v50 = vadd.f32 %v2248_v11, %v1356_v27  ;;  %v1508_v38 = vadd.f32 0.112945676, %v1507_v2  ;;  %v1444_v42 = vand.u32 2147483648, %v3617_v46  ;;  %v1585_v17 = vmul.f32 %v1584_v33, %v3410_v20 }
 0x1f3   :  { %v3657_v14 = vadd.f32 1.0, %v1471_v24  ;;  %v1623_v30 = vmul.f32 3.8918573e-05, %v3430_v47  ;;  %v1435_v45 = vsub.f32 1.0, %v1434_v19  ;;  %v1545_v3 = vmul.f32 %v1544_v10, %v3326_v40 }
 0x1f4   :  { %v2252_v25 = vpop.eup %2251  ;;  %v1361_v35 = vsel %vm1360_vm4, %v2248_v11, %v1357_v50  ;;  %v1509_v51 = vmul.f32 %v1508_v38, %v3310_v41  ;;  %vm3665_vm5 = vcmp.eq.f32.partialorder %v1442_v4, 8.507059e+37  ;;  %vm1439_vm6 = vweird.f32 %v2250_v58 }
 0x1f5   :  { %v1366_v7 = vsel %vm3645_vm2, %v1365_v8, %v1361_v35  ;;  %v1394_v54 = vmul.f32 %v2252_v25, %v3629_v26  ;;  %2253 = vrcp.f32 %v3657_v14  ;;  %v1436_v28 = vmul.f32 %v2250_v58, %v1435_v45  ;;  %vm1440_vm7 = vmor %vm1438_vm3, %vm1439_vm6 }
 0x1f6   :  { %v1367_v49 = vmul.f32 %v1366_v7, %v3350_v60  ;;  %v1402_v11 = vand.u32 2147483647, %v3629_v26  ;;  %v1445_v55 = vor.u32 1.1754944e-38, %v1444_v42  ;;  %v1510_v63 = vadd.f32 0.4994258, %v1509_v51  ;;  %v3894_v7 = vld [vmem:[#allocation26_spill] sm:$0xff] }
 0x1f7   :  { %v1395_v13 = vsub.f32 1.0, %v1394_v54  ;;  %v1586_v31 = vadd.f32 0.014752088, %v1585_v17  ;;  %v1437_v29 = vadd.f32 %v2250_v58, %v1436_v28  ;;  %v1404_v53 = vand.u32 2147483648, %v3629_v26 }
 0x1f8   :  { %v1546_v48 = vadd.f32 0.014752088, %v1545_v3  ;;  %v1624_v5 = vadd.f32 0.001143296, %v1623_v30  ;;  %vm1399_vm8 = vweird.f32 %v2252_v25  ;;  %v1511_v60 = vmul.f32 %v1510_v63, %v3310_v41 }
 0x1f9   :  { %v1396_v22 = vmul.f32 %v2252_v25, %v1395_v13  ;;  %v1587_v39 = vmul.f32 %v1586_v31, %v3410_v20  ;;  %v2085_v6 = vclamps-f32 %v1367_v49, 1.0  ;;  %v1441_v57 = vsel %vm1440_vm7, %v2250_v58, %v1437_v29 }
 0x1fa   :  { %vm1398_vm9 = vweird.f32 %v3629_v26  ;;  %v1547_v32 = vmul.f32 %v1546_v48, %v3326_v40  ;;  %v1446_v52 = vsel %vm3665_vm5, %v1445_v55, %v1441_v57  ;;  %v3682_v2 = vadd.f32 1.0, %v1511_v60 }
 0x1fb   :  { %v2254_v15 = vpop.eup %2253  ;;  %v1397_v27 = vadd.f32 %v2252_v25, %v1396_v22  ;;  %v1588_v46 = vadd.f32 0.112945676, %v1587_v39  ;;  %v1447_v33 = vmul.f32 %v1446_v52, %v3468_v56  ;;  %vm1400_vm10 = vmor %vm1398_vm9, %vm1399_vm8  ;;  %v1405_v10 = vor.u32 1.1754944e-38, %v1404_v53 }
 0x1fc   :  { %v1474_v18 = vmul.f32 %v2254_v15, %v3657_v14  ;;  %v1625_v58 = vmul.f32 %v1624_v5, %v3430_v47  ;;  %vm1403_vm11 = vcmp.eq.f32.partialorder %v1402_v11, 8.507059e+37  ;;  %v1482_v26 = vand.u32 2147483647, %v3657_v14 }
 0x1fd   :  { %v1401_v8 = vsel %vm1400_vm10, %v2252_v25, %v1397_v27  ;;  %2255 = vrcp.f32 %v3682_v2  ;;  %v2087_v4 = vclamps-f32 %v1447_v33, 1.0  ;;  %v1674_v24 = vadd.f32 1.0, %v2085_v6 }
 0x1fe   :  { %v1406_v50 = vsel %vm1403_vm11, %v1405_v10, %v1401_v8  ;;  %v1475_v19 = vsub.f32 1.0, %v1474_v18  ;;  %v1484_v56 = vand.u32 2147483648, %v3657_v14  ;;  %v1589_v42 = vmul.f32 %v1588_v46, %v3410_v20  ;;  %v3897_v8 = vld [vmem:[#allocation32_spill] sm:$0xff] }
 0x1ff   :  { %v1407_v38 = vmul.f32 %v1406_v50, %v3353_v61  ;;  %v1548_v17 = vadd.f32 0.112945676, %v1547_v32  ;;  %v1676_v30 = vadd.f32 1.0, %v2087_v4  ;;  %vm1479_vm12 = vweird.f32 %v2254_v15  ;;  %v1871_v50 = vpop.f32.mrf.mxu2 }
 0x200   :  { %v1476_v35 = vmul.f32 %v2254_v15, %v1475_v19  ;;  %v1626_v25 = vadd.f32 0.014752088, %v1625_v58  ;;  %v1577_v45 = vadd.f32 0.05243302, %v3637_v62  ;;  %vm1478_vm13 = vweird.f32 %v3657_v14  ;;  %v1920_v19 = vpop.f32.mrf.mxu3 }
 0x201   :  { %v1590_v51 = vadd.f32 0.4994258, %v1589_v42  ;;  %v1549_v3 = vmul.f32 %v1548_v17, %v3326_v40  ;;  %v1706_v34 = vmul.f32 %v1674_v24, %v3894_v7  ;;  %v1708_v61 = vmul.f32 %v1676_v30, %v3358_v23  ;;  %vm1480_vm14 = vmor %vm1478_vm13, %vm1479_vm12 }
 0x202   :  { %v1477_v54 = vadd.f32 %v2254_v15, %v1476_v35  ;;  %v1627_v49 = vmul.f32 %v1626_v25, %v3430_v47  ;;  %v2086_v11 = vclamps-f32 %v1407_v38, 1.0  ;;  %v1485_v55 = vor.u32 1.1754944e-38, %v1484_v56 }
 0x203   :  { %v2256_v28 = vpop.eup %2255  ;;  %v1591_v13 = vmul.f32 %v1590_v51, %v3410_v20  ;;  %v1550_v63 = vadd.f32 0.4994258, %v1549_v3  ;;  %v1758_v62 = vpack.c.bf16 %v1708_v61, %v1706_v34  ;;  %vm1483_vm15 = vcmp.eq.f32.partialorder %v1482_v26, 8.507059e+37 }
 0x204   :  { %v1481_v31 = vsel %vm1480_vm14, %v2254_v15, %v1477_v54  ;;  %v1514_v14 = vmul.f32 %v2256_v28, %v3682_v2  ;;  %v1578_v29 = vmul.f32 %v1577_v45, %v3410_v20  ;;  %v1500_v5 = vmul.f32 %v3614_v16, %v3310_v41 }
 0x205   :  { %v1486_v53 = vsel %vm1483_vm15, %v1485_v55, %v1481_v31  ;;  %v3701_v48 = vadd.f32 1.0, %v1591_v13  ;;  %v1551_v23 = vmul.f32 %v1550_v63, %v3326_v40  ;;  %1900 = vmatmul.bf16.gmra.mxu2 %v1758_v62  ;;  %v1628_v39 = vadd.f32 0.112945676, %v1627_v49 }
 0x206   :  { %v1487_v22 = vmul.f32 %v1486_v53, %v3611_v1  ;;  %v1515_v60 = vsub.f32 1.0, %v1514_v14  ;;  %v1617_v6 = vadd.f32 0.05243302, %v3640_v36  ;;  %v1675_v57 = vadd.f32 1.0, %v2086_v11 }
 0x207   :  { %vm1519_vm0 = vweird.f32 %v2256_v28  ;;  %2257 = vrcp.f32 %v3701_v48  ;;  %v3709_v52 = vadd.f32 1.0, %v1551_v23  ;;  %v1629_v27 = vmul.f32 %v1628_v39, %v3430_v47 }
 0x208   :  { %v2088_v32 = vclamps-f32 %v1487_v22, 1.0  ;;  %v1516_v15 = vmul.f32 %v2256_v28, %v1515_v60  ;;  %v1539_v46 = vadd.f32 0.18741608, %v3623_v21  ;;  %v1579_v41 = vadd.f32 0.18741608, %v1578_v29  ;;  %v1873_v29 = vpop.f32.mrf.mxu2  ;;  %v1922_v53 = vpop.f32.mrf.mxu3 }
 0x209   :  { %vm1518_vm1 = vweird.f32 %v3682_v2  ;;  %v1524_v1 = vand.u32 2147483648, %v3682_v2  ;;  %v1522_v36 = vand.u32 2147483647, %v3682_v2  ;;  %2259 = vrcp.f32 %v3709_v52  ;;  %v3730_v2 = vld [vmem:[%s3785_s4] ss:$0 sm:$0xff]  ;;  %s2399_s4 = smov [#allocation10]  }
 0x20a   :  { %v1677_v16 = vadd.f32 1.0, %v2088_v32  ;;  %v1517_v33 = vadd.f32 %v2256_v28, %v1516_v15  ;;  %v1618_v10 = vmul.f32 %v1617_v6, %v3430_v47  ;;  %vm3719_vm2 = vmor %vm1518_vm1, %vm1519_vm0  ;;  %v1630_v58 = vadd.f32 0.4994258, %v1629_v27  ;;  %s1980_s15 = sshll.u32 %s2399_s4, 4  ;;  %s1981_s15 = int_to_ptr.vmem [resolvable:$true] %s1980_s15 }
 0x20b   :  { %v1501_v21 = vadd.f32 1.1283791, %v1500_v5  ;;  %v1707_v26 = vmul.f32 %v1675_v57, %v3897_v8  ;;  %v1580_v56 = vmul.f32 %v1579_v41, %v3410_v20  ;;  %v1525_v42 = vor.u32 1.1754944e-38, %v1524_v1  ;;  %v3898_v41 = vld [vmem:[#allocation19_spill] sm:$0xff] }
 0x20c   :  { %v1709_v4 = vmul.f32 %v1677_v16, %v3361_v44  ;;  %v1521_v24 = vsel %vm3719_vm2, %v2256_v28, %v1517_v33  ;;  %v1631_v17 = vmul.f32 %v1630_v58, %v3430_v47  ;;  %v1540_v30 = vmul.f32 %v1539_v46, %v3326_v40 }
 0x20d   :  { %v2258_v38 = vpop.eup %2257  ;;  %vm1523_vm3 = vcmp.eq.f32.partialorder %v1522_v36, 8.507059e+37  ;;  %v1619_v25 = vadd.f32 0.18741608, %v1618_v10  ;;  %v1872_v3 = vadd.f32 %v3730_v2, %v1871_v50  ;;  %v1502_v34 = vmul.f32 %v1501_v21, %v3278_v12 }
 0x20e   :  { %v1759_v35 = vpack.c.bf16 %v1709_v4, %v1707_v26  ;;  %v1594_v44 = vmul.f32 %v2258_v38, %v3701_v48  ;;  %v1526_v45 = vsel %vm1523_vm3, %v1525_v42, %v1521_v24  ;;  %v3736_v51 = vadd.f32 1.0, %v1631_v17 }
 0x20f   :  { %v2260_v7 = vpop.eup %2259  ;;  %v1604_v61 = vand.u32 2147483648, %v3701_v48  ;;  %v1581_v54 = vadd.f32 1.1283791, %v1580_v56  ;;  %v1527_v49 = vmul.f32 %v1526_v45, %v1502_v34  ;;  %vm1599_vm4 = vweird.f32 %v2258_v38 }
 0x210   :  { %1949 = vmatmul.bf16.gmra.mxu3 %v1759_v35  ;;  %v1595_v20 = vsub.f32 1.0, %v1594_v44  ;;  %v1554_v40 = vmul.f32 %v2260_v7, %v3709_v52  ;;  %2261 = vrcp.f32 %v3736_v51  ;;  %v1602_v11 = vand.u32 2147483647, %v3701_v48  ;;  %v1876_v50 = vpop.f32.mrf.mxu2 }
 0x211   :  { %v1541_v55 = vadd.f32 1.1283791, %v1540_v30  ;;  %v1620_v13 = vmul.f32 %v1619_v25, %v3430_v47  ;;  %v1921_v62 = vadd.f32 %v1920_v19, %v1872_v3  ;;  %vm1598_vm5 = vweird.f32 %v3701_v48 }
 0x212   :  { %v1596_v28 = vmul.f32 %v2258_v38, %v1595_v20  ;;  %v1555_v63 = vsub.f32 1.0, %v1554_v40  ;;  %v1605_v31 = vor.u32 1.1754944e-38, %v1604_v61  ;;  %v1564_v14 = vand.u32 2147483648, %v3709_v52  ;;  %vm1600_vm6 = vmor %vm1598_vm5, %vm1599_vm4 }
 0x213   :  { %vm1559_vm7 = vweird.f32 %v2260_v7  ;;  %v1562_v5 = vand.u32 2147483647, %v3709_v52  ;;  %1960 = vst [vmem:[#allocation10] sm:$0xff] %v1921_v62  ;;  %v1874_v22 = vadd.f32 %v3730_v2, %v1873_v29  ;;  %v1582_v47 = vmul.f32 %v1581_v54, %v3386_v37 }
 0x214   :  { %v1597_v12 = vadd.f32 %v2258_v38, %v1596_v28  ;;  %v1556_v23 = vmul.f32 %v2260_v7, %v1555_v63  ;;  %v2089_v60 = vclamps-f32 %v1527_v49, 1.0  ;;  %vm1603_vm8 = vcmp.eq.f32.partialorder %v1602_v11, 8.507059e+37 }
 0x215   :  { %vm1558_vm9 = vweird.f32 %v3709_v52  ;;  %v1923_v32 = vadd.f32 %v1922_v53, %v1874_v22  ;;  %v1565_v27 = vor.u32 1.1754944e-38, %v1564_v14  ;;  %v334_v1 = vmul.f32 0.5, %v3898_v41 }
 0x216   :  { %v1601_v39 = vsel %vm1600_vm6, %v2258_v38, %v1597_v12  ;;  %v2262_v6 = vpop.eup %2261  ;;  %v1557_v57 = vadd.f32 %v2260_v7, %v1556_v23  ;;  %vm1560_vm10 = vmor %vm1558_vm9, %vm1559_vm7  ;;  %v1542_v16 = vmul.f32 %v1541_v55, %v3296_v59  ;;  %vm1563_vm11 = vcmp.eq.f32.partialorder %v1562_v5, 8.507059e+37  ;;  %v1925_v59 = vpop.f32.mrf.mxu3 }
 0x217   :  { %v1606_v48 = vsel %vm1603_vm8, %v1605_v31, %v1601_v39  ;;  %v1634_v46 = vmul.f32 %v2262_v6, %v3736_v51  ;;  %1961 = vst [vmem:[#allocation10 + $0x8] sm:$0xff] %v1923_v32  ;;  %v1678_v36 = vadd.f32 1.0, %v2089_v60  ;;  %v336_v58 = vmul.f32 0.5, %v3374_v43 }
 0x218   :  { %v1607_v15 = vmul.f32 %v1606_v48, %v1582_v47  ;;  %v1561_v33 = vsel %vm1560_vm10, %v2260_v7, %v1557_v57  ;;  %v1621_v52 = vadd.f32 1.1283791, %v1620_v13  ;;  %v1642_v21 = vand.u32 2147483647, %v3736_v51  ;;  %v1878_v20 = vpop.f32.mrf.mxu2 }
 0x219   :  { %v1566_v10 = vsel %vm1563_vm11, %v1565_v27, %v1561_v33  ;;  %v1635_v18 = vsub.f32 1.0, %v1634_v46  ;;  %v1644_v8 = vand.u32 2147483648, %v3736_v51  ;;  %vm1639_vm12 = vweird.f32 %v2262_v6 }
 0x21a   :  { %v2091_v37 = vclamps-f32 %v1607_v15, 1.0  ;;  %v1567_v4 = vmul.f32 %v1566_v10, %v1542_v16  ;;  %v1877_v19 = vadd.f32 %v3730_v2, %v1876_v50  ;;  %v1710_v38 = vmul.f32 %v1678_v36, %v334_v1 }
 0x21b   :  { %v1636_v24 = vmul.f32 %v2262_v6, %v1635_v18  ;;  %vm1638_vm13 = vweird.f32 %v3736_v51  ;;  %v1622_v43 = vmul.f32 %v1621_v52, %v3395_v0  ;;  %v1645_v17 = vor.u32 1.1754944e-38, %v1644_v8  ;;  %v3899_v51 = vld [vmem:[#allocation21_spill] sm:$0xff] }
 0x21c   :  { %v1680_v26 = vadd.f32 1.0, %v2091_v37  ;;  %vm1640_vm14 = vmor %vm1638_vm13, %vm1639_vm12  ;;  %v1926_v30 = vadd.f32 %v1925_v59, %v1877_v19  ;;  %v2090_v44 = vclamps-f32 %v1567_v4, 1.0  ;;  %vm1643_vm15 = vcmp.eq.f32.partialorder %v1642_v21, 8.507059e+37 }
 0x21d   :  { %v1637_v42 = vadd.f32 %v2262_v6, %v1636_v24  ;;  %v1879_v54 = vadd.f32 %v3730_v2, %v1878_v20  ;;  %v335_v40 = vmul.f32 0.5, %v3899_v51  ;;  %v337_v0 = vmul.f32 0.5, %v3381_v9 }
 0x21e   :  { %v1712_v56 = vmul.f32 %v1680_v26, %v336_v58  ;;  %1962 = vst [vmem:[#allocation10 + $0x10] sm:$0xff] %v1926_v30  ;;  %v1679_v34 = vadd.f32 1.0, %v2090_v44  ;;  %v1927_v61 = vpop.f32.mrf.mxu3 }
 0x21f   :  { %v1641_v25 = vsel %vm1640_vm14, %v2262_v6, %v1637_v42  ;;  %v1928_v28 = vadd.f32 %v1927_v61, %v1879_v54 }
 0x220   :  { %v1760_v35 = vpack.c.bf16 %v1712_v56, %v1710_v38  ;;  %v1646_v45 = vsel %vm1643_vm15, %v1645_v17, %v1641_v25  ;;  %v1711_v11 = vmul.f32 %v1679_v34, %v335_v40  ;;  %v1881_v63 = vpop.f32.mrf.mxu2 }
 0x221   :  { %v1647_v3 = vmul.f32 %v1646_v45, %v1622_v43  ;;  %1963 = vst [vmem:[#allocation10 + $0x18] sm:$0xff] %v1928_v28  ;;  %v1882_v12 = vadd.f32 %v3730_v2, %v1881_v63 }
 0x222   :  { %1905 = vmatmul.bf16.gmra.mxu2 %v1760_v35 }
 0x223   :  { %v2092_v7 = vclamps-f32 %v1647_v3, 1.0 }
 0x225   :  { %v1681_v49 = vadd.f32 1.0, %v2092_v7 }
 0x226   :  { %v1930_v62 = vpop.f32.mrf.mxu3 }
 0x227   :  { %v1713_v55 = vmul.f32 %v1681_v49, %v337_v0  ;;  %v1931_v31 = vadd.f32 %v1930_v62, %v1882_v12 }
 0x228   :  { %v1883_v14 = vpop.f32.mrf.mxu2 }
 0x229   :  { %v1761_v13 = vpack.c.bf16 %v1713_v55, %v1711_v11  ;;  %1964 = vst [vmem:[#allocation10 + $0x20] sm:$0xff] %v1931_v31  ;;  %v1884_v53 = vadd.f32 %v3730_v2, %v1883_v14 }
 0x22b   :  { %1954 = vmatmul.bf16.gmra.mxu3 %v1761_v13 }
 0x22e   :  { %v1932_v29 = vpop.f32.mrf.mxu3 }
 0x22f   :  { %v1933_v23 = vadd.f32 %v1932_v29, %v1884_v53 }
 0x230   :  { %v1886_v9 = vpop.f32.mrf.mxu2 }
 0x231   :  { %1965 = vst [vmem:[#allocation10 + $0x28] sm:$0xff] %v1933_v23  ;;  %v1887_v22 = vadd.f32 %v3730_v2, %v1886_v9 }
 0x238   :  { %v1888_v60 = vpop.f32.mrf.mxu2 }
 0x239   :  { %v1935_v5 = vpop.f32.mrf.mxu3  ;;  %v1889_v39 = vadd.f32 %v3730_v2, %v1888_v60 }
 0x23a   :  { %v1936_v47 = vadd.f32 %v1935_v5, %v1887_v22 }
 0x23c   :  { %1966 = vst [vmem:[#allocation10 + $0x30] sm:$0xff] %v1936_v47 }
 0x241   :  { %v1937_v6 = vpop.f32.mrf.mxu3 }
 0x242   :  { %v1938_v48 = vadd.f32 %v1937_v6, %v1889_v39 }
 0x244   :  { %1967 = vst [vmem:[#allocation10 + $0x38] sm:$0xff] %v1938_v48 }
 0x24b   :  { %v1891_v57 = vpop.f32.mrf.mxu2 }
 0x24c   :  { %v1892_v32 = vadd.f32 %v3730_v2, %v1891_v57 }
 0x253   :  { %v1893_v46 = vpop.f32.mrf.mxu2 }
 0x254   :  { %v1894_v41 = vadd.f32 %v3730_v2, %v1893_v46 }
 0x25f   :  { %v1940_v15 = vpop.f32.mrf.mxu3 }
 0x260   :  { %v1941_v27 = vadd.f32 %v1940_v15, %v1892_v32 }
 0x262   :  { %1968 = vst [vmem:[#allocation10 + $0x40] sm:$0xff] %v1941_v27 }
 0x267   :  { %v1942_v1 = vpop.f32.mrf.mxu3 }
 0x268   :  { %v1943_v16 = vadd.f32 %v1942_v1, %v1894_v41 }
 0x26a   :  { %1969 = vst [vmem:[#allocation10 + $0x48] sm:$0xff] %v1943_v16 }
 0x26b   :  { %v1896_v33 = vpop.f32.mrf.mxu2 }
 0x26c   :  { %v1897_v37 = vadd.f32 %v3730_v2, %v1896_v33 }
 0x273   :  { %v1898_v18 = vpop.f32.mrf.mxu2 }
 0x274   :  { %v1945_v36 = vpop.f32.mrf.mxu3  ;;  %v1899_v58 = vadd.f32 %v3730_v2, %v1898_v18 }
 0x275   :  { %v1946_v10 = vadd.f32 %v1945_v36, %v1897_v37 }
 0x277   :  { %1970 = vst [vmem:[#allocation10 + $0x50] sm:$0xff] %v1946_v10 }
 0x27c   :  { %v1947_v52 = vpop.f32.mrf.mxu3 }
 0x27d   :  { %v1948_v21 = vadd.f32 %v1947_v52, %v1899_v58 }
 0x27f   :  { %1971 = vst [vmem:[#allocation10 + $0x58] sm:$0xff] %v1948_v21 }
 0x288   :  { %v1901_v8 = vpop.f32.mrf.mxu2 }
 0x289   :  { %v1902_v26 = vadd.f32 %v3730_v2, %v1901_v8 }
 0x290   :  { %v1903_v50 = vpop.f32.mrf.mxu2 }
 0x291   :  { %v1904_v59 = vadd.f32 %v3730_v2, %v1903_v50 }
 0x293   :  { %v1950_v4 = vpop.f32.mrf.mxu3 }
 0x294   :  { %v1951_v24 = vadd.f32 %v1950_v4, %v1902_v26 }
 0x296   :  { %1972 = vst [vmem:[#allocation10 + $0x60] sm:$0xff] %v1951_v24 }
 0x29b   :  { %v1952_v19 = vpop.f32.mrf.mxu3 }
 0x29c   :  { %v1953_v38 = vadd.f32 %v1952_v19, %v1904_v59 }
 0x29e   :  { %1973 = vst [vmem:[#allocation10 + $0x68] sm:$0xff] %v1953_v38 }
 0x2a5   :  { %v1906_v56 = vpop.f32.mrf.mxu2 }
 0x2a6   :  { %v1907_v42 = vadd.f32 %v3730_v2, %v1906_v56 }
 0x2ad   :  { %v1908_v30 = vpop.f32.mrf.mxu2 }
 0x2ae   :  { %v1955_v43 = vpop.f32.mrf.mxu3  ;;  %v1909_v35 = vadd.f32 %v3730_v2, %v1908_v30 }
 0x2af   :  { %v1956_v17 = vadd.f32 %v1955_v43, %v1907_v42 }
 0x2b1   :  { %1974 = vst [vmem:[#allocation10 + $0x70] sm:$0xff] %v1956_v17 }
 0x2b6   :  { %v1957_v44 = vpop.f32.mrf.mxu3 }
 0x2b7   :  { %v1958_v25 = vadd.f32 %v1957_v44, %v1909_v35 }
 0x2b9   :  { %1975 = vst [vmem:[#allocation10 + $0x78] sm:$0xff] %v1958_v25 }
 0x2ba   :  { %1988 = dma.vmem_to_hbm [thread:$0]  %s1981_s15, 2048, %s1983_s18, [#allocation4], %s2392_s26, %s2392_s26, %s2393_s27  }
 0x2bb   :  { %2389 = dma.done.wait [#allocation4], 2048  }
 0x2bc   :  { %2390 = vsyncadd [#allocation4], 4294965248 }
 0x2bd   :  { %1993 = vsyncpa [#allocation3], 1 }
 0x2be   :  { %1994 = vsyncpa [#allocation6], 1 }
 0x2bf   :  { %1995 = vsyncpa [#allocation9], 1 }
 0x2c0   :  { %1996 = vsyncpa [#allocation4], 1 }

</bundles_post_ra>
